<compile_context>
chip_gen: v7x
topology: tpu7x:2x2x1
jax: 0.10.0
libtpu: 0.0.40
codegen_flags: <defaults>
</compile_context>

<pallas_src>
import math

import jax
import jax.numpy as jnp
from jax.experimental import pallas as pl
from jax.experimental.pallas import tpu as pltpu

_INV_SQRT2 = 1.0 / math.sqrt(2.0)


def _uv_head_kernel(x_ref, w1_ref, b1_ref, w2_ref, b2_ref, o_ref):
    """Fused Linear -> GELU(exact) -> Linear(out=1) -> Sigmoid for one row tile.

    x_ref : (TM, H)        activation tile
    w1_ref: (H, H)         dense weight, pre-transposed (x @ w1 == torch x @ W1^T)
    b1_ref: (1, H)         dense bias
    w2_ref: (1, H)         decoder weight row (torch weight shape (1, H))
    b2_ref: (1,)  [SMEM]   decoder bias scalar
    o_ref : (8, TM // 8)   lane-dense per-row sigmoid probabilities
    """
    x = x_ref[...]

    # dense: x @ W1^T + b1  (MXU, f32 accumulate)
    h = jnp.dot(x, w1_ref[...], preferred_element_type=jnp.float32) + b1_ref[...]

    # exact erf GELU (matches torch.nn.GELU default)
    h = 0.5 * h * (1.0 + jax.lax.erf(h * _INV_SQRT2))

    # TODO(synk): dropout is identity at inference (p only affects training).

    # decoder (out_features=1): VPU multiply + lane reduction instead of an
    # N=1 MXU matmul that would waste 127/255 of the systolic array columns.
    logits = jnp.sum(h * w2_ref[...], axis=-1)              # (TM,)

    # relayout per-row scalars into the lane-dense (8, TM//8) output block,
    # then finish bias + sigmoid on dense vregs.
    logits = logits.reshape(o_ref.shape) + b2_ref[0]
    o_ref[...] = jax.nn.sigmoid(logits).astype(o_ref.dtype)


def urban_village_detection_head(hidden_states, w1, b1, w2, b2, *, tm=1024):
    """hidden_states: (B, S, H) -> (B, S, 1) sigmoid probabilities.

    w1: (H, H), b1: (H,)  -- nn.Linear(H, H)
    w2: (1, H), b2: (1,)  -- nn.Linear(H, 1)
    """
    B, S, H = hidden_states.shape
    M = B * S
    assert tm % 8 == 0, "row tile must be a multiple of 8 (sublane count)"

    num_tiles = -(-M // tm)            # ceil-div; tail is padded, not asserted
    m_pad = num_tiles * tm
    lanes = tm // 8

    x2d = hidden_states.reshape(M, H)
    if m_pad != M:
        x2d = jnp.pad(x2d, ((0, m_pad - M), (0, 0)))

    w1_t = w1.T                        # (H, H): x @ w1_t == torch x @ W1^T
    b1_r = b1.reshape(1, H)
    w2_r = w2.reshape(1, H)            # decoder weight as a broadcastable row
    b2_s = b2.reshape(1)               # scalar bias -> SMEM

    out = pl.pallas_call(
        _uv_head_kernel,
        out_shape=jax.ShapeDtypeStruct((num_tiles * 8, lanes),
                                       hidden_states.dtype),
        grid_spec=pltpu.PrefetchScalarGridSpec(
            num_scalar_prefetch=0,
            grid=(num_tiles,),
            in_specs=[
                pl.BlockSpec((tm, H), lambda i: (i, 0)),   # activation tile
                pl.BlockSpec((H, H), lambda i: (0, 0)),    # w1 (resident)
                pl.BlockSpec((1, H), lambda i: (0, 0)),    # b1 (resident)
                pl.BlockSpec((1, H), lambda i: (0, 0)),    # w2 row (resident)
                pl.BlockSpec(memory_space=pltpu.MemorySpace.SMEM),  # b2 scalar
            ],
            out_specs=pl.BlockSpec((8, lanes), lambda i: (i, 0)),
        ),
        compiler_params=pltpu.CompilerParams(
            dimension_semantics=("parallel",)),
    )(x2d, w1_t, b1_r, w2_r, b2_s)

    # (num_tiles*8, tm//8) flattens row-major back to token order exactly.
    return out.reshape(-1)[:M].reshape(B, S, 1)


if __name__ == "__main__":
    # config: hidden_size=32, fdrop=0.1 (dropout is identity at inference)
    B, S, H = 2, 8, 32

    key = jax.random.PRNGKey(0)
    k_x, k_w1, k_b1, k_w2, k_b2 = jax.random.split(key, 5)

    hidden_states = jax.random.normal(k_x, (B, S, H), dtype=jnp.float32)

    # nn.Linear(H, H): weight (H, H), bias (H,)
    w1 = jax.random.normal(k_w1, (H, H), dtype=jnp.float32) * 0.05
    b1 = jax.random.normal(k_b1, (H,), dtype=jnp.float32) * 0.05
    # nn.Linear(H, 1): weight (1, H), bias (1,)
    w2 = jax.random.normal(k_w2, (1, H), dtype=jnp.float32) * 0.05
    b2 = jax.random.normal(k_b2, (1,), dtype=jnp.float32) * 0.05

    # reference (plain JAX, same math path as the torch module in eval mode)
    h_ref = hidden_states.reshape(-1, H) @ w1.T + b1
    h_ref = 0.5 * h_ref * (1.0 + jax.lax.erf(h_ref * _INV_SQRT2))
    ref = jax.nn.sigmoid(h_ref @ w2.T + b2).reshape(B, S, 1)

    # default large tile: exercises the tail-padding path (16 tokens -> 1024 rows)
    out = urban_village_detection_head(hidden_states, w1, b1, w2, b2)
    out = jax.block_until_ready(out)
    assert out.shape == (B, S, 1)
    assert jnp.allclose(out, ref, atol=1e-5, rtol=1e-5)

    # small tile: exercises a multi-step grid (2 tiles of 8 rows)
    out_small = urban_village_detection_head(hidden_states, w1, b1, w2, b2, tm=8)
    out_small = jax.block_until_ready(out_small)
    assert jnp.allclose(out_small, ref, atol=1e-5, rtol=1e-5)

    print("KERNEL_OK")
</pallas_src>

<mosaic_0001>
module attributes {stable_mosaic.version = 11 : i64} {
  func.func @_uv_head_kernel(%arg0: i32, %arg1: memref<1024x32xf32, #tpu.memory_space<vmem>>, %arg2: memref<32x32xf32, #tpu.memory_space<vmem>>, %arg3: memref<1x32xf32, #tpu.memory_space<vmem>>, %arg4: memref<1x32xf32, #tpu.memory_space<vmem>>, %arg5: memref<1xf32, #tpu.memory_space<smem>>, %arg6: memref<8x128xf32, #tpu.memory_space<vmem>>) attributes {dimension_semantics = [#tpu.dimension_semantics<parallel>], iteration_bounds = array<i64: 1>, scalar_prefetch = 0 : i64, scratch_operands = 0 : i64, tpu.core_type = #tpu.core_type<tc>, window_params = [{transform_indices = @transform_0, window_bounds = array<i64: 1024, 32>}, {pipeline_mode = #tpu.pipeline_mode<synchronous>, transform_indices = @transform_1, window_bounds = array<i64: 32, 32>}, {pipeline_mode = #tpu.pipeline_mode<synchronous>, transform_indices = @transform_2, window_bounds = array<i64: 1, 32>}, {pipeline_mode = #tpu.pipeline_mode<synchronous>, transform_indices = @transform_3, window_bounds = array<i64: 1, 32>}, {transform_indices = @transform_4, window_bounds = array<i64: 1>}, {transform_indices = @transform_5, window_bounds = array<i64: 8, 128>}]} {
    %c0 = arith.constant 0 : index
    %c0_0 = arith.constant 0 : index
    %0 = vector.load %arg1[%c0, %c0_0] : memref<1024x32xf32, #tpu.memory_space<vmem>>, vector<1024x32xf32>
    %c0_1 = arith.constant 0 : index
    %c0_2 = arith.constant 0 : index
    %1 = vector.load %arg2[%c0_1, %c0_2] : memref<32x32xf32, #tpu.memory_space<vmem>>, vector<32x32xf32>
    %cst = arith.constant dense<0.000000e+00> : vector<1024x32xf32>
    %2 = tpu.matmul %0, %1, %cst {dimension_numbers = #tpu.dot_dimension_numbers<[1], [0], [0], [1], [0, 0, 1, 1], [], []>} : vector<1024x32xf32>, vector<32x32xf32>, vector<1024x32xf32> -> vector<1024x32xf32>
    %c0_3 = arith.constant 0 : index
    %c0_4 = arith.constant 0 : index
    %3 = vector.load %arg3[%c0_3, %c0_4] : memref<1x32xf32, #tpu.memory_space<vmem>>, vector<1x32xf32>
    %4 = vector.broadcast %3 : vector<1x32xf32> to vector<1024x32xf32>
    %5 = arith.addf %2, %4 : vector<1024x32xf32>
    %cst_5 = arith.constant 5.000000e-01 : f32
    %6 = vector.broadcast %cst_5 : f32 to vector<1024x32xf32>
    %7 = arith.mulf %6, %5 : vector<1024x32xf32>
    %cst_6 = arith.constant 0.707106769 : f32
    %8 = vector.broadcast %cst_6 : f32 to vector<1024x32xf32>
    %9 = arith.mulf %5, %8 : vector<1024x32xf32>
    %10 = math.erf %9 : vector<1024x32xf32>
    %cst_7 = arith.constant 1.000000e+00 : f32
    %11 = vector.broadcast %cst_7 : f32 to vector<1024x32xf32>
    %12 = arith.addf %11, %10 : vector<1024x32xf32>
    %13 = arith.mulf %7, %12 : vector<1024x32xf32>
    %c0_8 = arith.constant 0 : index
    %c0_9 = arith.constant 0 : index
    %14 = vector.load %arg4[%c0_8, %c0_9] : memref<1x32xf32, #tpu.memory_space<vmem>>, vector<1x32xf32>
    %15 = vector.broadcast %14 : vector<1x32xf32> to vector<1024x32xf32>
    %16 = arith.mulf %13, %15 : vector<1024x32xf32>
    %cst_10 = arith.constant dense<0.000000e+00> : vector<1024xf32>
    %17 = vector.multi_reduction <add>, %16, %cst_10 [1] : vector<1024x32xf32> to vector<1024xf32>
    %18 = vector.shape_cast %17 : vector<1024xf32> to vector<8x128xf32>
    %c0_11 = arith.constant 0 : index
    %19 = memref.load %arg5[%c0_11] : memref<1xf32, #tpu.memory_space<smem>>
    %20 = vector.broadcast %19 : f32 to vector<8x128xf32>
    %21 = arith.addf %18, %20 : vector<8x128xf32>
    %22 = arith.negf %21 : vector<8x128xf32>
    %23 = math.exp %22 : vector<8x128xf32>
    %cst_12 = arith.constant 1.000000e+00 : f32
    %24 = vector.broadcast %cst_12 : f32 to vector<8x128xf32>
    %25 = arith.addf %24, %23 : vector<8x128xf32>
    %26 = arith.divf %24, %25 : vector<8x128xf32>
    %c0_13 = arith.constant 0 : index
    %c0_14 = arith.constant 0 : index
    %27 = vector.load %arg6[%c0_13, %c0_14] : memref<8x128xf32, #tpu.memory_space<vmem>>, vector<8x128xf32>
    tpu.vector_store %arg6[%c0_13, %c0_14], %26 {strides = array<i32>} : memref<8x128xf32, #tpu.memory_space<vmem>>, vector<8x128xf32>,
    return
  }
  func.func @transform_0(%arg0: i32) -> (i32, i32) {
    %c0_i32 = arith.constant 0 : i32
    %c0_i32_0 = arith.constant 0 : i32
    return %arg0, %c0_i32 : i32, i32
  }
  func.func @transform_1(%arg0: i32) -> (i32, i32) {
    %c0_i32 = arith.constant 0 : i32
    %c0_i32_0 = arith.constant 0 : i32
    %c0_i32_1 = arith.constant 0 : i32
    return %c0_i32, %c0_i32_0 : i32, i32
  }
  func.func @transform_2(%arg0: i32) -> (i32, i32) {
    %c0_i32 = arith.constant 0 : i32
    %c0_i32_0 = arith.constant 0 : i32
    %c0_i32_1 = arith.constant 0 : i32
    return %c0_i32, %c0_i32_0 : i32, i32
  }
  func.func @transform_3(%arg0: i32) -> (i32, i32) {
    %c0_i32 = arith.constant 0 : i32
    %c0_i32_0 = arith.constant 0 : i32
    %c0_i32_1 = arith.constant 0 : i32
    return %c0_i32, %c0_i32_0 : i32, i32
  }
  func.func @transform_4(%arg0: i32) -> i32 {
    %c0_i32 = arith.constant 0 : i32
    %c0_i32_0 = arith.constant 0 : i32
    return %c0_i32 : i32
  }
  func.func @transform_5(%arg0: i32) -> (i32, i32) {
    %c0_i32 = arith.constant 0 : i32
    %c0_i32_0 = arith.constant 0 : i32
    return %arg0, %c0_i32 : i32, i32
  }
}

</mosaic_0001>

<bundles_post_ra>
// kernel: tpu_custom_call.1
= control target key start
LH: loop header
LB: loop body
LE: loop exit
PB: predicated region body
PF: predicated region fallthrough
CT: control target
= control target key end

     0   :  { %vm161_vm0 = vcmask 261120   ;;  %s8754_s0 = inlined_call_operand.vmem [shape: f32[1024,32], index: 0, kind: input, shape index: {}]   ;;  %s8755_s1 = inlined_call_operand.vmem [shape: f32[32,32], index: 1, kind: input, shape index: {}]   ;;  %s8756_s2 = inlined_call_operand.vmem [shape: f32[1,32], index: 2, kind: input, shape index: {}]   ;;  %s8757_s3 = inlined_call_operand.vmem [shape: f32[1,32], index: 3, kind: input, shape index: {}]   ;;  %s8758_s4 = inlined_call_operand.<no memory space> [shape: f32[1], index: 4, kind: input, shape index: {}]   ;;  %s8759_s5 = inlined_call_operand.hbm [shape: f32[8,128], index: 5, kind: output, shape index: {}]  }
   0x1   :  { %v150_v0 = vld [vmem:[%s8755_s1] sm:$0xff]  ;;  %v151_v1 = vld [vmem:[%s8755_s1 + $0x8] sm:$0xff]  ;;  %v152_v2 = vld [vmem:[%s8755_s1 + $0x10] sm:$0xff] }
   0x2   :  { %v4720_v3 = vpack.c.bf16 %v151_v1, %v150_v0  ;;  %v153_v4 = vld [vmem:[%s8755_s1 + $0x18] sm:$0xff]  ;;  %v22_v5 = vld [vmem:[%s8754_s0] sm:$0xff]  ;;  %v23_v8 = vld [vmem:[%s8754_s0 + $0x8] sm:$0xff] }
   0x3   :  { %v86_v6 = vld [vmem:[%s8754_s0 + $0x200] sm:$0xff]  ;;  %v4724_v7 = vpack.c.bf16 %v153_v4, %v152_v2  ;;  %4528 = vmatprep.mubr.msk.f32.mxu0 %vm161_vm0, %v22_v5  ;;  %v87_v9 = vld [vmem:[%s8754_s0 + $0x208] sm:$0xff]  ;;  %v24_v10 = vld [vmem:[%s8754_s0 + $0x10] sm:$0xff] }
   0x4   :  { %4624 = vmatprep.mubr.msk.f32.mxu1 %vm161_vm0, %v86_v6  ;;  %4721 = vmatprep.subr.bf16.mxu0 %v4720_v3  ;;  %v88_v11 = vld [vmem:[%s8754_s0 + $0x210] sm:$0xff]  ;;  %v25_v12 = vld [vmem:[%s8754_s0 + $0x18] sm:$0xff]  ;;  %v26_v14 = vld [vmem:[%s8754_s0 + $0x20] sm:$0xff] }
   0x5   :  { %4728 = vmatprep.subr.bf16.mxu1 %v4720_v3  ;;  %4723 = vmatpush3.bf16.msra.mxu0 %v4720_v3  ;;  %v89_v13 = vld [vmem:[%s8754_s0 + $0x218] sm:$0xff]  ;;  %v90_v15 = vld [vmem:[%s8754_s0 + $0x220] sm:$0xff]  ;;  %v27_v16 = vld [vmem:[%s8754_s0 + $0x28] sm:$0xff] }
   0x6   :  { %4730 = vmatpush3.bf16.msra.mxu1 %v4720_v3  ;;  %4725 = vmatprep.subr.bf16.mxu0 %v4724_v7  ;;  %v91_v17 = vld [vmem:[%s8754_s0 + $0x228] sm:$0xff]  ;;  %v28_v18 = vld [vmem:[%s8754_s0 + $0x30] sm:$0xff]  ;;  %v29_v20 = vld [vmem:[%s8754_s0 + $0x38] sm:$0xff] }
   0x7   :  { %4729 = vmatprep.subr.bf16.mxu1 %v4724_v7  ;;  %v92_v19 = vld [vmem:[%s8754_s0 + $0x230] sm:$0xff]  ;;  %v93_v21 = vld [vmem:[%s8754_s0 + $0x238] sm:$0xff]  ;;  %v30_v22 = vld [vmem:[%s8754_s0 + $0x40] sm:$0xff] }
   0x8   :  { %v94_v23 = vld [vmem:[%s8754_s0 + $0x240] sm:$0xff]  ;;  %v31_v24 = vld [vmem:[%s8754_s0 + $0x48] sm:$0xff]  ;;  %v32_v26 = vld [vmem:[%s8754_s0 + $0x50] sm:$0xff] }
   0x9   :  { %4727 = vmatpush3.bf16.msra.mxu0 %v4724_v7  ;;  %v95_v25 = vld [vmem:[%s8754_s0 + $0x248] sm:$0xff]  ;;  %v96_v27 = vld [vmem:[%s8754_s0 + $0x250] sm:$0xff]  ;;  %v33_v28 = vld [vmem:[%s8754_s0 + $0x58] sm:$0xff] }
   0xa   :  { %4731 = vmatpush3.bf16.msra.mxu1 %v4724_v7  ;;  %v97_v29 = vld [vmem:[%s8754_s0 + $0x258] sm:$0xff]  ;;  %v34_v30 = vld [vmem:[%s8754_s0 + $0x60] sm:$0xff]  ;;  %v35_v32 = vld [vmem:[%s8754_s0 + $0x68] sm:$0xff] }
   0xb   :  { %v98_v31 = vld [vmem:[%s8754_s0 + $0x260] sm:$0xff]  ;;  %v99_v33 = vld [vmem:[%s8754_s0 + $0x268] sm:$0xff]  ;;  %v36_v34 = vld [vmem:[%s8754_s0 + $0x70] sm:$0xff] }
   0xc   :  { %4529 = vmatmul.mubr.msk.f32.vlgmr.msra.gmra.mrb[0].mxu0 %vm161_vm0, %v23_v8  ;;  %v100_v35 = vld [vmem:[%s8754_s0 + $0x270] sm:$0xff]  ;;  %v37_v36 = vld [vmem:[%s8754_s0 + $0x78] sm:$0xff]  ;;  %v38_v38 = vld [vmem:[%s8754_s0 + $0x80] sm:$0xff] }
   0xd   :  { %4625 = vmatmul.mubr.msk.f32.vlgmr.msra.gmra.mrb[0].mxu1 %vm161_vm0, %v87_v9  ;;  %4531 = vmatprep.mubr.msk.f32.mxu0 %vm161_vm0, %v24_v10  ;;  %v101_v37 = vld [vmem:[%s8754_s0 + $0x278] sm:$0xff]  ;;  %v102_v39 = vld [vmem:[%s8754_s0 + $0x280] sm:$0xff]  ;;  %v39_v40 = vld [vmem:[%s8754_s0 + $0x88] sm:$0xff] }
   0xe   :  { %4627 = vmatprep.mubr.msk.f32.mxu1 %vm161_vm0, %v88_v11  ;;  %v103_v41 = vld [vmem:[%s8754_s0 + $0x288] sm:$0xff] }
  0x10   :  { %4532 = vmatmul.mubr.msk.f32.gmra.mrb[2].mxu0 %vm161_vm0, %v25_v12 }
  0x11   :  { %4628 = vmatmul.mubr.msk.f32.gmra.mrb[2].mxu1 %vm161_vm0, %v89_v13  ;;  %4534 = vmatprep.mubr.msk.f32.mxu0 %vm161_vm0, %v26_v14 }
  0x12   :  { %4630 = vmatprep.mubr.msk.f32.mxu1 %vm161_vm0, %v90_v15 }
  0x14   :  { %4535 = vmatmul.mubr.msk.f32.gmra.mrb[4].mxu0 %vm161_vm0, %v27_v16 }
  0x15   :  { %4631 = vmatmul.mubr.msk.f32.gmra.mrb[4].mxu1 %vm161_vm0, %v91_v17  ;;  %4537 = vmatprep.mubr.msk.f32.mxu0 %vm161_vm0, %v28_v18 }
  0x16   :  { %4633 = vmatprep.mubr.msk.f32.mxu1 %vm161_vm0, %v92_v19 }
  0x18   :  { %4538 = vmatmul.mubr.msk.f32.gmra.mrb[6].mxu0 %vm161_vm0, %v29_v20 }
  0x19   :  { %4634 = vmatmul.mubr.msk.f32.gmra.mrb[6].mxu1 %vm161_vm0, %v93_v21  ;;  %4540 = vmatprep.mubr.msk.f32.mxu0 %vm161_vm0, %v30_v22 }
  0x1a   :  { %4636 = vmatprep.mubr.msk.f32.mxu1 %vm161_vm0, %v94_v23 }
  0x1c   :  { %4541 = vmatmul.mubr.msk.f32.gmra.mrb[8].mxu0 %vm161_vm0, %v31_v24 }
  0x1d   :  { %4637 = vmatmul.mubr.msk.f32.gmra.mrb[8].mxu1 %vm161_vm0, %v95_v25  ;;  %4543 = vmatprep.mubr.msk.f32.mxu0 %vm161_vm0, %v32_v26 }
  0x1e   :  { %4639 = vmatprep.mubr.msk.f32.mxu1 %vm161_vm0, %v96_v27 }
  0x20   :  { %4544 = vmatmul.mubr.msk.f32.gmra.mrb[10].mxu0 %vm161_vm0, %v33_v28 }
  0x21   :  { %4640 = vmatmul.mubr.msk.f32.gmra.mrb[10].mxu1 %vm161_vm0, %v97_v29  ;;  %4546 = vmatprep.mubr.msk.f32.mxu0 %vm161_vm0, %v34_v30 }
  0x22   :  { %4642 = vmatprep.mubr.msk.f32.mxu1 %vm161_vm0, %v98_v31 }
  0x24   :  { %4547 = vmatmul.mubr.msk.f32.gmra.mrb[12].mxu0 %vm161_vm0, %v35_v32 }
  0x25   :  { %4643 = vmatmul.mubr.msk.f32.gmra.mrb[12].mxu1 %vm161_vm0, %v99_v33  ;;  %4549 = vmatprep.mubr.msk.f32.mxu0 %vm161_vm0, %v36_v34 }
  0x26   :  { %4645 = vmatprep.mubr.msk.f32.mxu1 %vm161_vm0, %v100_v35 }
  0x28   :  { %4550 = vmatmul.mubr.msk.f32.gmra.mrb[14].mxu0 %vm161_vm0, %v37_v36 }
  0x29   :  { %4646 = vmatmul.mubr.msk.f32.gmra.mrb[14].mxu1 %vm161_vm0, %v101_v37  ;;  %4552 = vmatprep.mubr.msk.f32.mxu0 %vm161_vm0, %v38_v38 }
  0x2a   :  { %4648 = vmatprep.mubr.msk.f32.mxu1 %vm161_vm0, %v102_v39 }
  0x2b   :  { %11 = vsyncpa [#allocation4], 0  ;;  %v40_v42 = vld [vmem:[%s8754_s0 + $0x90] sm:$0xff]  ;;  %v41_v44 = vld [vmem:[%s8754_s0 + $0x98] sm:$0xff]  ;;  %vm3447_vm1 = vcmask 130112   ;;  %vm3454_vm2 = vcmask 195712  }
  0x2c   :  { %v104_v43 = vld [vmem:[%s8754_s0 + $0x290] sm:$0xff]  ;;  %4553 = vmatmul.mubr.msk.f32.gmra.mrb[16].mxu0 %vm161_vm0, %v39_v40  ;;  %v105_v45 = vld [vmem:[%s8754_s0 + $0x298] sm:$0xff]  ;;  %v42_v46 = vld [vmem:[%s8754_s0 + $0xa0] sm:$0xff]  ;;  %vm3461_vm3 = vcmask 261312   ;;  %vm3468_vm4 = vcmask 326912   ;;  %vm3475_vm5 = vcmask 392512  }
  0x2d   :  { %4649 = vmatmul.mubr.msk.f32.gmra.mrb[16].mxu1 %vm161_vm0, %v103_v41  ;;  %4555 = vmatprep.mubr.msk.f32.mxu0 %vm161_vm0, %v40_v42  ;;  %v106_v47 = vld [vmem:[%s8754_s0 + $0x2a0] sm:$0xff]  ;;  %v43_v48 = vld [vmem:[%s8754_s0 + $0xa8] sm:$0xff]  ;;  %v44_v50 = vld [vmem:[%s8754_s0 + $0xb0] sm:$0xff]  ;;  %vm3482_vm6 = vcmask 458112   ;;  %vm3489_vm7 = vcmask 523712   ;;  %vm3496_vm8 = vcmask 589312  }
  0x2e   :  { %4651 = vmatprep.mubr.msk.f32.mxu1 %vm161_vm0, %v104_v43  ;;  %v107_v49 = vld [vmem:[%s8754_s0 + $0x2a8] sm:$0xff]  ;;  %v108_v51 = vld [vmem:[%s8754_s0 + $0x2b0] sm:$0xff]  ;;  %v45_v52 = vld [vmem:[%s8754_s0 + $0xb8] sm:$0xff]  ;;  %vm3503_vm9 = vcmask 654912   ;;  %vm3510_vm10 = vcmask 720512   ;;  %vm3517_vm11 = vcmask 786112  }
  0x2f   :  { %v109_v53 = vld [vmem:[%s8754_s0 + $0x2b8] sm:$0xff]  ;;  %v46_v54 = vld [vmem:[%s8754_s0 + $0xc0] sm:$0xff]  ;;  %v47_v56 = vld [vmem:[%s8754_s0 + $0xc8] sm:$0xff]  ;;  %vm3524_vm12 = vcmask 851712   ;;  %vm3531_vm13 = vcmask 917312   ;;  %vm3538_vm14 = vcmask 982912  }
  0x30   :  { %4556 = vmatmul.mubr.msk.f32.gmra.mrb[18].mxu0 %vm161_vm0, %v41_v44  ;;  %v110_v55 = vld [vmem:[%s8754_s0 + $0x2c0] sm:$0xff]  ;;  %v111_v57 = vld [vmem:[%s8754_s0 + $0x2c8] sm:$0xff]  ;;  %v48_v58 = vld [vmem:[%s8754_s0 + $0xd0] sm:$0xff]  ;;  %vm3545_vm15 = vcmask 1048512  }
  0x31   :  { %4652 = vmatmul.mubr.msk.f32.gmra.mrb[18].mxu1 %vm161_vm0, %v105_v45  ;;  %4558 = vmatprep.mubr.msk.f32.mxu0 %vm161_vm0, %v42_v46  ;;  %v112_v59 = vld [vmem:[%s8754_s0 + $0x2d0] sm:$0xff]  ;;  %v49_v60 = vld [vmem:[%s8754_s0 + $0xd8] sm:$0xff]  ;;  %v50_v62 = vld [vmem:[%s8754_s0 + $0xe0] sm:$0xff] }
  0x32   :  { %4654 = vmatprep.mubr.msk.f32.mxu1 %vm161_vm0, %v106_v47  ;;  %v113_v61 = vld [vmem:[%s8754_s0 + $0x2d8] sm:$0xff]  ;;  %v114_v63 = vld [vmem:[%s8754_s0 + $0x2e0] sm:$0xff]  ;;  %v51_v0 = vld [vmem:[%s8754_s0 + $0xe8] sm:$0xff] }
  0x33   :  { %v115_v1 = vld [vmem:[%s8754_s0 + $0x2e8] sm:$0xff]  ;;  %v52_v2 = vld [vmem:[%s8754_s0 + $0xf0] sm:$0xff]  ;;  %v53_v4 = vld [vmem:[%s8754_s0 + $0xf8] sm:$0xff] }
  0x34   :  { %4559 = vmatmul.mubr.msk.f32.gmra.mrb[20].mxu0 %vm161_vm0, %v43_v48  ;;  %v116_v3 = vld [vmem:[%s8754_s0 + $0x2f0] sm:$0xff]  ;;  %v117_v5 = vld [vmem:[%s8754_s0 + $0x2f8] sm:$0xff]  ;;  %v54_v6 = vld [vmem:[%s8754_s0 + $0x100] sm:$0xff] }
  0x35   :  { %4655 = vmatmul.mubr.msk.f32.gmra.mrb[20].mxu1 %vm161_vm0, %v107_v49  ;;  %4561 = vmatprep.mubr.msk.f32.mxu0 %vm161_vm0, %v44_v50  ;;  %v118_v7 = vld [vmem:[%s8754_s0 + $0x300] sm:$0xff]  ;;  %v55_v8 = vld [vmem:[%s8754_s0 + $0x108] sm:$0xff]  ;;  %v56_v10 = vld [vmem:[%s8754_s0 + $0x110] sm:$0xff] }
  0x36   :  { %4657 = vmatprep.mubr.msk.f32.mxu1 %vm161_vm0, %v108_v51  ;;  %v119_v9 = vld [vmem:[%s8754_s0 + $0x308] sm:$0xff]  ;;  %v120_v11 = vld [vmem:[%s8754_s0 + $0x310] sm:$0xff]  ;;  %v57_v12 = vld [vmem:[%s8754_s0 + $0x118] sm:$0xff] }
  0x37   :  { %v121_v13 = vld [vmem:[%s8754_s0 + $0x318] sm:$0xff]  ;;  %v58_v14 = vld [vmem:[%s8754_s0 + $0x120] sm:$0xff]  ;;  %v59_v16 = vld [vmem:[%s8754_s0 + $0x128] sm:$0xff] }
  0x38   :  { %4562 = vmatmul.mubr.msk.f32.gmra.mrb[22].mxu0 %vm161_vm0, %v45_v52  ;;  %v122_v15 = vld [vmem:[%s8754_s0 + $0x320] sm:$0xff]  ;;  %v123_v17 = vld [vmem:[%s8754_s0 + $0x328] sm:$0xff]  ;;  %v60_v18 = vld [vmem:[%s8754_s0 + $0x130] sm:$0xff] }
  0x39   :  { %4658 = vmatmul.mubr.msk.f32.gmra.mrb[22].mxu1 %vm161_vm0, %v109_v53  ;;  %4564 = vmatprep.mubr.msk.f32.mxu0 %vm161_vm0, %v46_v54  ;;  %v124_v19 = vld [vmem:[%s8754_s0 + $0x330] sm:$0xff]  ;;  %v61_v20 = vld [vmem:[%s8754_s0 + $0x138] sm:$0xff]  ;;  %v62_v22 = vld [vmem:[%s8754_s0 + $0x140] sm:$0xff] }
  0x3a   :  { %4660 = vmatprep.mubr.msk.f32.mxu1 %vm161_vm0, %v110_v55  ;;  %v125_v21 = vld [vmem:[%s8754_s0 + $0x338] sm:$0xff]  ;;  %v126_v23 = vld [vmem:[%s8754_s0 + $0x340] sm:$0xff]  ;;  %v63_v24 = vld [vmem:[%s8754_s0 + $0x148] sm:$0xff] }
  0x3b   :  { %v127_v25 = vld [vmem:[%s8754_s0 + $0x348] sm:$0xff]  ;;  %v64_v26 = vld [vmem:[%s8754_s0 + $0x150] sm:$0xff]  ;;  %v65_v28 = vld [vmem:[%s8754_s0 + $0x158] sm:$0xff] }
  0x3c   :  { %4565 = vmatmul.mubr.msk.f32.gmra.mrb[24].mxu0 %vm161_vm0, %v47_v56  ;;  %v128_v27 = vld [vmem:[%s8754_s0 + $0x350] sm:$0xff]  ;;  %v129_v29 = vld [vmem:[%s8754_s0 + $0x358] sm:$0xff]  ;;  %v66_v30 = vld [vmem:[%s8754_s0 + $0x160] sm:$0xff] }
  0x3d   :  { %4661 = vmatmul.mubr.msk.f32.gmra.mrb[24].mxu1 %vm161_vm0, %v111_v57  ;;  %4567 = vmatprep.mubr.msk.f32.mxu0 %vm161_vm0, %v48_v58  ;;  %v130_v31 = vld [vmem:[%s8754_s0 + $0x360] sm:$0xff]  ;;  %v67_v32 = vld [vmem:[%s8754_s0 + $0x168] sm:$0xff]  ;;  %v68_v34 = vld [vmem:[%s8754_s0 + $0x170] sm:$0xff] }
  0x3e   :  { %4663 = vmatprep.mubr.msk.f32.mxu1 %vm161_vm0, %v112_v59  ;;  %v131_v33 = vld [vmem:[%s8754_s0 + $0x368] sm:$0xff]  ;;  %v132_v35 = vld [vmem:[%s8754_s0 + $0x370] sm:$0xff]  ;;  %v69_v36 = vld [vmem:[%s8754_s0 + $0x178] sm:$0xff] }
  0x3f   :  { %v133_v37 = vld [vmem:[%s8754_s0 + $0x378] sm:$0xff]  ;;  %v70_v38 = vld [vmem:[%s8754_s0 + $0x180] sm:$0xff]  ;;  %v71_v40 = vld [vmem:[%s8754_s0 + $0x188] sm:$0xff] }
  0x40   :  { %4568 = vmatmul.mubr.msk.f32.gmra.mrb[26].mxu0 %vm161_vm0, %v49_v60  ;;  %v134_v39 = vld [vmem:[%s8754_s0 + $0x380] sm:$0xff]  ;;  %v135_v41 = vld [vmem:[%s8754_s0 + $0x388] sm:$0xff]  ;;  %v72_v42 = vld [vmem:[%s8754_s0 + $0x190] sm:$0xff] }
  0x41   :  { %4664 = vmatmul.mubr.msk.f32.gmra.mrb[26].mxu1 %vm161_vm0, %v113_v61  ;;  %4570 = vmatprep.mubr.msk.f32.mxu0 %vm161_vm0, %v50_v62  ;;  %v136_v43 = vld [vmem:[%s8754_s0 + $0x390] sm:$0xff]  ;;  %v73_v44 = vld [vmem:[%s8754_s0 + $0x198] sm:$0xff]  ;;  %v74_v46 = vld [vmem:[%s8754_s0 + $0x1a0] sm:$0xff] }
  0x42   :  { %4666 = vmatprep.mubr.msk.f32.mxu1 %vm161_vm0, %v114_v63  ;;  %v137_v45 = vld [vmem:[%s8754_s0 + $0x398] sm:$0xff]  ;;  %v138_v47 = vld [vmem:[%s8754_s0 + $0x3a0] sm:$0xff]  ;;  %v75_v48 = vld [vmem:[%s8754_s0 + $0x1a8] sm:$0xff] }
  0x43   :  { %v139_v49 = vld [vmem:[%s8754_s0 + $0x3a8] sm:$0xff]  ;;  %v76_v50 = vld [vmem:[%s8754_s0 + $0x1b0] sm:$0xff]  ;;  %v77_v52 = vld [vmem:[%s8754_s0 + $0x1b8] sm:$0xff] }
  0x44   :  { %4571 = vmatmul.mubr.msk.f32.gmra.mrb[28].mxu0 %vm161_vm0, %v51_v0  ;;  %v140_v51 = vld [vmem:[%s8754_s0 + $0x3b0] sm:$0xff]  ;;  %v141_v53 = vld [vmem:[%s8754_s0 + $0x3b8] sm:$0xff]  ;;  %v78_v54 = vld [vmem:[%s8754_s0 + $0x1c0] sm:$0xff] }
  0x45   :  { %4667 = vmatmul.mubr.msk.f32.gmra.mrb[28].mxu1 %vm161_vm0, %v115_v1  ;;  %4573 = vmatprep.mubr.msk.f32.mxu0 %vm161_vm0, %v52_v2  ;;  %v142_v55 = vld [vmem:[%s8754_s0 + $0x3c0] sm:$0xff]  ;;  %v79_v56 = vld [vmem:[%s8754_s0 + $0x1c8] sm:$0xff]  ;;  %v80_v58 = vld [vmem:[%s8754_s0 + $0x1d0] sm:$0xff] }
  0x46   :  { %4669 = vmatprep.mubr.msk.f32.mxu1 %vm161_vm0, %v116_v3  ;;  %v143_v57 = vld [vmem:[%s8754_s0 + $0x3c8] sm:$0xff]  ;;  %v144_v59 = vld [vmem:[%s8754_s0 + $0x3d0] sm:$0xff]  ;;  %v81_v60 = vld [vmem:[%s8754_s0 + $0x1d8] sm:$0xff] }
  0x47   :  { %v145_v61 = vld [vmem:[%s8754_s0 + $0x3d8] sm:$0xff]  ;;  %v146_v62 = vld [vmem:[%s8754_s0 + $0x3e0] sm:$0xff]  ;;  %v147_v0 = vld [vmem:[%s8754_s0 + $0x3e8] sm:$0xff] }
  0x48   :  { %4574 = vmatmul.mubr.msk.f32.gmra.mrb[30].mxu0 %vm161_vm0, %v53_v4  ;;  %v82_v63 = vld [vmem:[%s8754_s0 + $0x1e0] sm:$0xff]  ;;  %v83_v1 = vld [vmem:[%s8754_s0 + $0x1e8] sm:$0xff]  ;;  %v84_v2 = vld [vmem:[%s8754_s0 + $0x1f0] sm:$0xff] }
  0x49   :  { %4670 = vmatmul.mubr.msk.f32.gmra.mrb[30].mxu1 %vm161_vm0, %v117_v5  ;;  %4576 = vmatprep.mubr.msk.f32.mxu0 %vm161_vm0, %v54_v6  ;;  %v148_v3 = vld [vmem:[%s8754_s0 + $0x3f0] sm:$0xff]  ;;  %v85_v4 = vld [vmem:[%s8754_s0 + $0x1f8] sm:$0xff]  ;;  %v6089_v6 = vld [vmem:[%s8756_s2] ss:$0 sm:$0xff] }
  0x4a   :  { %4672 = vmatprep.mubr.msk.f32.mxu1 %vm161_vm0, %v118_v7  ;;  %v149_v5 = vld [vmem:[%s8754_s0 + $0x3f8] sm:$0xff] }
  0x4c   :  { %4577 = vmatmul.mubr.msk.f32.gmra.mrb[32].mxu0 %vm161_vm0, %v55_v8 }
  0x4d   :  { %4673 = vmatmul.mubr.msk.f32.gmra.mrb[32].mxu1 %vm161_vm0, %v119_v9  ;;  %4579 = vmatprep.mubr.msk.f32.mxu0 %vm161_vm0, %v56_v10 }
  0x4e   :  { %4675 = vmatprep.mubr.msk.f32.mxu1 %vm161_vm0, %v120_v11 }
  0x50   :  { %4580 = vmatmul.mubr.msk.f32.gmra.mrb[34].mxu0 %vm161_vm0, %v57_v12 }
  0x51   :  { %4676 = vmatmul.mubr.msk.f32.gmra.mrb[34].mxu1 %vm161_vm0, %v121_v13  ;;  %4582 = vmatprep.mubr.msk.f32.mxu0 %vm161_vm0, %v58_v14 }
  0x52   :  { %4678 = vmatprep.mubr.msk.f32.mxu1 %vm161_vm0, %v122_v15 }
  0x54   :  { %4583 = vmatmul.mubr.msk.f32.gmra.mrb[36].mxu0 %vm161_vm0, %v59_v16 }
  0x55   :  { %4679 = vmatmul.mubr.msk.f32.gmra.mrb[36].mxu1 %vm161_vm0, %v123_v17  ;;  %4585 = vmatprep.mubr.msk.f32.mxu0 %vm161_vm0, %v60_v18 }
  0x56   :  { %4681 = vmatprep.mubr.msk.f32.mxu1 %vm161_vm0, %v124_v19 }
  0x58   :  { %4586 = vmatmul.mubr.msk.f32.gmra.mrb[38].mxu0 %vm161_vm0, %v61_v20 }
  0x59   :  { %4682 = vmatmul.mubr.msk.f32.gmra.mrb[38].mxu1 %vm161_vm0, %v125_v21  ;;  %4588 = vmatprep.mubr.msk.f32.mxu0 %vm161_vm0, %v62_v22 }
  0x5a   :  { %4684 = vmatprep.mubr.msk.f32.mxu1 %vm161_vm0, %v126_v23 }
  0x5c   :  { %4589 = vmatmul.mubr.msk.f32.gmra.mrb[40].mxu0 %vm161_vm0, %v63_v24 }
  0x5d   :  { %4685 = vmatmul.mubr.msk.f32.gmra.mrb[40].mxu1 %vm161_vm0, %v127_v25  ;;  %4591 = vmatprep.mubr.msk.f32.mxu0 %vm161_vm0, %v64_v26 }
  0x5e   :  { %4687 = vmatprep.mubr.msk.f32.mxu1 %vm161_vm0, %v128_v27 }
  0x60   :  { %4592 = vmatmul.mubr.msk.f32.gmra.mrb[42].mxu0 %vm161_vm0, %v65_v28 }
  0x61   :  { %4688 = vmatmul.mubr.msk.f32.gmra.mrb[42].mxu1 %vm161_vm0, %v129_v29  ;;  %4594 = vmatprep.mubr.msk.f32.mxu0 %vm161_vm0, %v66_v30 }
  0x62   :  { %4690 = vmatprep.mubr.msk.f32.mxu1 %vm161_vm0, %v130_v31 }
  0x64   :  { %4595 = vmatmul.mubr.msk.f32.gmra.mrb[44].mxu0 %vm161_vm0, %v67_v32 }
  0x65   :  { %4691 = vmatmul.mubr.msk.f32.gmra.mrb[44].mxu1 %vm161_vm0, %v131_v33  ;;  %4597 = vmatprep.mubr.msk.f32.mxu0 %vm161_vm0, %v68_v34 }
  0x66   :  { %4693 = vmatprep.mubr.msk.f32.mxu1 %vm161_vm0, %v132_v35 }
  0x68   :  { %4598 = vmatmul.mubr.msk.f32.gmra.mrb[46].mxu0 %vm161_vm0, %v69_v36 }
  0x69   :  { %4694 = vmatmul.mubr.msk.f32.gmra.mrb[46].mxu1 %vm161_vm0, %v133_v37  ;;  %4600 = vmatprep.mubr.msk.f32.mxu0 %vm161_vm0, %v70_v38 }
  0x6a   :  { %4696 = vmatprep.mubr.msk.f32.mxu1 %vm161_vm0, %v134_v39 }
  0x6c   :  { %4601 = vmatmul.mubr.msk.f32.gmra.mrb[48].mxu0 %vm161_vm0, %v71_v40 }
  0x6d   :  { %4697 = vmatmul.mubr.msk.f32.gmra.mrb[48].mxu1 %vm161_vm0, %v135_v41  ;;  %4603 = vmatprep.mubr.msk.f32.mxu0 %vm161_vm0, %v72_v42 }
  0x6e   :  { %4699 = vmatprep.mubr.msk.f32.mxu1 %vm161_vm0, %v136_v43 }
  0x70   :  { %4604 = vmatmul.mubr.msk.f32.gmra.mrb[50].mxu0 %vm161_vm0, %v73_v44 }
  0x71   :  { %4700 = vmatmul.mubr.msk.f32.gmra.mrb[50].mxu1 %vm161_vm0, %v137_v45  ;;  %4606 = vmatprep.mubr.msk.f32.mxu0 %vm161_vm0, %v74_v46 }
  0x72   :  { %4702 = vmatprep.mubr.msk.f32.mxu1 %vm161_vm0, %v138_v47 }
  0x74   :  { %4607 = vmatmul.mubr.msk.f32.gmra.mrb[52].mxu0 %vm161_vm0, %v75_v48 }
  0x75   :  { %4703 = vmatmul.mubr.msk.f32.gmra.mrb[52].mxu1 %vm161_vm0, %v139_v49  ;;  %4609 = vmatprep.mubr.msk.f32.mxu0 %vm161_vm0, %v76_v50 }
  0x76   :  { %4705 = vmatprep.mubr.msk.f32.mxu1 %vm161_vm0, %v140_v51 }
  0x78   :  { %4610 = vmatmul.mubr.msk.f32.gmra.mrb[54].mxu0 %vm161_vm0, %v77_v52 }
  0x79   :  { %4706 = vmatmul.mubr.msk.f32.gmra.mrb[54].mxu1 %vm161_vm0, %v141_v53  ;;  %4612 = vmatprep.mubr.msk.f32.mxu0 %vm161_vm0, %v78_v54 }
  0x7a   :  { %4708 = vmatprep.mubr.msk.f32.mxu1 %vm161_vm0, %v142_v55 }
  0x7c   :  { %4613 = vmatmul.mubr.msk.f32.gmra.mrb[56].mxu0 %vm161_vm0, %v79_v56 }
  0x7d   :  { %4709 = vmatmul.mubr.msk.f32.gmra.mrb[56].mxu1 %vm161_vm0, %v143_v57  ;;  %4615 = vmatprep.mubr.msk.f32.mxu0 %vm161_vm0, %v80_v58 }
  0x7e   :  { %4711 = vmatprep.mubr.msk.f32.mxu1 %vm161_vm0, %v144_v59 }
  0x80   :  { %4616 = vmatmul.mubr.msk.f32.gmra.mrb[58].mxu0 %vm161_vm0, %v81_v60 }
  0x81   :  { %4712 = vmatmul.mubr.msk.f32.gmra.mrb[58].mxu1 %vm161_vm0, %v145_v61  ;;  %4618 = vmatprep.mubr.msk.f32.mxu0 %vm161_vm0, %v82_v63 }
  0x82   :  { %4714 = vmatprep.mubr.msk.f32.mxu1 %vm161_vm0, %v146_v62 }
  0x84   :  { %4619 = vmatmul.mubr.msk.f32.gmra.mrb[60].mxu0 %vm161_vm0, %v83_v1 }
  0x85   :  { %4715 = vmatmul.mubr.msk.f32.gmra.mrb[60].mxu1 %vm161_vm0, %v147_v0  ;;  %4621 = vmatprep.mubr.msk.f32.mxu0 %vm161_vm0, %v84_v2 }
  0x86   :  { %4717 = vmatprep.mubr.msk.f32.mxu1 %vm161_vm0, %v148_v3 }
  0x88   :  { %4622 = vmatmul.mubr.msk.f32.gmra.mrb[62].mxu0 %vm161_vm0, %v85_v4 }
  0x89   :  { %4718 = vmatmul.mubr.msk.f32.gmra.mrb[62].mxu1 %vm161_vm0, %v149_v5 }
  0xdf   :  { %v4530_v7 = vpop.f32.mrb[0].mxu0 }
  0xe0   :  { %v4626_v8 = vpop.f32.mrb[0].mxu1  ;;  %v612_v9 = vpop.f32.mrb[1].mxu0  ;;  %v618_v11 = vadd.f32 %v4530_v7, %v6089_v6 }
  0xe1   :  { %v932_v10 = vpop.f32.mrb[1].mxu1  ;;  %v938_v12 = vadd.f32 %v4626_v8, %v6089_v6  ;;  %v613_v18 = vadd.f32 %v6089_v6, %v612_v9 }
  0xe2   :  { %v1380_v15 = vmul.f32 0.70710677, %v618_v11  ;;  %v933_v25 = vadd.f32 %v6089_v6, %v932_v10  ;;  %v1252_v39 = vmul.f32 0.5, %v618_v11 }
  0xe3   :  { %v4533_v13 = vpop.f32.mrb[2].mxu0  ;;  %v1444_v21 = vmul.f32 0.70710677, %v938_v12  ;;  %v1379_v26 = vmul.f32 0.70710677, %v613_v18  ;;  %v1316_v44 = vmul.f32 0.5, %v938_v12 }
  0xe4   :  { %v4629_v14 = vpop.f32.mrb[2].mxu1  ;;  %v622_v16 = vpop.f32.mrb[3].mxu0  ;;  %v628_v22 = vadd.f32 %v4533_v13, %v6089_v6  ;;  %4733 = verf.f32 %v1380_v15  ;;  %v1443_v34 = vmul.f32 0.70710677, %v933_v25  ;;  %v6103_v45 = vmul.f32 0.5, %v613_v18 }
  0xe5   :  { %v942_v17 = vpop.f32.mrb[3].mxu1  ;;  %4735 = verf.f32 %v1444_v21  ;;  %v948_v30 = vadd.f32 %v4629_v14, %v6089_v6  ;;  %v623_v32 = vadd.f32 %v6089_v6, %v622_v16  ;;  %v6106_v48 = vmul.f32 0.5, %v933_v25  ;;  %v6149_v21 = vld [vmem:[%s8757_s3] ss:$0 sm:$0xff] }
  0xe6   :  { %v1382_v29 = vmul.f32 0.70710677, %v628_v22  ;;  %v943_v35 = vadd.f32 %v6089_v6, %v942_v17  ;;  %4737 = verf.f32 %v1379_v26  ;;  %v6109_v52 = vmul.f32 0.5, %v628_v22 }
  0xe7   :  { %v4536_v19 = vpop.f32.mrb[4].mxu0  ;;  %v1446_v40 = vmul.f32 0.70710677, %v948_v30  ;;  %v1381_v46 = vmul.f32 0.70710677, %v623_v32  ;;  %v6111_v53 = vmul.f32 0.5, %v948_v30 }
  0xe8   :  { %v4632_v20 = vpop.f32.mrb[4].mxu1  ;;  %v632_v23 = vpop.f32.mrb[5].mxu0  ;;  %v638_v36 = vadd.f32 %v4536_v19, %v6089_v6  ;;  %4739 = verf.f32 %v1382_v29  ;;  %v1445_v49 = vmul.f32 0.70710677, %v943_v35  ;;  %v6116_v58 = vmul.f32 0.5, %v623_v32 }
  0xe9   :  { %v952_v24 = vpop.f32.mrb[5].mxu1  ;;  %v958_v41 = vadd.f32 %v4632_v20, %v6089_v6  ;;  %v633_v47 = vadd.f32 %v6089_v6, %v632_v23  ;;  %4741 = verf.f32 %v1443_v34  ;;  %v6118_v59 = vmul.f32 0.5, %v943_v35 }
  0xea   :  { %v953_v50 = vadd.f32 %v6089_v6, %v952_v24  ;;  %v1384_v54 = vmul.f32 0.70710677, %v638_v36  ;;  %4743 = verf.f32 %v1446_v40  ;;  %v6124_v63 = vmul.f32 0.5, %v638_v36 }
  0xeb   :  { %v4539_v27 = vpop.f32.mrb[6].mxu0  ;;  %v1448_v60 = vmul.f32 0.70710677, %v958_v41  ;;  %4745 = verf.f32 %v1381_v46  ;;  %v1383_v0 = vmul.f32 0.70710677, %v633_v47  ;;  %v6128_v7 = vmul.f32 0.5, %v958_v41 }
  0xec   :  { %v4635_v28 = vpop.f32.mrb[6].mxu1  ;;  %v642_v31 = vpop.f32.mrb[7].mxu0  ;;  %v648_v55 = vadd.f32 %v4539_v27, %v6089_v6  ;;  %4747 = verf.f32 %v1445_v49  ;;  %v1447_v3 = vmul.f32 0.70710677, %v953_v50  ;;  %v6135_v12 = vmul.f32 0.5, %v633_v47 }
  0xed   :  { %v962_v33 = vpop.f32.mrb[7].mxu1  ;;  %v968_v1 = vadd.f32 %v4635_v28, %v6089_v6  ;;  %v643_v4 = vadd.f32 %v6089_v6, %v642_v31  ;;  %4749 = verf.f32 %v1384_v54  ;;  %v6137_v13 = vmul.f32 0.5, %v953_v50 }
  0xee   :  { %v4734_v51 = vpop.eup %4733  ;;  %v1386_v8 = vmul.f32 0.70710677, %v648_v55  ;;  %v963_v9 = vadd.f32 %v6089_v6, %v962_v33  ;;  %4751 = verf.f32 %v1448_v60  ;;  %v6144_v18 = vmul.f32 0.5, %v648_v55 }
  0xef   :  { %v4542_v37 = vpop.f32.mrb[8].mxu0  ;;  %v4736_v2 = vpop.eup %4735  ;;  %v1636_v5 = vadd.f32 1.0, %v4734_v51  ;;  %4753 = verf.f32 %v1383_v0  ;;  %v1450_v19 = vmul.f32 0.70710677, %v968_v1  ;;  %v1385_v23 = vmul.f32 0.70710677, %v643_v4 }
  0xf0   :  { %v4638_v38 = vpop.f32.mrb[8].mxu1  ;;  %v652_v42 = vpop.f32.mrb[9].mxu0  ;;  %v658_v14 = vadd.f32 %v4542_v37, %v6089_v6  ;;  %v1700_v20 = vadd.f32 1.0, %v4736_v2  ;;  %4755 = verf.f32 %v1447_v3  ;;  %v1449_v26 = vmul.f32 0.70710677, %v963_v9 }
  0xf1   :  { %v6101_v43 = vpop.f32.mrb[9].mxu1  ;;  %v4738_v17 = vpop.eup %4737  ;;  %v653_v24 = vadd.f32 %v6089_v6, %v652_v42  ;;  %v1764_v25 = vmul.f32 %v1636_v5, %v1252_v39  ;;  %4757 = verf.f32 %v1386_v8  ;;  %v978_v27 = vadd.f32 %v4638_v38, %v6089_v6 }
  0xf2   :  { %v4740_v22 = vpop.eup %4739  ;;  %v1828_v28 = vmul.f32 %v1700_v20, %v1316_v44  ;;  %v1635_v32 = vadd.f32 1.0, %v4738_v17  ;;  %v6157_v33 = vmul.f32 0.5, %v968_v1  ;;  %v1388_v34 = vmul.f32 0.70710677, %v658_v14 }
  0xf3   :  { %v4545_v56 = vpop.f32.mrb[10].mxu0  ;;  %v4742_v31 = vpop.eup %4741  ;;  %v1899_v35 = vmul.f32 %v6149_v21, %v1764_v25  ;;  %v1638_v39 = vadd.f32 1.0, %v4740_v22  ;;  %4759 = verf.f32 %v1450_v19  ;;  %v973_v38 = vadd.f32 %v6089_v6, %v6101_v43 }
  0xf4   :  { %v6114_v57 = vpop.f32.mrb[10].mxu1  ;;  %v6120_v61 = vpop.f32.mrb[11].mxu0  ;;  %v1963_v40 = vmul.f32 %v6149_v21, %v1828_v28  ;;  %4761 = verf.f32 %v1385_v23  ;;  %v1387_v42 = vmul.f32 0.70710677, %v653_v24  ;;  %v668_v44 = vadd.f32 %v4545_v56, %v6089_v6 }
  0xf5   :  { %v6122_v62 = vpop.f32.mrb[11].mxu1  ;;  %v4744_v41 = vpop.eup %4743  ;;  %v2029_v46 = vsel %vm161_vm0, %v1899_v35, 0.0  ;;  %v6169_v49 = vmul.f32 0.5, %v643_v4  ;;  %4763 = verf.f32 %v1449_v26  ;;  %v1452_v50 = vmul.f32 0.70710677, %v978_v27 }
  0xf6   :  { %v4746_v47 = vpop.eup %4745  ;;  %v2221_v51 = vsel %vm161_vm0, %v1963_v40, 0.0  ;;  %2030 = vadd.xlane.f32.xlu0 %v2029_v46  ;;  %v6174_v55 = vadd.f32 1.0, %v4742_v31  ;;  %v6176_v60 = vmul.f32 0.5, %v963_v9  ;;  %v6178_v0 = vmul.f32 0.5, %v658_v14 }
  0xf7   :  { %v6131_v10 = vpop.f32.mrb[12].mxu0  ;;  %v4748_v43 = vpop.eup %4747  ;;  %4765 = verf.f32 %v1388_v34  ;;  %2222 = vadd.xlane.f32.xlu1 %v2221_v51  ;;  %v1451_v3 = vmul.f32 0.70710677, %v973_v38  ;;  %v663_v4 = vadd.f32 %v6089_v6, %v6120_v61  ;;  %v1766_v5 = vmul.f32 %v1638_v39, %v6109_v52 }
  0xf8   :  { %v6133_v11 = vpop.f32.mrb[12].mxu1  ;;  %v6140_v15 = vpop.f32.mrb[13].mxu0  ;;  %v1763_v8 = vmul.f32 %v1635_v32, %v6103_v45  ;;  %v1702_v14 = vadd.f32 1.0, %v4744_v41  ;;  %v6190_v19 = vmul.f32 0.5, %v653_v24  ;;  %4767 = verf.f32 %v1387_v42 }
  0xf9   :  { %v6142_v16 = vpop.f32.mrb[13].mxu1  ;;  %v4750_v2 = vpop.eup %4749  ;;  %v1390_v20 = vmul.f32 0.70710677, %v668_v44  ;;  %v6192_v23 = vmul.f32 0.5, %v978_v27  ;;  %4769 = verf.f32 %v1452_v50  ;;  %v988_v25 = vadd.f32 %v6114_v57, %v6089_v6 }
  0xfa   :  { %v4752_v9 = vpop.eup %4751  ;;  %8800 = vst [vmem:[#allocation6_spill] sm:$0xff] %v6190_v19  ;;  %v1901_v61 = vmul.f32 %v6149_v21, %v1766_v5  ;;  %v6201_v28 = vadd.f32 1.0, %v4746_v47  ;;  %v6203_v24 = vadd.f32 1.0, %v4748_v43  ;;  %v6205_v31 = vmul.f32 0.5, %v973_v38 }
  0xfb   :  { %v6153_v29 = vpop.f32.mrb[14].mxu0  ;;  %v4754_v22 = vpop.eup %4753  ;;  %v1898_v27 = vmul.f32 %v6149_v21, %v1763_v8  ;;  %4771 = verf.f32 %v1451_v3  ;;  %v1389_v35 = vmul.f32 0.70710677, %v663_v4  ;;  %v678_v39 = vadd.f32 %v6131_v10, %v6089_v6 }
  0xfc   :  { %v6155_v30 = vpop.f32.mrb[14].mxu1  ;;  %v6160_v36 = vpop.f32.mrb[15].mxu0  ;;  %8801 = vst [vmem:[#allocation7_spill] sm:$0xff] %v6205_v31  ;;  %v2035_v40 = vsel %vm161_vm0, %v1901_v61, 0.0  ;;  %v6215_v41 = vadd.f32 1.0, %v4750_v2  ;;  %v6217_v42 = vmul.f32 0.5, %v668_v44  ;;  %4773 = verf.f32 %v1390_v20 }
  0xfd   :  { %v6162_v37 = vpop.f32.mrb[15].mxu1  ;;  %v4756_v26 = vpop.eup %4755  ;;  %2036 = vadd.xlane.f32.xlu1 %v2035_v40  ;;  %v2026_v38 = vsel %vm161_vm0, %v1898_v27, 0.0  ;;  %v6220_v47 = vadd.f32 1.0, %v4752_v9  ;;  %v1454_v50 = vmul.f32 0.70710677, %v988_v25  ;;  %v983_v51 = vadd.f32 %v6089_v6, %v6122_v62 }
  0xfe   :  { %v4758_v57 = vpop.eup %4757  ;;  %2027 = vadd.xlane.f32.xlu0 %v2026_v38  ;;  %v1830_v10 = vmul.f32 %v1702_v14, %v6111_v53  ;;  %v6229_v3 = vadd.f32 1.0, %v4754_v22  ;;  %v6231_v5 = vadd.f32 1.0, %v4756_v26  ;;  %v6235_v9 = vmul.f32 0.5, %v663_v4 }
  0xff   :  { %v6172_v54 = vpop.f32.mrb[16].mxu0  ;;  %v4760_v46 = vpop.eup %4759  ;;  %v6233_v8 = vadd.f32 1.0, %v4758_v57  ;;  %4775 = verf.f32 %v1389_v35  ;;  %v6241_v53 = vmul.f32 0.5, %v988_v25  ;;  %v1392_v14 = vmul.f32 0.70710677, %v678_v39 }
 0x100   :  { %v6180_v56 = vpop.f32.mrb[17].mxu0  ;;  %v6182_v1 = vpop.f32.mrb[16].mxu1  ;;  %8802 = vst [vmem:[#allocation8_spill] sm:$0xff] %v6235_v9  ;;  %v673_v27 = vadd.f32 %v6089_v6, %v6140_v15  ;;  %v6245_v40 = vadd.f32 1.0, %v4760_v46  ;;  %v998_v26 = vadd.f32 %v6133_v11, %v6089_v6  ;;  %v1965_v4 = vmul.f32 %v6149_v21, %v1830_v10 }
 0x101   :  { %v6188_v17 = vpop.f32.mrb[17].mxu1  ;;  %v4762_v44 = vpop.eup %4761  ;;  %8803 = vst [vmem:[#allocation9_spill] sm:$0xff] %v6241_v53  ;;  %v1827_v57 = vmul.f32 %v6174_v55, %v6106_v48  ;;  %4777 = verf.f32 %v1454_v50  ;;  %v1453_v25 = vmul.f32 0.70710677, %v983_v51  ;;  %v688_v35 = vadd.f32 %v6153_v29, %v6089_v6 }
 0x102   :  { %v4764_v62 = vpop.eup %4763  ;;  %v6252_v38 = vadd.f32 1.0, %v4762_v44  ;;  %v6262_v11 = vmul.f32 0.5, %v678_v39  ;;  %v2227_v10 = vsel %vm161_vm0, %v1965_v4, 0.0  ;;  %4779 = verf.f32 %v1392_v14 }
 0x103   :  { %v6197_v52 = vpop.f32.mrb[18].mxu0  ;;  %v4766_v22 = vpop.eup %4765  ;;  %v6260_v53 = vadd.f32 1.0, %v4764_v62  ;;  %v1962_v48 = vmul.f32 %v6149_v21, %v1827_v57  ;;  %v6270_v29 = vmul.f32 0.5, %v983_v51  ;;  %v1391_v31 = vmul.f32 0.70710677, %v673_v27  ;;  %2228 = vadd.xlane.f32.xlu1 %v2227_v10 }
 0x104   :  { %v6199_v45 = vpop.f32.mrb[18].mxu1  ;;  %v6208_v32 = vpop.f32.mrb[19].mxu0  ;;  %v6274_v62 = vadd.f32 1.0, %v4766_v22  ;;  %v1456_v39 = vmul.f32 0.70710677, %v998_v26  ;;  %v683_v4 = vadd.f32 %v6089_v6, %v6160_v36  ;;  %4781 = verf.f32 %v1453_v25 }
 0x105   :  { %v6210_v34 = vpop.f32.mrb[19].mxu1  ;;  %v4768_v46 = vpop.eup %4767  ;;  %8807 = vst [vmem:[#allocation13_spill] sm:$0xff] %v6270_v29  ;;  %v2218_v57 = vsel %vm161_vm0, %v1962_v48, 0.0  ;;  %v1394_v14 = vmul.f32 0.70710677, %v688_v35  ;;  %v1765_v51 = vmul.f32 %v6201_v28, %v6116_v58  ;;  %v1008_v36 = vadd.f32 %v6155_v30, %v6089_v6 }
 0x106   :  { %v4770_v44 = vpop.eup %4769  ;;  %v6279_v19 = vadd.f32 1.0, %v4768_v46  ;;  %2219 = vadd.xlane.f32.xlu0 %v2218_v57  ;;  %v1829_v25 = vmul.f32 %v6203_v24, %v6118_v59  ;;  %4783 = verf.f32 %v1391_v31  ;;  %v6302_v57 = vmul.f32 0.5, %v998_v26 }
 0x107   :  { %v6225_v43 = vpop.f32.mrb[20].mxu0  ;;  %v6287_v10 = vadd.f32 1.0, %v4770_v44  ;;  %v1900_v28 = vmul.f32 %v6149_v21, %v1765_v51  ;;  %v1768_v44 = vmul.f32 %v6215_v41, %v6124_v63  ;;  %4785 = verf.f32 %v1456_v39 }
 0x108   :  { %v6227_v2 = vpop.f32.mrb[20].mxu1  ;;  %v6237_v20 = vpop.f32.mrb[21].mxu0  ;;  %v1964_v30 = vmul.f32 %v6149_v21, %v1829_v25  ;;  %4787 = verf.f32 %v1394_v14  ;;  %v1458_v51 = vmul.f32 0.70710677, %v1008_v36  ;;  %v698_v63 = vadd.f32 %v6172_v54, %v6089_v6 }
 0x109   :  { %v6239_v61 = vpop.f32.mrb[21].mxu1  ;;  %v2032_v24 = vsel %vm161_vm0, %v1900_v28, 0.0  ;;  %v1903_v26 = vmul.f32 %v6149_v21, %v1768_v44  ;;  %v6320_v25 = vmul.f32 0.5, %v688_v35  ;;  %v1003_v14 = vadd.f32 %v6089_v6, %v6162_v37 }
 0x10a   :  { %2033 = vadd.xlane.f32.xlu1 %v2032_v24  ;;  %v2224_v41 = vsel %vm161_vm0, %v1964_v30, 0.0  ;;  %v1832_v54 = vmul.f32 %v6220_v47, %v6128_v7  ;;  %v693_v24 = vadd.f32 %v6089_v6, %v6180_v56  ;;  %v1831_v7 = vmul.f32 %v6231_v5, %v6137_v13 }
 0x10b   :  { %v6256_v9 = vpop.f32.mrb[22].mxu0  ;;  %2225 = vadd.xlane.f32.xlu0 %v2224_v41  ;;  %v2041_v37 = vsel %vm161_vm0, %v1903_v26, 0.0  ;;  %v1396_v56 = vmul.f32 0.70710677, %v698_v63  ;;  %v1767_v13 = vmul.f32 %v6229_v3, %v6135_v12 }
 0x10c   :  { %v6258_v15 = vpop.f32.mrb[22].mxu1  ;;  %v6266_v55 = vpop.f32.mrb[23].mxu0  ;;  %v1967_v41 = vmul.f32 %v6149_v21, %v1832_v54  ;;  %v1966_v54 = vmul.f32 %v6149_v21, %v1831_v7 }
 0x10d   :  { %8804 = vst [vmem:[#allocation10_spill] sm:$0xff] %v6258_v15  ;;  %8805 = vst [vmem:[#allocation11_spill] sm:$0xff] %v6266_v55  ;;  %v6268_v50 = vpop.f32.mrb[23].mxu1  ;;  %v993_v15 = vadd.f32 %v6089_v6, %v6142_v16  ;;  %v4772_v55 = vpop.eup %4771  ;;  %v1902_v12 = vmul.f32 %v6149_v21, %v1767_v13 }
 0x10e   :  { %8806 = vst [vmem:[#allocation12_spill] sm:$0xff] %v6268_v50  ;;  %v4774_v22 = vpop.eup %4773  ;;  %v6289_v50 = vmul.f32 0.5, %v673_v27  ;;  %v1393_v27 = vmul.f32 0.70710677, %v683_v4  ;;  %v6307_v59 = vadd.f32 1.0, %v4772_v55  ;;  %2042 = vadd.xlane.f32.xlu1 %v2041_v37  ;;  %v2233_v26 = vsel %vm161_vm0, %v1967_v41, 0.0 }
 0x10f   :  { %v6283_v29 = vpop.f32.mrb[24].mxu0  ;;  %v1455_v58 = vmul.f32 0.70710677, %v993_v15  ;;  %v6330_v44 = vmul.f32 0.5, %v993_v15  ;;  %v1395_v37 = vmul.f32 0.70710677, %v693_v24  ;;  %2234 = vadd.xlane.f32.xlu0 %v2233_v26  ;;  %v1013_v41 = vadd.f32 %v6089_v6, %v6188_v17 }
 0x110   :  { %v6285_v16 = vpop.f32.mrb[24].mxu1  ;;  %8809 = vst [vmem:[#allocation15_spill] sm:$0xff] %v6289_v50  ;;  %v6295_v46 = vpop.f32.mrb[25].mxu0  ;;  %v2230_v7 = vsel %vm161_vm0, %v1966_v54, 0.0  ;;  %v708_v26 = vadd.f32 %v6197_v52, %v6089_v6  ;;  %v6378_v54 = vmul.f32 0.5, %v693_v24  ;;  %v1770_v52 = vmul.f32 %v6233_v8, %v6144_v18 }
 0x111   :  { %8808 = vst [vmem:[#allocation14_spill] sm:$0xff] %v6285_v16  ;;  %v6297_v48 = vpop.f32.mrb[25].mxu1  ;;  %v4776_v50 = vpop.eup %4775  ;;  %v6305_v16 = vadd.f32 1.0, %v4774_v22  ;;  %4789 = verf.f32 %v1455_v58  ;;  %8810 = vst [vmem:[#allocation16_spill] sm:$0xff] %v6330_v44  ;;  %v1018_v58 = vadd.f32 %v6182_v1, %v6089_v6  ;;  %v1457_v1 = vmul.f32 0.70710677, %v1003_v14 }
 0x112   :  { %v4778_v55 = vpop.eup %4777  ;;  %v6328_v30 = vadd.f32 1.0, %v4776_v50  ;;  %4791 = verf.f32 %v1393_v27  ;;  %v6346_v27 = vmul.f32 0.5, %v683_v4  ;;  %v6358_v4 = vmul.f32 0.5, %v1008_v36  ;;  %2231 = vadd.xlane.f32.xlu1 %v2230_v7 }
 0x113   :  { %v6310_v31 = vpop.f32.mrb[26].mxu0  ;;  %v4780_v35 = vpop.eup %4779  ;;  %v6344_v15 = vadd.f32 1.0, %v4778_v55  ;;  %4793 = verf.f32 %v1458_v51  ;;  %v6360_v51 = vmul.f32 0.5, %v698_v63  ;;  %v6372_v63 = vmul.f32 0.5, %v1003_v14 }
 0x114   :  { %v6316_v39 = vpop.f32.mrb[27].mxu0  ;;  %v6318_v22 = vpop.f32.mrb[26].mxu1  ;;  %8813 = vst [vmem:[#allocation19_spill] sm:$0xff] %v6346_v27  ;;  %v6356_v55 = vadd.f32 1.0, %v4780_v35  ;;  %8815 = vst [vmem:[#allocation21_spill] sm:$0xff] %v6358_v4  ;;  %4795 = verf.f32 %v1396_v56  ;;  %v6380_v13 = vmul.f32 0.5, %v1018_v58  ;;  %v1834_v14 = vmul.f32 %v6245_v40, %v6157_v33 }
 0x115   :  { %v6326_v28 = vpop.f32.mrb[27].mxu1  ;;  %v4782_v44 = vpop.eup %4781  ;;  %4797 = verf.f32 %v1457_v1  ;;  %v6393_v24 = vmul.f32 0.5, %v1013_v41  ;;  %v1905_v18 = vmul.f32 %v6149_v21, %v1770_v52 }
 0x116   :  { %v4784_v27 = vpop.eup %4783  ;;  %v6370_v36 = vadd.f32 1.0, %v4782_v44  ;;  %4799 = verf.f32 %v1395_v37  ;;  %v1398_v37 = vmul.f32 0.70710677, %v708_v26  ;;  %v1969_v33 = vmul.f32 %v6149_v21, %v1834_v14 }
 0x117   :  { %v6340_v47 = vpop.f32.mrb[28].mxu0  ;;  %v4786_v35 = vpop.eup %4785  ;;  %v6385_v44 = vadd.f32 1.0, %v4784_v27  ;;  %8818 = vst [vmem:[#allocation24_spill] sm:$0xff] %v6393_v24  ;;  %v2047_v52 = vsel %vm161_vm0, %v1905_v18, 0.0 }
 0x118   :  { %8811 = vst [vmem:[#allocation17_spill] sm:$0xff] %v6340_v47  ;;  %v6342_v50 = vpop.f32.mrb[28].mxu1  ;;  %v6352_v5 = vpop.f32.mrb[29].mxu0  ;;  %v6391_v1 = vadd.f32 1.0, %v4786_v35  ;;  %v1772_v35 = vmul.f32 %v6274_v62, %v6178_v0  ;;  %v2239_v14 = vsel %vm161_vm0, %v1969_v33, 0.0  ;;  %2048 = vadd.xlane.f32.xlu1 %v2047_v52 }
 0x119   :  { %8812 = vst [vmem:[#allocation18_spill] sm:$0xff] %v6342_v50  ;;  %v6354_v47 = vpop.f32.mrb[29].mxu1  ;;  %v1460_v50 = vmul.f32 0.70710677, %v1018_v58  ;;  %v4788_v17 = vpop.eup %4787  ;;  %v1459_v58 = vmul.f32 0.70710677, %v1013_v41  ;;  %v703_v41 = vadd.f32 %v6089_v6, %v6208_v32  ;;  %v1833_v32 = vmul.f32 %v6260_v53, %v6176_v60 }
 0x11a   :  { %8814 = vst [vmem:[#allocation20_spill] sm:$0xff] %v6354_v47  ;;  %v1907_v0 = vmul.f32 %v6149_v21, %v1772_v35 }
 0x11b   :  { %v6366_v3 = vpop.f32.mrb[30].mxu0  ;;  %v4790_v56 = vpop.eup %4789  ;;  %4801 = verf.f32 %v1460_v50  ;;  %v1650_v50 = vadd.f32 1.0, %v4788_v17  ;;  %v1774_v17 = vmul.f32 %v6305_v16, %v6217_v42  ;;  %v1028_v42 = vadd.f32 %v6199_v45, %v6089_v6 }
 0x11c   :  { %8816 = vst [vmem:[#allocation22_spill] sm:$0xff] %v6366_v3  ;;  %v6368_v47 = vpop.f32.mrb[30].mxu1  ;;  %v6376_v4 = vpop.f32.mrb[31].mxu0  ;;  %v6431_v62 = vadd.f32 1.0, %v4790_v56  ;;  %4803 = verf.f32 %v1398_v37  ;;  %v1397_v60 = vmul.f32 0.70710677, %v703_v41  ;;  %v1968_v52 = vmul.f32 %v6149_v21, %v1833_v32 }
 0x11d   :  { %8817 = vst [vmem:[#allocation23_spill] sm:$0xff] %v6368_v47  ;;  %v2038_v47 = vsel %vm161_vm0, %v1902_v12, 0.0  ;;  %v6383_v3 = vpop.f32.mrb[31].mxu1  ;;  %v4792_v27 = vpop.eup %4791  ;;  %4805 = verf.f32 %v1459_v58  ;;  %v2053_v35 = vsel %vm161_vm0, %v1907_v0, 0.0  ;;  %v1909_v37 = vmul.f32 %v6149_v21, %v1774_v17 }
 0x11e   :  { %2039 = vadd.xlane.f32.xlu0 %v2038_v47  ;;  %v718_v47 = vadd.f32 %v6225_v43, %v6089_v6  ;;  %v4794_v24 = vpop.eup %4793  ;;  %v6415_v43 = vadd.f32 %v6227_v2, %v6089_v6  ;;  %v6439_v33 = vadd.f32 1.0, %v4792_v27  ;;  %v6450_v27 = vadd.f32 %v6089_v6, %v6239_v61  ;;  %2054 = vadd.xlane.f32.xlu1 %v2053_v35 }
 0x11f   :  { %v6395_v7 = vpop.f32.mrb[32].mxu0  ;;  %v4796_v53 = vpop.eup %4795  ;;  %v1836_v58 = vmul.f32 %v6287_v10, %v6192_v23  ;;  %v6460_v32 = vmul.f32 0.5, %v703_v41  ;;  %v713_v61 = vadd.f32 %v6089_v6, %v6237_v20  ;;  %v1023_v23 = vadd.f32 %v6089_v6, %v6210_v34 }
 0x120   :  { %v6397_v12 = vpop.f32.mrb[32].mxu1  ;;  %v6403_v8 = vpop.f32.mrb[33].mxu0  ;;  %v1400_v18 = vmul.f32 0.70710677, %v718_v47  ;;  %v2059_v41 = vsel %vm161_vm0, %v1909_v37, 0.0  ;;  %v1778_v20 = vmul.f32 %v1650_v50, %v6320_v25  ;;  %v6486_v37 = vmul.f32 0.5, %v1028_v42 }
 0x121   :  { %8819 = vst [vmem:[#allocation25_spill] sm:$0xff] %v6397_v12  ;;  %v6405_v40 = vpop.f32.mrb[33].mxu1  ;;  %v1769_v12 = vmul.f32 %v6252_v38, %v6169_v49  ;;  %v4798_v45 = vpop.eup %4797  ;;  %v8827_v25 = vld [vmem:[#allocation6_spill] sm:$0xff] }
 0x122   :  { %8820 = vst [vmem:[#allocation26_spill] sm:$0xff] %v6405_v40  ;;  %v6421_v40 = vmul.f32 0.5, %v708_v26  ;;  %2240 = vadd.xlane.f32.xlu0 %v2239_v14  ;;  %v1464_v14 = vmul.f32 0.70710677, %v6415_v43  ;;  %4807 = verf.f32 %v1400_v18  ;;  %v2236_v18 = vsel %vm161_vm0, %v1968_v52, 0.0  ;;  %2060 = vadd.xlane.f32.xlu1 %v2059_v41 }
 0x123   :  { %v1904_v49 = vmul.f32 %v6149_v21, %v1769_v12  ;;  %v6427_v2 = vpop.f32.mrb[34].mxu0  ;;  %v6441_v12 = vadd.f32 1.0, %v4794_v24  ;;  %v1776_v24 = vmul.f32 %v6356_v55, %v6262_v11  ;;  %v1652_v55 = vadd.f32 1.0, %v4796_v53 }
 0x124   :  { %v6429_v38 = vpop.f32.mrb[34].mxu1  ;;  %v6435_v16 = vpop.f32.mrb[35].mxu0  ;;  %4809 = verf.f32 %v1397_v60  ;;  %v6480_v60 = vadd.f32 %v6256_v9, %v6089_v6  ;;  %v1399_v52 = vmul.f32 0.70710677, %v713_v61  ;;  %v1461_v9 = vmul.f32 0.70710677, %v1023_v23 }
 0x125   :  { %v6437_v26 = vpop.f32.mrb[35].mxu1  ;;  %v2044_v56 = vsel %vm161_vm0, %v1904_v49, 0.0  ;;  %v4800_v49 = vpop.eup %4799  ;;  %v1911_v10 = vmul.f32 %v6149_v21, %v1776_v24  ;;  %4811 = verf.f32 %v1464_v14  ;;  %v1780_v41 = vmul.f32 %v1652_v55, %v6360_v51 }
 0x126   :  { %8821 = vst [vmem:[#allocation27_spill] sm:$0xff] %v6437_v26  ;;  %2045 = vadd.xlane.f32.xlu0 %v2044_v56  ;;  %v1462_v26 = vmul.f32 0.70710677, %v1028_v42  ;;  %v4802_v11 = vpop.eup %4801  ;;  %v1913_v42 = vmul.f32 %v6149_v21, %v1778_v20  ;;  %v6512_v55 = vadd.f32 1.0, %v4800_v49  ;;  %v6514_v20 = vmul.f32 0.5, %v713_v61 }
 0x127   :  { %v6456_v0 = vpop.f32.mrb[36].mxu0  ;;  %v1716_v24 = vadd.f32 1.0, %v4802_v11  ;;  %v1402_v11 = vmul.f32 0.70710677, %v6480_v60 }
 0x128   :  { %8822 = vst [vmem:[#allocation28_spill] sm:$0xff] %v6456_v0  ;;  %v6458_v17 = vpop.f32.mrb[36].mxu1  ;;  %v6464_v35 = vpop.f32.mrb[37].mxu0  ;;  %v6475_v0 = vmul.f32 0.5, %v718_v47  ;;  %4813 = verf.f32 %v1462_v26  ;;  %v1771_v47 = vmul.f32 %v6279_v19, %v8827_v25  ;;  %v2071_v49 = vsel %vm161_vm0, %v1913_v42, 0.0 }
 0x129   :  { %8823 = vst [vmem:[#allocation29_spill] sm:$0xff] %v6458_v17  ;;  %v6466_v56 = vpop.f32.mrb[37].mxu1  ;;  %v1971_v17 = vmul.f32 %v6149_v21, %v1836_v58  ;;  %v2065_v58 = vsel %vm161_vm0, %v1911_v10, 0.0  ;;  %v8831_v10 = vld [vmem:[#allocation10_spill] sm:$0xff] }
 0x12a   :  { %8824 = vst [vmem:[#allocation30_spill] sm:$0xff] %v6466_v56  ;;  %v1463_v56 = vmul.f32 0.70710677, %v6450_v27  ;;  %2237 = vadd.xlane.f32.xlu0 %v2236_v18  ;;  %v4804_v18 = vpop.eup %4803  ;;  %v1906_v26 = vmul.f32 %v6149_v21, %v1771_v47  ;;  %2066 = vadd.xlane.f32.xlu1 %v2065_v58  ;;  %v6524_v58 = vmul.f32 0.5, %v1023_v23 }
 0x12b   :  { %v6482_v34 = vpop.f32.mrb[38].mxu0  ;;  %v4806_v25 = vpop.eup %4805  ;;  %v1654_v47 = vadd.f32 1.0, %v4804_v18 }
 0x12c   :  { %8825 = vst [vmem:[#allocation31_spill] sm:$0xff] %v6482_v34  ;;  %v6484_v53 = vpop.f32.mrb[38].mxu1  ;;  %v6490_v50 = vpop.f32.mrb[39].mxu0  ;;  %v8830_v34 = vld [vmem:[#allocation7_spill] sm:$0xff]  ;;  %4815 = verf.f32 %v1463_v56  ;;  %v2050_v61 = vsel %vm161_vm0, %v1906_v26, 0.0  ;;  %v6542_v26 = vadd.f32 1.0, %v4806_v25 }
 0x12d   :  { %8826 = vst [vmem:[#allocation32_spill] sm:$0xff] %v6484_v53  ;;  %8828 = vst [vmem:[#allocation6_spill] sm:$0xff] %v6490_v50  ;;  %v6492_v14 = vpop.f32.mrb[39].mxu1  ;;  %v2245_v53 = vsel %vm161_vm0, %v1971_v17, 0.0  ;;  %v1835_v19 = vmul.f32 %v6307_v59, %v8830_v34  ;;  %v6501_v50 = vadd.f32 1.0, %v4798_v45  ;;  %4817 = verf.f32 %v1399_v52  ;;  %v8834_v59 = vld [vmem:[#allocation11_spill] sm:$0xff] }
 0x12e   :  { %8829 = vst [vmem:[#allocation33_spill] sm:$0xff] %v6492_v14  ;;  %v6506_v14 = vadd.f32 %v8831_v10, %v6089_v6  ;;  %2246 = vadd.xlane.f32.xlu0 %v2245_v53  ;;  %v6518_v45 = vadd.f32 %v6089_v6, %v8834_v59  ;;  %4819 = verf.f32 %v1461_v9  ;;  %v1915_v53 = vmul.f32 %v6149_v21, %v1780_v41  ;;  %v4808_v10 = vpop.eup %4807  ;;  %v8838_v9 = vld [vmem:[#allocation9_spill] sm:$0xff] }
 0x12f   :  { %v6508_v51 = vpop.f32.mrb[40].mxu0  ;;  %v1970_v52 = vmul.f32 %v6149_v21, %v1835_v19  ;;  %v1844_v59 = vmul.f32 %v1716_v24, %v6380_v13  ;;  %4821 = verf.f32 %v1402_v11  ;;  %2072 = vadd.xlane.f32.xlu1 %v2071_v49  ;;  %v1838_v41 = vmul.f32 %v6344_v15, %v8838_v9 }
 0x130   :  { %8832 = vst [vmem:[#allocation7_spill] sm:$0xff] %v6508_v51  ;;  %v6510_v17 = vpop.f32.mrb[40].mxu1  ;;  %v6520_v56 = vpop.f32.mrb[41].mxu0  ;;  %v1336_v13 = vmul.f32 0.5, %v6415_v43  ;;  %v1401_v24 = vmul.f32 0.70710677, %v6518_v45  ;;  %v1782_v9 = vmul.f32 %v1654_v47, %v6421_v40  ;;  %v6567_v40 = vadd.f32 %v6089_v6, %v6295_v46 }
 0x131   :  { %8833 = vst [vmem:[#allocation10_spill] sm:$0xff] %v6510_v17  ;;  %8835 = vst [vmem:[#allocation11_spill] sm:$0xff] %v6520_v56  ;;  %v6522_v34 = vpop.f32.mrb[41].mxu1  ;;  %v4810_v17 = vpop.eup %4809  ;;  %v1466_v56 = vmul.f32 0.70710677, %v6506_v14  ;;  %v1656_v49 = vadd.f32 1.0, %v4808_v10  ;;  %v1979_v43 = vmul.f32 %v6149_v21, %v1844_v59 }
 0x132   :  { %8836 = vst [vmem:[#allocation34_spill] sm:$0xff] %v6522_v34  ;;  %v8837_v34 = vld [vmem:[#allocation12_spill] sm:$0xff]  ;;  %2051 = vadd.xlane.f32.xlu0 %v2050_v61  ;;  %v6552_v61 = vadd.f32 %v6283_v29, %v6089_v6  ;;  %v2077_v15 = vsel %vm161_vm0, %v1915_v53, 0.0  ;;  %v6562_v10 = vmul.f32 0.5, %v6450_v27  ;;  %v6596_v51 = vmul.f32 0.5, %v6480_v60 }
 0x133   :  { %v6534_v23 = vadd.f32 %v6089_v6, %v8837_v34  ;;  %v6538_v18 = vpop.f32.mrb[42].mxu0  ;;  %v4812_v34 = vpop.eup %4811  ;;  %4823 = verf.f32 %v1466_v56  ;;  %2078 = vadd.xlane.f32.xlu1 %v2077_v15  ;;  %v2269_v15 = vsel %vm161_vm0, %v1979_v43, 0.0 }
 0x134   :  { %8839 = vst [vmem:[#allocation12_spill] sm:$0xff] %v6538_v18  ;;  %v6540_v42 = vpop.f32.mrb[42].mxu1  ;;  %v6546_v19 = vpop.f32.mrb[43].mxu0  ;;  %v1973_v18 = vmul.f32 %v6149_v21, %v1838_v41  ;;  %v1720_v59 = vadd.f32 1.0, %v4812_v34  ;;  %4825 = verf.f32 %v1401_v24  ;;  %v1404_v46 = vmul.f32 0.70710677, %v6552_v61 }
 0x135   :  { %8840 = vst [vmem:[#allocation9_spill] sm:$0xff] %v6540_v42  ;;  %8841 = vst [vmem:[#allocation35_spill] sm:$0xff] %v6546_v19  ;;  %v6548_v11 = vpop.f32.mrb[43].mxu1  ;;  %v4814_v25 = vpop.eup %4813  ;;  %v2242_v42 = vsel %vm161_vm0, %v1970_v52, 0.0  ;;  %v8843_v19 = vld [vmem:[#allocation8_spill] sm:$0xff]  ;;  %v6573_v52 = vadd.f32 1.0, %v4810_v17  ;;  %v1917_v17 = vmul.f32 %v6149_v21, %v1782_v9  ;;  %v1784_v34 = vmul.f32 %v1656_v49, %v6475_v0 }
 0x136   :  { %8842 = vst [vmem:[#allocation36_spill] sm:$0xff] %v6548_v11  ;;  %v1773_v11 = vmul.f32 %v6328_v30, %v8843_v19  ;;  %v1465_v29 = vmul.f32 0.70710677, %v6534_v23  ;;  %2243 = vadd.xlane.f32.xlu0 %v2242_v42  ;;  %v8846_v30 = vld [vmem:[#allocation14_spill] sm:$0xff]  ;;  %v4816_v42 = vpop.eup %4815  ;;  %v6586_v19 = vadd.f32 %v6089_v6, %v6297_v48  ;;  %v1403_v48 = vmul.f32 0.70710677, %v6567_v40 }
 0x137   :  { %v6569_v47 = vpop.f32.mrb[44].mxu0  ;;  %v6577_v27 = vadd.f32 %v8846_v30, %v6089_v6  ;;  %v4818_v24 = vpop.eup %4817  ;;  %v2251_v30 = vsel %vm161_vm0, %v1973_v18, 0.0  ;;  %2270 = vadd.xlane.f32.xlu1 %v2269_v15  ;;  %v6601_v0 = vadd.f32 %v6310_v31, %v6089_v6  ;;  %v6610_v9 = vmul.f32 0.5, %v6518_v45 }
 0x138   :  { %8844 = vst [vmem:[#allocation8_spill] sm:$0xff] %v6569_v47  ;;  %v6571_v53 = vpop.f32.mrb[44].mxu1  ;;  %v6579_v56 = vpop.f32.mrb[45].mxu0  ;;  %4827 = verf.f32 %v1465_v29  ;;  %v2083_v6 = vsel %vm161_vm0, %v1917_v17, 0.0  ;;  %v1919_v31 = vmul.f32 %v6149_v21, %v1784_v34  ;;  %v1848_v45 = vmul.f32 %v1720_v59, %v1336_v13 }
 0x139   :  { %8845 = vst [vmem:[#allocation37_spill] sm:$0xff] %v6571_v53  ;;  %8847 = vst [vmem:[#allocation14_spill] sm:$0xff] %v6579_v56  ;;  %v6581_v41 = vpop.f32.mrb[45].mxu1  ;;  %v1908_v53 = vmul.f32 %v6149_v21, %v1773_v11  ;;  %v8849_v56 = vld [vmem:[#allocation13_spill] sm:$0xff]  ;;  %v4820_v47 = vpop.eup %4819  ;;  %v6607_v11 = vadd.f32 1.0, %v4814_v25  ;;  %4829 = verf.f32 %v1404_v46  ;;  %v6627_v46 = vmul.f32 0.5, %v6506_v14 }
 0x13a   :  { %8848 = vst [vmem:[#allocation38_spill] sm:$0xff] %v6581_v41  ;;  %v1837_v41 = vmul.f32 %v6370_v36, %v8849_v56  ;;  %2252 = vadd.xlane.f32.xlu0 %v2251_v30  ;;  %v1719_v36 = vadd.f32 1.0, %v4816_v42  ;;  %v1468_v60 = vmul.f32 0.70710677, %v6577_v27  ;;  %v4822_v29 = vpop.eup %4821  ;;  %v1467_v56 = vmul.f32 0.70710677, %v6586_v19 }
 0x13b   :  { %v6603_v49 = vpop.f32.mrb[46].mxu0  ;;  %v2056_v25 = vsel %vm161_vm0, %v1908_v53, 0.0  ;;  %v1840_v30 = vmul.f32 %v6391_v1, %v6302_v57  ;;  %4831 = verf.f32 %v1403_v48  ;;  %2084 = vadd.xlane.f32.xlu1 %v2083_v6  ;;  %v1406_v17 = vmul.f32 0.70710677, %v6601_v0 }
 0x13c   :  { %v6605_v18 = vpop.f32.mrb[46].mxu1  ;;  %v6613_v43 = vpop.f32.mrb[47].mxu0  ;;  %v1972_v42 = vmul.f32 %v6149_v21, %v1837_v41  ;;  %v6634_v53 = vadd.f32 1.0, %v4820_v47  ;;  %v1658_v13 = vadd.f32 1.0, %v4822_v29  ;;  %v6637_v59 = vmul.f32 0.5, %v6534_v23 }
 0x13d   :  { %8850 = vst [vmem:[#allocation13_spill] sm:$0xff] %v6605_v18  ;;  %v6618_v15 = vpop.f32.mrb[47].mxu1  ;;  %v6624_v18 = vadd.f32 1.0, %v4818_v24  ;;  %4833 = verf.f32 %v1468_v60  ;;  %v4824_v14 = vpop.eup %4823  ;;  %v2089_v41 = vsel %vm161_vm0, %v1919_v31, 0.0  ;;  %v6647_v24 = vld [vmem:[%s8756_s2] ss:$0 sm:$0xff]  ;;  %v1847_v23 = vmul.f32 %v1719_v36, %v6562_v10 }
 0x13e   :  { %8851 = vst [vmem:[#allocation39_spill] sm:$0xff] %v6618_v15  ;;  %2057 = vadd.xlane.f32.xlu0 %v2056_v25  ;;  %4835 = verf.f32 %v1467_v56  ;;  %v743_v47 = vadd.f32 %v6647_v24, %v6316_v39  ;;  %v4826_v48 = vpop.eup %4825  ;;  %v2248_v60 = vsel %vm161_vm0, %v1972_v42, 0.0  ;;  %v1983_v29 = vmul.f32 %v6149_v21, %v1848_v45  ;;  %v8856_v56 = vld [vmem:[#allocation15_spill] sm:$0xff] }
 0x13f   :  { %v6630_v34 = vpop.f32.mrb[48].mxu0  ;;  %v1975_v6 = vmul.f32 %v6149_v21, %v1840_v30  ;;  %v1775_v31 = vmul.f32 %v6385_v44, %v8856_v56  ;;  %v6658_v25 = vmul.f32 0.5, %v6552_v61  ;;  %4837 = verf.f32 %v1406_v17  ;;  %2090 = vadd.xlane.f32.xlu1 %v2089_v41  ;;  %v8861_v56 = vld [vmem:[#allocation17_spill] sm:$0xff] }
 0x140   :  { %8852 = vst [vmem:[#allocation40_spill] sm:$0xff] %v6630_v34  ;;  %v6632_v15 = vpop.f32.mrb[48].mxu1  ;;  %v6639_v57 = vpop.f32.mrb[49].mxu0  ;;  %v1068_v39 = vadd.f32 %v6647_v24, %v6318_v22  ;;  %v6665_v10 = vstv %s8758_s4  ;;  %v1722_v45 = vadd.f32 1.0, %v4824_v14  ;;  %v6672_v44 = vmul.f32 0.5, %v6567_v40 }
 0x141   :  { %8853 = vst [vmem:[#allocation41_spill] sm:$0xff] %v6632_v15  ;;  %8854 = vst [vmem:[#allocation42_spill] sm:$0xff] %v6639_v57  ;;  %v6641_v1 = vpop.f32.mrb[49].mxu1  ;;  %v6675_v61 = vmul.f32 0.5, %v6577_v27  ;;  %v1063_v30 = vadd.f32 %v6647_v24, %v6326_v28  ;;  %v1405_v41 = vmul.f32 0.70710677, %v743_v47  ;;  %v1786_v14 = vmul.f32 %v1658_v13, %v6596_v51 }
 0x142   :  { %8855 = vst [vmem:[#allocation43_spill] sm:$0xff] %v6641_v1  ;;  %2249 = vadd.xlane.f32.xlu0 %v2248_v60  ;;  %8857 = vst [vmem:[#allocation15_spill] sm:$0xff] %v6665_v10  ;;  %v4828_v17 = vpop.eup %4827  ;;  %v1982_v60 = vmul.f32 %v6149_v21, %v1847_v23  ;;  %v2281_v40 = vsel %vm161_vm0, %v1983_v29, 0.0  ;;  %v2257_v27 = vsel %vm161_vm0, %v1975_v6, 0.0  ;;  %v1910_v1 = vmul.f32 %v6149_v21, %v1775_v31  ;;  %v8863_v28 = vld [vmem:[#allocation16_spill] sm:$0xff] }
 0x143   :  { %v6667_v36 = vpop.f32.mrb[50].mxu0  ;;  %v4830_v10 = vpop.eup %4829  ;;  %v6692_v15 = vadd.f32 1.0, %v4826_v48  ;;  %v6695_v23 = vmul.f32 0.5, %v6586_v19  ;;  %2282 = vadd.xlane.f32.xlu1 %v2281_v40  ;;  %v1721_v29 = vadd.f32 1.0, %v4828_v17  ;;  %v6700_v6 = vmul.f32 0.5, %v6601_v0 }
 0x144   :  { %8858 = vst [vmem:[#allocation44_spill] sm:$0xff] %v6667_v36  ;;  %v6669_v42 = vpop.f32.mrb[50].mxu1  ;;  %v6679_v22 = vpop.f32.mrb[51].mxu0  ;;  %v758_v36 = vadd.f32 %v6647_v24, %v8861_v56  ;;  %v1470_v56 = vmul.f32 0.70710677, %v1068_v39  ;;  %4839 = verf.f32 %v1405_v41  ;;  %v2278_v19 = vsel %vm161_vm0, %v1982_v60, 0.0 }
 0x145   :  { %8859 = vst [vmem:[#allocation45_spill] sm:$0xff] %v6669_v42  ;;  %8860 = vst [vmem:[#allocation46_spill] sm:$0xff] %v6679_v22  ;;  %v6685_v42 = vpop.f32.mrb[51].mxu1  ;;  %v1839_v22 = vmul.f32 %v6431_v62, %v8863_v28  ;;  %v1469_v31 = vmul.f32 0.70710677, %v1063_v30  ;;  %v753_v62 = vadd.f32 %v6647_v24, %v6352_v5  ;;  %v4832_v48 = vpop.eup %4831  ;;  %v1921_v40 = vmul.f32 %v6149_v21, %v1786_v14  ;;  %v8867_v41 = vld [vmem:[#allocation18_spill] sm:$0xff] }
 0x146   :  { %8862 = vst [vmem:[#allocation17_spill] sm:$0xff] %v6685_v42  ;;  %2258 = vadd.xlane.f32.xlu0 %v2257_v27  ;;  %v1408_v42 = vmul.f32 0.70710677, %v758_v36  ;;  %v2062_v51 = vsel %vm161_vm0, %v1910_v1, 0.0  ;;  %v1850_v0 = vmul.f32 %v1722_v45, %v6627_v46  ;;  %v1660_v34 = vadd.f32 1.0, %v4830_v10  ;;  %v8868_v45 = vld [vmem:[#allocation20_spill] sm:$0xff] }
 0x147   :  { %v6697_v13 = vpop.f32.mrb[52].mxu0  ;;  %v4834_v27 = vpop.eup %4833  ;;  %v1974_v17 = vmul.f32 %v6149_v21, %v1839_v22  ;;  %4841 = verf.f32 %v1470_v56  ;;  %2279 = vadd.xlane.f32.xlu1 %v2278_v19  ;;  %v1078_v60 = vadd.f32 %v6647_v24, %v8867_v41  ;;  %v6717_v14 = vmul.f32 0.5, %v1068_v39 }
 0x148   :  { %8864 = vst [vmem:[#allocation16_spill] sm:$0xff] %v6697_v13  ;;  %v6704_v28 = vpop.f32.mrb[53].mxu0  ;;  %v8866_v13 = vld [vmem:[#allocation21_spill] sm:$0xff]  ;;  %v4836_v5 = vpop.eup %4835  ;;  %v6719_v1 = vmul.f32 0.5, %v1063_v30  ;;  %4843 = verf.f32 %v1469_v31  ;;  %v1407_v22 = vmul.f32 0.70710677, %v753_v62  ;;  %v1849_v10 = vmul.f32 %v1721_v29, %v6637_v59 }
 0x149   :  { %8865 = vst [vmem:[#allocation47_spill] sm:$0xff] %v6704_v28  ;;  %v1842_v57 = vmul.f32 %v6441_v12, %v8866_v13  ;;  %v6713_v28 = vmul.f32 0.5, %v743_v47  ;;  %v4838_v46 = vpop.eup %4837  ;;  %4845 = verf.f32 %v1408_v42  ;;  %v2095_v12 = vsel %vm161_vm0, %v1921_v40, 0.0  ;;  %v6725_v56 = vpop.f32.mrb[52].mxu1  ;;  %v8869_v13 = vld [vmem:[#allocation19_spill] sm:$0xff]  ;;  %v8870_v59 = vld [vmem:[#allocation22_spill] sm:$0xff] }
 0x14a   :  { %2063 = vadd.xlane.f32.xlu0 %v2062_v51  ;;  %v1073_v47 = vadd.f32 %v6647_v24, %v8868_v45  ;;  %v2254_v51 = vsel %vm161_vm0, %v1974_v17, 0.0  ;;  %v1985_v39 = vmul.f32 %v6149_v21, %v1850_v0  ;;  %v1777_v31 = vmul.f32 %v6439_v33, %v8869_v13  ;;  %v6732_v19 = vpop.f32.mrb[53].mxu1  ;;  %v6745_v33 = vld [vmem:[%s8757_s3] ss:$0 sm:$0xff] }
 0x14b   :  { %v1977_v30 = vmul.f32 %v6149_v21, %v1842_v57  ;;  %v6734_v42 = vadd.f32 1.0, %v4832_v48  ;;  %v1724_v40 = vadd.f32 1.0, %v4834_v27  ;;  %2096 = vadd.xlane.f32.xlu1 %v2095_v12  ;;  %v1472_v41 = vmul.f32 0.70710677, %v1078_v60 }
 0x14c   :  { %v768_v29 = vadd.f32 %v6647_v24, %v8870_v59  ;;  %v1723_v45 = vadd.f32 1.0, %v4836_v5  ;;  %v6738_v17 = vadd.f32 1.0, %v4838_v46  ;;  %v6740_v0 = vmul.f32 0.5, %v758_v36 }
 0x14d   :  { %4847 = verf.f32 %v1407_v22  ;;  %v1471_v21 = vmul.f32 0.70710677, %v1073_v47  ;;  %v1984_v57 = vmul.f32 %v6745_v33, %v1849_v10  ;;  %v1788_v48 = vmul.f32 %v1660_v34, %v6658_v25  ;;  %v8871_v34 = vld [vmem:[#allocation23_spill] sm:$0xff] }
 0x14e   :  { %2255 = vadd.xlane.f32.xlu0 %v2254_v51  ;;  %v1841_v27 = vmul.f32 %v6501_v50, %v6372_v63  ;;  %v2287_v5 = vsel %vm161_vm0, %v1985_v39, 0.0  ;;  %v2263_v46 = vsel %vm161_vm0, %v1977_v30, 0.0  ;;  %v1912_v36 = vmul.f32 %v6745_v33, %v1777_v31  ;;  %v4840_v12 = vpop.eup %4839 }
 0x14f   :  { %v763_v22 = vadd.f32 %v6647_v24, %v6376_v4  ;;  %v6756_v51 = vmul.f32 0.5, %v753_v62  ;;  %4849 = verf.f32 %v1472_v41  ;;  %2288 = vadd.xlane.f32.xlu1 %v2287_v5  ;;  %v1410_v10 = vmul.f32 0.70710677, %v768_v29 }
 0x150   :  { %v1088_v25 = vadd.f32 %v6647_v24, %v8871_v34  ;;  %v6760_v63 = vmul.f32 0.5, %v1078_v60  ;;  %v6762_v50 = vmul.f32 0.5, %v1073_v47  ;;  %v1083_v39 = vadd.f32 %v6647_v24, %v6383_v3 }
 0x151   :  { %v1852_v30 = vmul.f32 %v1724_v40, %v6675_v61  ;;  %v4842_v4 = vpop.eup %4841  ;;  %v1923_v62 = vmul.f32 %v6745_v33, %v1788_v48  ;;  %v1976_v13 = vmul.f32 %v6745_v33, %v1841_v27  ;;  %v1779_v31 = vmul.f32 %v6512_v55, %v6378_v54 }
 0x152   :  { %2264 = vadd.xlane.f32.xlu0 %v2263_v46  ;;  %v778_v41 = vadd.f32 %v6647_v24, %v6395_v7  ;;  %v4844_v60 = vpop.eup %4843  ;;  %4851 = verf.f32 %v1471_v21  ;;  %v2284_v47 = vsel %vm161_vm0, %v1984_v57, 0.0  ;;  %v2068_v59 = vsel %vm161_vm0, %v1912_v36, 0.0 }
 0x153   :  { %v1409_v3 = vmul.f32 0.70710677, %v763_v22  ;;  %v4846_v5 = vpop.eup %4845  ;;  %v6775_v61 = vadd.f32 1.0, %v4840_v12  ;;  %2285 = vadd.xlane.f32.xlu1 %v2284_v47  ;;  %v6777_v40 = vmul.f32 0.5, %v768_v29  ;;  %4853 = verf.f32 %v1410_v10  ;;  %v8872_v10 = vld [vmem:[#allocation24_spill] sm:$0xff] }
 0x154   :  { %v1474_v48 = vmul.f32 0.70710677, %v1088_v25  ;;  %v1726_v54 = vadd.f32 1.0, %v4842_v4  ;;  %v1473_v55 = vmul.f32 0.70710677, %v1083_v39  ;;  %v1987_v7 = vmul.f32 %v6745_v33, %v1852_v30  ;;  %v8873_v4 = vld [vmem:[#allocation25_spill] sm:$0xff] }
 0x155   :  { %v773_v21 = vadd.f32 %v6647_v24, %v6403_v8  ;;  %v2101_v57 = vsel %vm161_vm0, %v1923_v62, 0.0  ;;  %v2260_v27 = vsel %vm161_vm0, %v1976_v13, 0.0  ;;  %v1914_v46 = vmul.f32 %v6745_v33, %v1779_v31  ;;  %v8874_v8 = vld [vmem:[#allocation26_spill] sm:$0xff]  ;;  %v6794_v13 = vpop.f32.mrb[54].mxu0 }
 0x156   :  { %2069 = vadd.xlane.f32.xlu0 %v2068_v59  ;;  %v1412_v36 = vmul.f32 0.70710677, %v778_v41  ;;  %4855 = verf.f32 %v1409_v3  ;;  %v1851_v29 = vmul.f32 %v1723_v45, %v6695_v23  ;;  %v1843_v34 = vmul.f32 %v6542_v26, %v8872_v10  ;;  %v6799_v45 = vpop.f32.mrb[55].mxu0 }
 0x157   :  { %v4848_v12 = vpop.eup %4847  ;;  %v1098_v30 = vadd.f32 %v6647_v24, %v8873_v4  ;;  %v1725_v47 = vadd.f32 1.0, %v4844_v60  ;;  %v6790_v59 = vadd.f32 1.0, %v4846_v5  ;;  %2102 = vadd.xlane.f32.xlu1 %v2101_v57  ;;  %4857 = verf.f32 %v1474_v48 }
 0x158   :  { %v1093_v62 = vadd.f32 %v6647_v24, %v8874_v8  ;;  %v6796_v31 = vmul.f32 0.5, %v763_v22  ;;  %4859 = verf.f32 %v1473_v55  ;;  %v2293_v23 = vsel %vm161_vm0, %v1987_v7, 0.0 }
 0x159   :  { %v1411_v26 = vmul.f32 0.70710677, %v773_v21  ;;  %v4850_v3 = vpop.eup %4849  ;;  %v2074_v60 = vsel %vm161_vm0, %v1914_v46, 0.0  ;;  %4861 = verf.f32 %v1412_v36  ;;  %v1790_v5 = vmul.f32 %v6738_v17, %v6700_v6 }
 0x15a   :  { %2261 = vadd.xlane.f32.xlu0 %v2260_v27  ;;  %v788_v48 = vadd.f32 %v6647_v24, %v6427_v2  ;;  %v1986_v57 = vmul.f32 %v6745_v33, %v1851_v29  ;;  %v1978_v22 = vmul.f32 %v6745_v33, %v1843_v34  ;;  %v1476_v55 = vmul.f32 0.70710677, %v1098_v30 }
 0x15b   :  { %v1846_v7 = vmul.f32 %v6607_v11, %v6486_v37  ;;  %v6810_v27 = vmul.f32 0.5, %v1088_v25  ;;  %v6812_v10 = vmul.f32 0.5, %v1083_v39  ;;  %2294 = vadd.xlane.f32.xlu1 %v2293_v23  ;;  %v1475_v46 = vmul.f32 0.70710677, %v1093_v62 }
 0x15c   :  { %v783_v6 = vadd.f32 %v6647_v24, %v6435_v16  ;;  %v4852_v17 = vpop.eup %4851  ;;  %v6816_v2 = vadd.f32 1.0, %v4848_v12  ;;  %v6818_v36 = vadd.f32 1.0, %v4850_v3  ;;  %v6820_v29 = vmul.f32 0.5, %v778_v41 }
 0x15d   :  { %4863 = verf.f32 %v1411_v26  ;;  %v4854_v34 = vpop.eup %4853  ;;  %v1925_v37 = vmul.f32 %v6745_v33, %v1790_v5  ;;  %v1414_v11 = vmul.f32 0.70710677, %v788_v48  ;;  %v1854_v25 = vmul.f32 %v1726_v54, %v6717_v14 }
 0x15e   :  { %2075 = vadd.xlane.f32.xlu0 %v2074_v60  ;;  %v1781_v39 = vmul.f32 %v6573_v52, %v6460_v32  ;;  %v2290_v4 = vsel %vm161_vm0, %v1986_v57, 0.0  ;;  %v2266_v16 = vsel %vm161_vm0, %v1978_v22, 0.0  ;;  %4865 = verf.f32 %v1476_v55  ;;  %v8875_v55 = vld [vmem:[#allocation27_spill] sm:$0xff] }
 0x15f   :  { %v1981_v12 = vmul.f32 %v6745_v33, %v1846_v7  ;;  %v6829_v8 = vadd.f32 1.0, %v4852_v17  ;;  %2291 = vadd.xlane.f32.xlu1 %v2290_v4  ;;  %4867 = verf.f32 %v1475_v46  ;;  %v1413_v41 = vmul.f32 0.70710677, %v783_v6 }
 0x160   :  { %v1108_v23 = vadd.f32 %v6647_v24, %v6429_v38  ;;  %v4856_v14 = vpop.eup %4855  ;;  %v6833_v54 = vadd.f32 1.0, %v4854_v34  ;;  %v6835_v32 = vmul.f32 0.5, %v773_v21  ;;  %v6837_v52 = vmul.f32 0.5, %v1098_v30  ;;  %v8876_v34 = vld [vmem:[#allocation28_spill] sm:$0xff] }
 0x161   :  { %v6839_v26 = vmul.f32 0.5, %v1093_v62  ;;  %v4858_v3 = vpop.eup %4857  ;;  %v2107_v60 = vsel %vm161_vm0, %v1925_v37, 0.0  ;;  %4869 = verf.f32 %v1414_v11  ;;  %v1989_v5 = vmul.f32 %v6745_v33, %v1854_v25 }
 0x162   :  { %2267 = vadd.xlane.f32.xlu0 %v2266_v16  ;;  %v1916_v57 = vmul.f32 %v6745_v33, %v1781_v39  ;;  %v4860_v22 = vpop.eup %4859  ;;  %v2275_v38 = vsel %vm161_vm0, %v1981_v12, 0.0  ;;  %v1103_v7 = vadd.f32 %v6647_v24, %v8875_v55  ;;  %v1853_v21 = vmul.f32 %v1725_v47, %v6719_v1 }
 0x163   :  { %v1845_v30 = vmul.f32 %v6634_v53, %v6524_v58  ;;  %v4862_v62 = vpop.eup %4861  ;;  %v6850_v46 = vadd.f32 1.0, %v4856_v14  ;;  %2108 = vadd.xlane.f32.xlu1 %v2107_v60  ;;  %4871 = verf.f32 %v1413_v41  ;;  %v1478_v17 = vmul.f32 0.70710677, %v1108_v23  ;;  %v6862_v53 = vpop.f32.mrb[54].mxu1 }
 0x164   :  { %v798_v37 = vadd.f32 %v6647_v24, %v8876_v34  ;;  %v6854_v11 = vadd.f32 1.0, %v4858_v3  ;;  %v6856_v25 = vmul.f32 0.5, %v788_v48  ;;  %v1792_v1 = vmul.f32 %v6790_v59, %v6740_v0  ;;  %v6870_v12 = vpop.f32.mrb[55].mxu1 }
 0x165   :  { %v1783_v58 = vmul.f32 %v6624_v18, %v6514_v20  ;;  %v6864_v47 = vadd.f32 1.0, %v4860_v22  ;;  %v2299_v39 = vsel %vm161_vm0, %v1989_v5, 0.0  ;;  %v2080_v4 = vsel %vm161_vm0, %v1916_v57, 0.0  ;;  %8877 = vst [vmem:[#allocation21_spill] sm:$0xff] %v6870_v12  ;;  %v8878_v22 = vld [vmem:[#allocation31_spill] sm:$0xff]  ;;  %v8897_v12 = vld [vmem:[#allocation37_spill] sm:$0xff] }
 0x166   :  { %2276 = vadd.xlane.f32.xlu0 %v2275_v38  ;;  %v6868_v16 = vmul.f32 0.5, %v783_v6  ;;  %v6872_v41 = vadd.f32 1.0, %v4862_v62  ;;  %v1477_v14 = vmul.f32 0.70710677, %v1103_v7  ;;  %v1988_v0 = vmul.f32 %v6745_v33, %v1853_v21 }
 0x167   :  { %v4864_v48 = vpop.eup %4863  ;;  %v1980_v20 = vmul.f32 %v6745_v33, %v1845_v30  ;;  %2300 = vadd.xlane.f32.xlu1 %v2299_v39  ;;  %v6876_v18 = vmul.f32 0.5, %v1108_v23  ;;  %4873 = verf.f32 %v1478_v17  ;;  %v1416_v59 = vmul.f32 0.70710677, %v798_v37  ;;  %v8879_v30 = vld [vmem:[#allocation29_spill] sm:$0xff]  ;;  %v8880_v39 = vld [vmem:[#allocation6_spill] sm:$0xff] }
 0x168   :  { %v793_v6 = vadd.f32 %v6647_v24, %v6464_v35  ;;  %v4866_v3 = vpop.eup %4865  ;;  %v6880_v60 = vmul.f32 0.5, %v1103_v7  ;;  %v1927_v5 = vmul.f32 %v6745_v33, %v1792_v1  ;;  %v1918_v57 = vmul.f32 %v6745_v33, %v1783_v58 }
 0x169   :  { %v808_v38 = vadd.f32 %v6647_v24, %v8878_v22  ;;  %v4868_v55 = vpop.eup %4867  ;;  %v6886_v21 = vadd.f32 1.0, %v4864_v48  ;;  %v6888_v23 = vmul.f32 0.5, %v798_v37  ;;  %v1118_v62 = vadd.f32 %v6647_v24, %v8879_v30  ;;  %v8881_v30 = vld [vmem:[#allocation30_spill] sm:$0xff] }
 0x16a   :  { %2081 = vadd.xlane.f32.xlu0 %v2080_v4  ;;  %v1856_v35 = vmul.f32 %v6818_v36, %v6760_v63  ;;  %4875 = verf.f32 %v1477_v14  ;;  %v2296_v7 = vsel %vm161_vm0, %v1988_v0, 0.0  ;;  %v2272_v17 = vsel %vm161_vm0, %v1980_v20, 0.0 }
 0x16b   :  { %v1785_v34 = vmul.f32 %v6692_v15, %v6610_v9  ;;  %v4870_v1 = vpop.eup %4869  ;;  %v6898_v58 = vadd.f32 1.0, %v4866_v3  ;;  %2297 = vadd.xlane.f32.xlu1 %v2296_v7  ;;  %4877 = verf.f32 %v1416_v59  ;;  %v1415_v37 = vmul.f32 0.70710677, %v793_v6  ;;  %v6922_v7 = vpop.f32.mrb[56].mxu0 }
 0x16c   :  { %v803_v4 = vadd.f32 %v6647_v24, %v8880_v39  ;;  %v6902_v48 = vadd.f32 1.0, %v4868_v55  ;;  %v2113_v63 = vsel %vm161_vm0, %v1927_v5, 0.0  ;;  %v2086_v36 = vsel %vm161_vm0, %v1918_v57, 0.0  ;;  %8882 = vst [vmem:[#allocation18_spill] sm:$0xff] %v6922_v7 }
 0x16d   :  { %v1418_v14 = vmul.f32 0.70710677, %v808_v38  ;;  %v4872_v0 = vpop.eup %4871  ;;  %v6906_v20 = vmul.f32 0.5, %v793_v6  ;;  %v1480_v9 = vmul.f32 0.70710677, %v1118_v62  ;;  %v1991_v15 = vmul.f32 %v6745_v33, %v1856_v35 }
 0x16e   :  { %2273 = vadd.xlane.f32.xlu0 %v2272_v17  ;;  %v1855_v59 = vmul.f32 %v6829_v8, %v6762_v50  ;;  %v6911_v3 = vadd.f32 1.0, %v4870_v1  ;;  %v6913_v22 = vmul.f32 0.5, %v808_v38  ;;  %v1920_v55 = vmul.f32 %v6745_v33, %v1785_v34  ;;  %v8883_v38 = vld [vmem:[#allocation7_spill] sm:$0xff]  ;;  %v8885_v34 = vld [vmem:[#allocation32_spill] sm:$0xff] }
 0x16f   :  { %v1787_v5 = vmul.f32 %v6734_v42, %v6672_v44  ;;  %2114 = vadd.xlane.f32.xlu1 %v2113_v63  ;;  %4879 = verf.f32 %v1415_v37  ;;  %v6918_v6 = vmul.f32 0.5, %v1118_v62  ;;  %v1417_v57 = vmul.f32 0.70710677, %v803_v4  ;;  %v6930_v44 = vpop.f32.mrb[57].mxu0 }
 0x170   :  { %v1113_v35 = vadd.f32 %v6647_v24, %v8881_v30  ;;  %v6924_v50 = vadd.f32 1.0, %v4872_v0  ;;  %4881 = verf.f32 %v1418_v14  ;;  %v6926_v8 = vmul.f32 0.5, %v803_v4  ;;  %8884 = vst [vmem:[#allocation20_spill] sm:$0xff] %v6930_v44 }
 0x171   :  { %v818_v17 = vadd.f32 %v6647_v24, %v8883_v38  ;;  %v4874_v42 = vpop.eup %4873  ;;  %4883 = verf.f32 %v1480_v9  ;;  %v2305_v62 = vsel %vm161_vm0, %v1991_v15, 0.0  ;;  %v1128_v1 = vadd.f32 %v6647_v24, %v8885_v34  ;;  %v8886_v9 = vld [vmem:[#allocation11_spill] sm:$0xff]  ;;  %v8887_v38 = vld [vmem:[#allocation33_spill] sm:$0xff] }
 0x172   :  { %2087 = vadd.xlane.f32.xlu0 %v2086_v36  ;;  %v1990_v37 = vmul.f32 %v6745_v33, %v1855_v59  ;;  %v2092_v39 = vsel %vm161_vm0, %v1920_v55, 0.0  ;;  %v1922_v63 = vmul.f32 %v6745_v33, %v1787_v5  ;;  %v1794_v4 = vmul.f32 %v6833_v54, %v6777_v40 }
 0x173   :  { %v1789_v36 = vmul.f32 %v6775_v61, %v6713_v28  ;;  %2306 = vadd.xlane.f32.xlu1 %v2305_v62  ;;  %4885 = verf.f32 %v1417_v57  ;;  %v6942_v14 = vmul.f32 0.5, %v1113_v35  ;;  %v1479_v0 = vmul.f32 0.70710677, %v1113_v35  ;;  %v8888_v62 = vld [vmem:[#allocation12_spill] sm:$0xff] }
 0x174   :  { %v813_v15 = vadd.f32 %v6647_v24, %v8886_v9  ;;  %v4876_v59 = vpop.eup %4875  ;;  %v6946_v30 = vadd.f32 1.0, %v4874_v42  ;;  %v6948_v55 = vmul.f32 0.5, %v818_v17  ;;  %v1420_v5 = vmul.f32 0.70710677, %v818_v17 }
 0x175   :  { %v1123_v40 = vadd.f32 %v6647_v24, %v8887_v38  ;;  %v4878_v54 = vpop.eup %4877  ;;  %v6952_v28 = vmul.f32 0.5, %v1128_v1  ;;  %v1482_v61 = vmul.f32 0.70710677, %v1128_v1  ;;  %v2302_v57 = vsel %vm161_vm0, %v1990_v37, 0.0  ;;  %v8889_v38 = vld [vmem:[#allocation10_spill] sm:$0xff] }
 0x176   :  { %2093 = vadd.xlane.f32.xlu0 %v2092_v39  ;;  %v828_v35 = vadd.f32 %v6647_v24, %v8888_v62  ;;  %v2098_v34 = vsel %vm161_vm0, %v1922_v63, 0.0  ;;  %v1929_v42 = vmul.f32 %v6745_v33, %v1794_v4  ;;  %v1924_v39 = vmul.f32 %v6745_v33, %v1789_v36 }
 0x177   :  { %v1857_v17 = vmul.f32 %v6864_v47, %v6812_v10  ;;  %v6962_v9 = vadd.f32 1.0, %v4876_v59  ;;  %4887 = verf.f32 %v1479_v0  ;;  %2303 = vadd.xlane.f32.xlu1 %v2302_v57  ;;  %v1419_v1 = vmul.f32 0.70710677, %v813_v15  ;;  %v8890_v10 = vld [vmem:[#allocation35_spill] sm:$0xff]  ;;  %v8891_v0 = vld [vmem:[#allocation34_spill] sm:$0xff]  ;;  %v6978_v57 = vpop.f32.mrb[56].mxu1 }
 0x178   :  { %v1138_v37 = vadd.f32 %v6647_v24, %v8889_v38  ;;  %v6966_v44 = vadd.f32 1.0, %v4878_v54  ;;  %4889 = verf.f32 %v1420_v5  ;;  %v1481_v63 = vmul.f32 0.70710677, %v1123_v40  ;;  %8892 = vst [vmem:[#allocation19_spill] sm:$0xff] %v6978_v57 }
 0x179   :  { %v1791_v4 = vmul.f32 %v6816_v2, %v6756_v51  ;;  %v4880_v36 = vpop.eup %4879  ;;  %4891 = verf.f32 %v1482_v61  ;;  %v1422_v62 = vmul.f32 0.70710677, %v828_v35  ;;  %v6972_v47 = vadd.f32 %v6647_v24, %v8890_v10  ;;  %v6984_v61 = vpop.f32.mrb[57].mxu1 }
 0x17a   :  { %2099 = vadd.xlane.f32.xlu0 %v2098_v34  ;;  %v6976_v59 = vadd.f32 %v6647_v24, %v8891_v0  ;;  %v4882_v54 = vpop.eup %4881  ;;  %v2119_v5 = vsel %vm161_vm0, %v1929_v42, 0.0  ;;  %v2104_v34 = vsel %vm161_vm0, %v1924_v39, 0.0  ;;  %v1992_v51 = vmul.f32 %v6745_v33, %v1857_v17  ;;  %8893 = vst [vmem:[#allocation22_spill] sm:$0xff] %v6984_v61  ;;  %v8894_v0 = vld [vmem:[#allocation8_spill] sm:$0xff]  ;;  %v8895_v17 = vld [vmem:[#allocation9_spill] sm:$0xff] }
 0x17b   :  { %v1926_v2 = vmul.f32 %v6745_v33, %v1791_v4  ;;  %v4884_v38 = vpop.eup %4883  ;;  %v6986_v10 = vmul.f32 0.5, %v813_v15  ;;  %4893 = verf.f32 %v1419_v1  ;;  %v1484_v7 = vmul.f32 0.70710677, %v1138_v37  ;;  %2120 = vadd.xlane.f32.xlu1 %v2119_v5  ;;  %v8896_v5 = vld [vmem:[#allocation14_spill] sm:$0xff] }
 0x17c   :  { %v6990_v57 = vadd.f32 %v6647_v24, %v8894_v0  ;;  %v6992_v42 = vmul.f32 0.5, %v1123_v40  ;;  %4895 = verf.f32 %v1481_v63  ;;  %v6994_v39 = vmul.f32 0.5, %v828_v35 }
 0x17d   :  { %v6998_v4 = vadd.f32 %v6647_v24, %v8895_v17  ;;  %v4886_v61 = vpop.eup %4885  ;;  %4897 = verf.f32 %v1422_v62  ;;  %v1421_v15 = vmul.f32 0.70710677, %v6972_v47  ;;  %v1483_v1 = vmul.f32 0.70710677, %v6976_v59 }
 0x17e   :  { %2105 = vadd.xlane.f32.xlu0 %v2104_v34  ;;  %v7004_v34 = vadd.f32 %v6647_v24, %v8896_v5  ;;  %v2308_v40 = vsel %vm161_vm0, %v1992_v51, 0.0  ;;  %v2110_v63 = vsel %vm161_vm0, %v1926_v2, 0.0  ;;  %v1796_v35 = vmul.f32 %v6872_v41, %v6820_v29 }
 0x17f   :  { %v1858_v0 = vmul.f32 %v6854_v11, %v6810_v27  ;;  %v7012_v17 = vmul.f32 0.5, %v1138_v37  ;;  %4899 = verf.f32 %v1484_v7  ;;  %v1424_v62 = vmul.f32 0.70710677, %v6990_v57  ;;  %2309 = vadd.xlane.f32.xlu1 %v2308_v40  ;;  %v8898_v37 = vld [vmem:[#allocation36_spill] sm:$0xff] }
 0x180   :  { %v1859_v5 = vmul.f32 %v6902_v48, %v6839_v26  ;;  %v1486_v51 = vmul.f32 0.70710677, %v6998_v4  ;;  %v7020_v2 = vadd.f32 %v6647_v24, %v8897_v12  ;;  %v1931_v29 = vmul.f32 %v6745_v33, %v1796_v35  ;;  %v7035_v35 = vpop.f32.mrb[58].mxu0 }
 0x181   :  { %v1993_v27 = vmul.f32 %v6745_v33, %v1858_v0  ;;  %v4888_v11 = vpop.eup %4887  ;;  %v7024_v41 = vadd.f32 1.0, %v4880_v36  ;;  %v7026_v7 = vadd.f32 1.0, %v4882_v54  ;;  %4901 = verf.f32 %v1421_v15  ;;  %8899 = vst [vmem:[#allocation23_spill] sm:$0xff] %v7035_v35 }
 0x182   :  { %2111 = vadd.xlane.f32.xlu0 %v2110_v63  ;;  %v7030_v40 = vadd.f32 %v6647_v24, %v8898_v37  ;;  %v4890_v26 = vpop.eup %4889  ;;  %4903 = verf.f32 %v1483_v1  ;;  %v1423_v48 = vmul.f32 0.70710677, %v7004_v34  ;;  %v2125_v12 = vsel %vm161_vm0, %v1931_v29, 0.0  ;;  %v7044_v1 = vpop.f32.mrb[59].mxu0 }
 0x183   :  { %v2311_v63 = vsel %vm161_vm0, %v1993_v27, 0.0  ;;  %v4892_v0 = vpop.eup %4891  ;;  %4905 = verf.f32 %v1424_v62  ;;  %v7039_v36 = vadd.f32 %v6647_v24, %v6603_v49  ;;  %2126 = vadd.xlane.f32.xlu1 %v2125_v12  ;;  %v1994_v54 = vmul.f32 %v6745_v33, %v1859_v5  ;;  %8900 = vst [vmem:[#allocation24_spill] sm:$0xff] %v7044_v1 }
 0x184   :  { %v1793_v15 = vmul.f32 %v6850_v46, %v6796_v31  ;;  %v7046_v29 = vadd.f32 1.0, %v4884_v38  ;;  %4907 = verf.f32 %v1486_v51  ;;  %v1488_v27 = vmul.f32 0.70710677, %v7020_v2  ;;  %v8901_v38 = vld [vmem:[#allocation38_spill] sm:$0xff] }
 0x185   :  { %v1798_v62 = vmul.f32 %v6911_v3, %v6856_v25  ;;  %v4894_v37 = vpop.eup %4893  ;;  %v1485_v49 = vmul.f32 0.70710677, %v7030_v40  ;;  %v7054_v12 = vadd.f32 %v6647_v24, %v6613_v43  ;;  %v1860_v31 = vmul.f32 %v6898_v58, %v6837_v52 }
 0x186   :  { %2312 = vadd.xlane.f32.xlu0 %v2311_v63  ;;  %v1928_v5 = vmul.f32 %v6745_v33, %v1793_v15  ;;  %v4896_v46 = vpop.eup %4895  ;;  %4909 = verf.f32 %v1423_v48  ;;  %v7061_v51 = vadd.f32 %v6647_v24, %v8901_v38  ;;  %v2314_v25 = vsel %vm161_vm0, %v1994_v54, 0.0 }
 0x187   :  { %v1933_v3 = vmul.f32 %v6745_v33, %v1798_v62  ;;  %v4898_v63 = vpop.eup %4897  ;;  %v1426_v1 = vmul.f32 0.70710677, %v7039_v36  ;;  %2315 = vadd.xlane.f32.xlu1 %v2314_v25  ;;  %v1995_v15 = vmul.f32 %v6745_v33, %v1860_v31  ;;  %v1861_v52 = vmul.f32 %v6962_v9, %v6880_v60  ;;  %v8903_v31 = vld [vmem:[#allocation13_spill] sm:$0xff] }
 0x188   :  { %v2116_v43 = vsel %vm161_vm0, %v1928_v5, 0.0  ;;  %v7070_v58 = vadd.f32 1.0, %v4886_v61  ;;  %v7073_v48 = vmul.f32 0.5, %v6972_v47  ;;  %v7076_v54 = vmul.f32 0.5, %v6976_v59 }
 0x189   :  { %4911 = verf.f32 %v1488_v27  ;;  %v4900_v62 = vpop.eup %4899  ;;  %v7078_v38 = vadd.f32 1.0, %v4888_v11  ;;  %v1425_v5 = vmul.f32 0.70710677, %v7054_v12  ;;  %v1168_v25 = vadd.f32 %v6647_v24, %v8903_v31 }
 0x18a   :  { %8902 = vst [vmem:[#allocation25_spill] sm:$0xff] %v7073_v48  ;;  %2117 = vadd.xlane.f32.xlu0 %v2116_v43  ;;  %4913 = verf.f32 %v1485_v49  ;;  %v1487_v60 = vmul.f32 0.70710677, %v7061_v51  ;;  %v2131_v9 = vsel %vm161_vm0, %v1933_v3, 0.0  ;;  %v1996_v47 = vmul.f32 %v6745_v33, %v1861_v52  ;;  %v7093_v43 = vpop.xlane.xlu1 %2222 }
 0x18b   :  { %v1795_v59 = vmul.f32 %v6886_v21, %v6835_v32  ;;  %v4902_v61 = vpop.eup %4901  ;;  %4915 = verf.f32 %v1426_v1  ;;  %2132 = vadd.xlane.f32.xlu1 %v2131_v9  ;;  %v2317_v11 = vsel %vm161_vm0, %v1995_v15, 0.0  ;;  %v1800_v27 = vmul.f32 %v6966_v44, %v6888_v23  ;;  %v7103_v1 = vpop.xlane.xlu0 %2030 }
 0x18c   :  { %v1862_v49 = vmul.f32 %v6946_v30, %v6876_v18  ;;  %v4904_v31 = vpop.eup %4903  ;;  %v7095_v3 = vadd.f32 1.0, %v4890_v26  ;;  %v7097_v52 = vadd.f32 1.0, %v4892_v0  ;;  %v7100_v32 = vmul.f32 0.5, %v6990_v57  ;;  %v8905_v26 = vld [vmem:[#allocation39_spill] sm:$0xff] }
 0x18d   :  { %v1930_v21 = vmul.f32 %v6745_v33, %v1795_v59  ;;  %v4906_v15 = vpop.eup %4905  ;;  %v7105_v23 = vadd.f32 1.0, %v4894_v37  ;;  %v7108_v18 = vmul.f32 0.5, %v6998_v4  ;;  %4917 = verf.f32 %v1425_v5 }
 0x18e   :  { %2318 = vadd.xlane.f32.xlu0 %v2317_v11  ;;  %v1490_v44 = vmul.f32 0.70710677, %v1168_v25  ;;  %v4908_v30 = vpop.eup %4907  ;;  %4919 = verf.f32 %v1487_v60  ;;  %v1163_v0 = vadd.f32 %v6647_v24, %v8905_v26  ;;  %v2320_v57 = vsel %vm161_vm0, %v1996_v47, 0.0 }
 0x18f   :  { %8904 = vst [vmem:[#allocation26_spill] sm:$0xff] %v7108_v18  ;;  %v1935_v9 = vmul.f32 %v6745_v33, %v1800_v27  ;;  %v7114_v59 = vadd.f32 1.0, %v4896_v46  ;;  %v1295_v11 = vmul.f32 0.5, %v7004_v34  ;;  %2321 = vadd.xlane.f32.xlu1 %v2320_v57  ;;  %v2122_v37 = vsel %vm161_vm0, %v1930_v21, 0.0  ;;  %v8908_v27 = vld [vmem:[#allocation40_spill] sm:$0xff]  ;;  %v2037_v21 = vpop.xlane.xlu1 %2036 }
 0x190   :  { %v1997_v4 = vmul.f32 %v6745_v33, %v1862_v49  ;;  %v4910_v5 = vpop.eup %4909  ;;  %v7119_v35 = vadd.f32 1.0, %v4898_v63  ;;  %v7121_v60 = vadd.f32 1.0, %v4900_v62  ;;  %v7124_v26 = vmul.f32 0.5, %v7030_v40  ;;  %v7134_v63 = vpop.f32.mrb[58].mxu1 }
 0x191   :  { %v7127_v47 = vmul.f32 0.5, %v7039_v36  ;;  %v7129_v46 = vadd.f32 1.0, %v4902_v61  ;;  %v1360_v34 = vmul.f32 0.5, %v7020_v2  ;;  %4921 = verf.f32 %v1490_v44  ;;  %8909 = vst [vmem:[#allocation31_spill] sm:$0xff] %v7134_v63 }
 0x192   :  { %8906 = vst [vmem:[#allocation27_spill] sm:$0xff] %v7124_v26  ;;  %2123 = vadd.xlane.f32.xlu0 %v2122_v37  ;;  %v858_v49 = vadd.f32 %v6647_v24, %v8908_v27  ;;  %v1489_v57 = vmul.f32 0.70710677, %v1163_v0  ;;  %v2137_v40 = vsel %vm161_vm0, %v1935_v9, 0.0  ;;  %v1802_v36 = vmul.f32 %v7026_v7, %v6913_v22  ;;  %v2028_v37 = vpop.xlane.xlu0 %2027  ;;  %v7141_v26 = vpop.f32.mrb[59].mxu1  ;;  %v8911_v7 = vld [vmem:[#allocation42_spill] sm:$0xff] }
 0x193   :  { %8907 = vst [vmem:[#allocation28_spill] sm:$0xff] %v7129_v46  ;;  %v4912_v62 = vpop.eup %4911  ;;  %v1797_v61 = vmul.f32 %v6924_v50, %v6868_v16  ;;  %8910 = vst [vmem:[#allocation29_spill] sm:$0xff] %v7141_v26  ;;  %v7143_v44 = vadd.f32 1.0, %v4904_v31  ;;  %v7146_v27 = vmul.f32 0.5, %v7054_v12  ;;  %v7149_v63 = vmul.f32 0.5, %v7061_v51  ;;  %2138 = vadd.xlane.f32.xlu1 %v2137_v40 }
 0x194   :  { %v4914_v2 = vpop.eup %4913  ;;  %v2323_v9 = vsel %vm161_vm0, %v1997_v4, 0.0  ;;  %v1679_v46 = vadd.f32 1.0, %v4910_v5  ;;  %v7152_v22 = vmul.f32 0.5, %v1168_v25  ;;  %v853_v16 = vadd.f32 %v6647_v24, %v8911_v7  ;;  %v2229_v7 = vpop.xlane.xlu1 %2228 }
 0x195   :  { %v1937_v50 = vmul.f32 %v6745_v33, %v1802_v36  ;;  %v4916_v31 = vpop.eup %4915  ;;  %v7157_v26 = vadd.f32 1.0, %v4906_v15  ;;  %v1744_v12 = vadd.f32 1.0, %v4912_v62  ;;  %v1428_v48 = vmul.f32 0.70710677, %v858_v49  ;;  %v8914_v36 = vld [vmem:[#allocation41_spill] sm:$0xff] }
 0x196   :  { %2324 = vadd.xlane.f32.xlu0 %v2323_v9  ;;  %v1932_v51 = vmul.f32 %v6745_v33, %v1797_v61  ;;  %v7160_v18 = vadd.f32 1.0, %v4908_v30  ;;  %v7162_v40 = vmul.f32 0.5, %v1163_v0  ;;  %4923 = verf.f32 %v1489_v57 }
 0x197   :  { %v2143_v25 = vsel %vm161_vm0, %v1937_v50, 0.0  ;;  %v4918_v4 = vpop.eup %4917  ;;  %v7165_v5 = vadd.f32 1.0, %v4914_v2  ;;  %v7167_v9 = vmul.f32 0.5, %v858_v49  ;;  %v1178_v15 = vadd.f32 %v6647_v24, %v8914_v36  ;;  %v8916_v50 = vld [vmem:[#allocation15_spill] sm:$0xff]  ;;  %v2220_v2 = vpop.xlane.xlu0 %2219 }
 0x198   :  { %8912 = vst [vmem:[#allocation6_spill] sm:$0xff] %v7160_v18  ;;  %2144 = vadd.xlane.f32.xlu1 %v2143_v25  ;;  %v2128_v62 = vsel %vm161_vm0, %v1932_v51, 0.0  ;;  %v4920_v61 = vpop.eup %4919  ;;  %v7172_v30 = vmul.f32 %v1679_v46, %v1295_v11  ;;  %v7174_v0 = vadd.f32 1.0, %v4916_v31  ;;  %v1427_v57 = vmul.f32 0.70710677, %v853_v16  ;;  %v7178_v49 = vpop.f32.mrb[60].mxu1 }
 0x199   :  { %8913 = vst [vmem:[#allocation30_spill] sm:$0xff] %v7165_v5  ;;  %v2477_v18 = vadd.f32 %v8916_v50, %v7093_v43  ;;  %8917 = vst [vmem:[#allocation32_spill] sm:$0xff] %v7178_v49  ;;  %v7180_v5 = vmul.f32 %v1744_v12, %v1360_v34  ;;  %4925 = verf.f32 %v1428_v48  ;;  %v7182_v25 = vmul.f32 0.5, %v853_v16  ;;  %v7186_v11 = vpop.f32.mrb[60].mxu0  ;;  %v7188_v46 = vpop.f32.mrb[61].mxu1 }
 0x19a   :  { %8915 = vst [vmem:[#allocation7_spill] sm:$0xff] %v7172_v30  ;;  %2129 = vadd.xlane.f32.xlu0 %v2128_v62  ;;  %v2413_v51 = vadd.f32 %v8916_v50, %v7103_v1  ;;  %8919 = vst [vmem:[#allocation33_spill] sm:$0xff] %v7186_v11  ;;  %v7190_v31 = vmul.f32 0.5, %v1178_v15  ;;  %v2415_v43 = vadd.f32 %v8916_v50, %v2037_v21  ;;  %v7197_v48 = vpop.f32.mrb[61].mxu0  ;;  %v1681_v12 = vadd.f32 1.0, %v4918_v4 }
 0x19b   :  { %8918 = vst [vmem:[#allocation11_spill] sm:$0xff] %v7180_v5  ;;  %8920 = vst [vmem:[#allocation12_spill] sm:$0xff] %v7188_v46  ;;  %v1804_v36 = vmul.f32 %v7095_v3, %v6948_v55  ;;  %v1864_v34 = vmul.f32 %v7046_v29, %v6918_v6  ;;  %v4922_v16 = vpop.eup %4921  ;;  %v1743_v62 = vadd.f32 1.0, %v4920_v61  ;;  %v1492_v1 = vmul.f32 0.70710677, %v1178_v15  ;;  %v8925_v3 = vld [vmem:[#allocation43_spill] sm:$0xff]  ;;  %v2034_v61 = vpop.xlane.xlu1 %2033 }
 0x19c   :  { %8921 = vst [vmem:[#allocation10_spill] sm:$0xff] %v7197_v48  ;;  %v8922_v49 = vlaneseq  ;;  %4927 = verf.f32 %v1427_v57  ;;  %v4325_v46 = vmul.f32 -1.442695, %v2477_v18  ;;  %v1173_v6 = vadd.f32 %v6647_v24, %v8925_v3 }
 0x19d   :  { %v1939_v30 = vmul.f32 %v6745_v33, %v1804_v36  ;;  %v1999_v21 = vmul.f32 %v6745_v33, %v1864_v34  ;;  %v4261_v29 = vmul.f32 -1.442695, %v2413_v51  ;;  %v2412_v4 = vadd.f32 %v8916_v50, %v2028_v37  ;;  %v2226_v36 = vpop.xlane.xlu0 %2225 }
 0x19e   :  { %v7200_v11 = vand.u32 127, %v8922_v49  ;;  %v7205_v55 = vshrl.u32 %v8922_v49, 7  ;;  %v4263_v15 = vmul.f32 -1.442695, %v2415_v43  ;;  %v1806_v18 = vmul.f32 %v7119_v35, %v6994_v39  ;;  %v7225_v39 = vld [vmem:[%s8756_s2] ss:$0 sm:$0xff] }
 0x19f   :  { %v2149_v48 = vsel %vm161_vm0, %v1939_v30, 0.0  ;;  %v2329_v57 = vsel %vm161_vm0, %v1999_v21, 0.0  ;;  %v7215_v34 = vmul.f32 %v1681_v12, %v7146_v27  ;;  %v7217_v49 = vadd.f32 1.0, %v4922_v16  ;;  %v8927_v35 = vld [vmem:[#allocation44_spill] sm:$0xff] }
 0x1a0   :  { %8923 = vst [vmem:[#allocation35_spill] sm:$0xff] %v7200_v11  ;;  %8924 = vst [vmem:[#allocation34_spill] sm:$0xff] %v7205_v55  ;;  %4929 = verf.f32 %v1492_v1  ;;  %2150 = vadd.xlane.f32.xlu1 %v2149_v48  ;;  %2330 = vadd.xlane.f32.xlu0 %v2329_v57  ;;  %v1799_v24 = vmul.f32 %v7024_v41, %v6906_v20  ;;  %v4924_v37 = vpop.eup %4923  ;;  %v3442_v30 = vadd.s32 4294967288, %v7200_v11  ;;  %v4260_v43 = vmul.f32 -1.442695, %v2412_v4  ;;  %v2043_v41 = vpop.xlane.xlu1 %2042 }
 0x1a1   :  { %8926 = vst [vmem:[#allocation8_spill] sm:$0xff] %v7215_v34  ;;  %4931 = vpow2.f32 %v4325_v46  ;;  %v868_v27 = vadd.f32 %v7225_v39, %v8927_v35  ;;  %v1941_v51 = vmul.f32 %v6745_v33, %v1806_v18  ;;  %v2479_v48 = vadd.f32 %v8916_v50, %v2229_v7  ;;  %v8928_v46 = vld [vmem:[#allocation46_spill] sm:$0xff]  ;;  %v2235_v4 = vpop.xlane.xlu0 %2234 }
 0x1a2   :  { %4933 = vpow2.f32 %v4261_v29  ;;  %v1934_v20 = vmul.f32 %v6745_v33, %v1799_v24  ;;  %v1491_v16 = vmul.f32 0.70710677, %v1173_v6  ;;  %v863_v12 = vadd.f32 %v7225_v39, %v8928_v46  ;;  %v8931_v24 = vld [vmem:[#allocation45_spill] sm:$0xff] }
 0x1a3   :  { %4935 = vpow2.f32 %v4263_v15  ;;  %v2155_v1 = vsel %vm161_vm0, %v1941_v51, 0.0  ;;  %v4926_v21 = vpop.eup %4925  ;;  %v7236_v3 = vmul.f32 %v1743_v62, %v7149_v63  ;;  %v7238_v57 = vadd.f32 1.0, %v4924_v37 }
 0x1a4   :  { %v2476_v29 = vadd.f32 %v8916_v50, %v2220_v2  ;;  %2156 = vadd.xlane.f32.xlu1 %v2155_v1  ;;  %v2134_v7 = vsel %vm161_vm0, %v1934_v20, 0.0  ;;  %v7243_v18 = vsub.s32 %v3442_v30, %v7205_v55  ;;  %v1430_v15 = vmul.f32 0.70710677, %v868_v27  ;;  %v7254_v1 = vpop.xlane.xlu1 %2231 }
 0x1a5   :  { %8929 = vst [vmem:[#allocation9_spill] sm:$0xff] %v7236_v3  ;;  %v1188_v35 = vadd.f32 %v7225_v39, %v8931_v24  ;;  %2135 = vadd.xlane.f32.xlu0 %v2134_v7  ;;  %v2414_v51 = vadd.f32 %v8916_v50, %v2034_v61  ;;  %4937 = vpow2.f32 %v4260_v43  ;;  %v4327_v63 = vmul.f32 -1.442695, %v2479_v48  ;;  %v8932_v7 = vld [vmem:[#allocation17_spill] sm:$0xff] }
 0x1a6   :  { %8930 = vst [vmem:[#allocation14_spill] sm:$0xff] %v7243_v18  ;;  %v1808_v62 = vmul.f32 %v7157_v26, %v7100_v32  ;;  %v1863_v2 = vmul.f32 %v7078_v38, %v6942_v14  ;;  %v4928_v37 = vpop.eup %4927  ;;  %4939 = verf.f32 %v1491_v16  ;;  %v3456_v30 = vadd.s32 4294967272, %v7200_v11  ;;  %v7264_v14 = vpop.f32.mrb[62].mxu0 }
 0x1a7   :  { %v1429_v20 = vmul.f32 0.70710677, %v863_v12  ;;  %v2478_v46 = vadd.f32 %v8916_v50, %v2226_v36  ;;  %v7258_v61 = vadd.f32 %v7225_v39, %v8932_v7  ;;  %v4324_v43 = vmul.f32 -1.442695, %v2476_v29  ;;  %8933 = vst [vmem:[#allocation37_spill] sm:$0xff] %v7264_v14  ;;  %v7270_v24 = vpop.f32.mrb[63].mxu0 }
 0x1a8   :  { %v1943_v48 = vmul.f32 %v6745_v33, %v1808_v62  ;;  %v1998_v32 = vmul.f32 %v6745_v33, %v1863_v2  ;;  %v7266_v38 = vmul.f32 0.5, %v1173_v6  ;;  %v7268_v16 = vmul.f32 0.5, %v868_v27  ;;  %8934 = vst [vmem:[#allocation36_spill] sm:$0xff] %v7270_v24  ;;  %v7296_v24 = vpop.f32.mrb[62].mxu1 }
 0x1a9   :  { %4941 = verf.f32 %v1430_v15  ;;  %v4262_v36 = vmul.f32 -1.442695, %v2414_v51  ;;  %v1494_v7 = vmul.f32 0.70710677, %v1188_v35  ;;  %v7274_v2 = vadd.f32 1.0, %v4926_v21  ;;  %8937 = vst [vmem:[#allocation39_spill] sm:$0xff] %v7296_v24 }
 0x1aa   :  { %v4930_v34 = vpop.eup %4929  ;;  %4943 = vpow2.f32 %v4327_v63  ;;  %v2161_v29 = vsel %vm161_vm0, %v1943_v48, 0.0  ;;  %v2326_v62 = vsel %vm161_vm0, %v1998_v32, 0.0  ;;  %v7277_v14 = vsub.s32 %v3456_v30, %v7205_v55 }
 0x1ab   :  { %v7262_v26 = vpop.xlane.xlu0 %2039  ;;  %v4932_v33 = vpop.eup %4931  ;;  %4945 = verf.f32 %v1429_v20  ;;  %v4326_v6 = vmul.f32 -1.442695, %v2478_v46  ;;  %2162 = vadd.xlane.f32.xlu1 %v2161_v29  ;;  %2327 = vadd.xlane.f32.xlu0 %v2326_v62  ;;  %v7279_v15 = vmul.f32 0.5, %v863_v12  ;;  %v7283_v51 = vsub.s32 %v7200_v11, %v7205_v55 }
 0x1ac   :  { %8935 = vst [vmem:[#allocation38_spill] sm:$0xff] %v7277_v14  ;;  %v4934_v27 = vpop.eup %4933  ;;  %v1493_v63 = vmul.f32 0.70710677, %v7258_v61  ;;  %4947 = vpow2.f32 %v4324_v43  ;;  %v1683_v21 = vadd.f32 1.0, %v4928_v37  ;;  %v2417_v30 = vadd.f32 %v8916_v50, %v2043_v41  ;;  %v7289_v46 = vpop.xlane.xlu1 %2048  ;;  %v7301_v41 = vld [vmem:[%s8757_s3] ss:$0 sm:$0xff] }
 0x1ad   :  { %8936 = vst [vmem:[#allocation13_spill] sm:$0xff] %v7283_v51  ;;  %v4936_v48 = vpop.eup %4935  ;;  %4949 = vpow2.f32 %v4262_v36  ;;  %v1810_v20 = vmul.f32 %v7174_v0, %v7127_v47  ;;  %v7293_v12 = vadd.f32 1.0, %v4930_v34  ;;  %v2989_v29 = vadd.f32 1.0, %v4932_v33  ;;  %v7306_v34 = vpop.f32.mrb[63].mxu1 }
 0x1ae   :  { %4951 = verf.f32 %v1494_v7  ;;  %v2481_v62 = vadd.f32 %v8916_v50, %v2235_v4  ;;  %v2925_v43 = vadd.f32 1.0, %v4934_v27  ;;  %v1866_v0 = vmul.f32 %v7097_v52, %v6952_v28  ;;  %8938 = vst [vmem:[#allocation40_spill] sm:$0xff] %v7306_v34  ;;  %v8940_v4 = vld [vmem:[#allocation16_spill] sm:$0xff]  ;;  %v8941_v27 = vld [vmem:[#allocation47_spill] sm:$0xff] }
 0x1af   :  { %v7291_v32 = vpop.xlane.xlu0 %2240  ;;  %4953 = vpow2.f32 %v4326_v6  ;;  %v1945_v47 = vmul.f32 %v7301_v41, %v1810_v20  ;;  %v4938_v37 = vpop.eup %4937  ;;  %v2927_v36 = vadd.f32 1.0, %v4936_v48  ;;  %v7308_v7 = vmul.f32 0.5, %v1188_v35 }
 0x1b0   :  { %4955 = verf.f32 %v1493_v63  ;;  %v7312_v33 = vadd.f32 %v7225_v39, %v8940_v4  ;;  %v4940_v6 = vpop.eup %4939  ;;  %v7316_v24 = vadd.f32 %v7225_v39, %v8941_v27  ;;  %v4265_v20 = vmul.f32 -1.442695, %v2417_v30  ;;  %v7320_v52 = vpop.xlane.xlu1 %2054 }
 0x1b1   :  { %8939 = vst [vmem:[#allocation42_spill] sm:$0xff] %v7308_v7  ;;  %v2167_v3 = vsel %vm161_vm0, %v1945_v47, 0.0  ;;  %v2001_v28 = vmul.f32 %v7301_v41, %v1866_v0  ;;  %v7325_v35 = vmul.f32 %v1683_v21, %v7182_v25  ;;  %4957 = vrcp.f32 %v2989_v29 }
 0x1b2   :  { %v3449_v63 = vadd.s32 4294967280, %v7200_v11  ;;  %v4329_v4 = vmul.f32 -1.442695, %v2481_v62  ;;  %2168 = vadd.xlane.f32.xlu1 %v2167_v3  ;;  %4959 = vrcp.f32 %v2925_v43  ;;  %v2924_v27 = vadd.f32 1.0, %v4938_v37 }
 0x1b3   :  { %v7322_v48 = vpop.xlane.xlu0 %2045  ;;  %8942 = vst [vmem:[#allocation41_spill] sm:$0xff] %v7325_v35  ;;  %v4942_v34 = vpop.eup %4941  ;;  %v7329_v30 = vmul.f32 0.5, %v7258_v61  ;;  %v2335_v47 = vsel %vm161_vm0, %v2001_v28, 0.0  ;;  %v1747_v5 = vadd.f32 1.0, %v4940_v6  ;;  %4961 = vrcp.f32 %v2927_v36 }
 0x1b4   :  { %v4944_v0 = vpop.eup %4943  ;;  %v1432_v7 = vmul.f32 0.70710677, %v7312_v33  ;;  %2336 = vadd.xlane.f32.xlu0 %v2335_v47  ;;  %v2480_v25 = vadd.f32 %v8916_v50, %v7254_v1  ;;  %v1431_v3 = vmul.f32 0.70710677, %v7316_v24  ;;  %4963 = vpow2.f32 %v4265_v20  ;;  %v7340_v62 = vpop.xlane.xlu1 %2060 }
 0x1b5   :  { %v4946_v21 = vpop.eup %4945  ;;  %v2416_v29 = vadd.f32 %v8916_v50, %v7262_v26  ;;  %v1874_v61 = vmul.f32 %v7217_v49, %v7152_v22  ;;  %v7345_v36 = vsub.s32 %v3449_v63, %v7205_v55  ;;  %4965 = vpow2.f32 %v4329_v4 }
 0x1b6   :  { %v4948_v37 = vpop.eup %4947  ;;  %v4328_v1 = vmul.f32 -1.442695, %v2480_v25  ;;  %v1801_v6 = vmul.f32 %v7070_v58, %v6926_v8  ;;  %4967 = vrcp.f32 %v2924_v27  ;;  %v2991_v28 = vadd.f32 1.0, %v4944_v0 }
 0x1b7   :  { %v7342_v43 = vpop.xlane.xlu0 %2237  ;;  %8943 = vst [vmem:[#allocation15_spill] sm:$0xff] %v7345_v36  ;;  %v4950_v20 = vpop.eup %4949  ;;  %v7351_v26 = vadd.f32 %v7225_v39, %v6725_v56  ;;  %v2009_v22 = vmul.f32 %v7301_v41, %v1874_v61  ;;  %v7355_v47 = vmul.f32 %v1747_v5, %v7266_v38  ;;  %4969 = verf.f32 %v1432_v7 }
 0x1b8   :  { %v4952_v49 = vpop.eup %4951  ;;  %v4264_v63 = vmul.f32 -1.442695, %v2416_v29  ;;  %v1936_v4 = vmul.f32 %v7301_v41, %v1801_v6  ;;  %v1685_v35 = vadd.f32 1.0, %v4946_v21  ;;  %v2988_v8 = vadd.f32 1.0, %v4948_v37  ;;  %v7359_v27 = vpop.xlane.xlu1 %2066 }
 0x1b9   :  { %8944 = vst [vmem:[#allocation43_spill] sm:$0xff] %v7355_v47  ;;  %v4954_v25 = vpop.eup %4953  ;;  %4971 = verf.f32 %v1431_v3  ;;  %v2359_v58 = vsel %vm161_vm0, %v2009_v22, 0.0  ;;  %v2926_v61 = vadd.f32 1.0, %v4950_v20  ;;  %v1193_v5 = vadd.f32 %v7225_v39, %v6732_v19 }
 0x1ba   :  { %v4956_v0 = vpop.eup %4955  ;;  %4973 = vpow2.f32 %v4328_v1  ;;  %2360 = vadd.xlane.f32.xlu1 %v2359_v58  ;;  %v2140_v38 = vsel %vm161_vm0, %v1936_v4, 0.0  ;;  %v7366_v7 = vadd.f32 1.0, %v4942_v34  ;;  %v1496_v21 = vmul.f32 0.70710677, %v7351_v26 }
 0x1bb   :  { %v7361_v56 = vpop.xlane.xlu0 %2246  ;;  %4975 = vrcp.f32 %v2991_v28  ;;  %2141 = vadd.xlane.f32.xlu0 %v2140_v38  ;;  %v1873_v3 = vmul.f32 %v7238_v57, %v7162_v40  ;;  %v7371_v29 = vpop.eup %4957  ;;  %v2990_v37 = vadd.f32 1.0, %v4954_v25  ;;  %v7374_v6 = vmul.f32 0.5, %v7312_v33 }
 0x1bc   :  { %v3470_v19 = vadd.s32 4294967256, %v7200_v11  ;;  %4977 = vpow2.f32 %v4264_v63  ;;  %v7377_v1 = vpop.eup %4959  ;;  %v2419_v34 = vadd.f32 %v8916_v50, %v7289_v46  ;;  %v1865_v40 = vmul.f32 %v7114_v59, %v6992_v42  ;;  %v7384_v57 = vpop.xlane.xlu1 %2072 }
 0x1bd   :  { %8945 = vst [vmem:[#allocation44_spill] sm:$0xff] %v7374_v6  ;;  %4979 = vrcp.f32 %v2988_v8  ;;  %v2008_v20 = vmul.f32 %v7301_v41, %v1873_v3  ;;  %v7388_v33 = vpop.eup %4961  ;;  %v7391_v22 = vmul.f32 %v1685_v35, %v7279_v15  ;;  %v7393_v63 = vadd.f32 1.0, %v4952_v49 }
 0x1be   :  { %4981 = vrcp.f32 %v2926_v61  ;;  %v1495_v4 = vmul.f32 0.70710677, %v1193_v5  ;;  %v4964_v25 = vpop.eup %4963  ;;  %v7396_v46 = vmul.f32 0.5, %v7316_v24  ;;  %v2000_v59 = vmul.f32 %v7301_v41, %v1865_v40 }
 0x1bf   :  { %v7386_v28 = vpop.xlane.xlu0 %2051  ;;  %8946 = vst [vmem:[#allocation46_spill] sm:$0xff] %v7391_v22  ;;  %4983 = verf.f32 %v1496_v21  ;;  %v2356_v42 = vsel %vm161_vm0, %v2008_v20, 0.0  ;;  %v4966_v8 = vpop.eup %4965  ;;  %v7400_v58 = vadd.f32 1.0, %v4956_v0  ;;  %v7403_v15 = vsub.s32 %v3470_v19, %v7205_v55 }
 0x1c0   :  { %4985 = vrcp.f32 %v2990_v37  ;;  %v2483_v35 = vadd.f32 %v8916_v50, %v7291_v32  ;;  %2357 = vadd.xlane.f32.xlu1 %v2356_v42  ;;  %v4968_v49 = vpop.eup %4967  ;;  %v3463_v24 = vadd.s32 4294967264, %v7200_v11  ;;  %v4267_v61 = vmul.f32 -1.442695, %v2419_v34  ;;  %v7413_v0 = vpop.xlane.xlu1 %2078 }
 0x1c1   :  { %8947 = vst [vmem:[#allocation45_spill] sm:$0xff] %v7403_v15  ;;  %v7410_v38 = vadd.f32 %v7225_v39, %v6794_v13  ;;  %v2332_v21 = vsel %vm161_vm0, %v2000_v59, 0.0  ;;  %v4970_v37 = vpop.eup %4969  ;;  %v2929_v32 = vadd.f32 1.0, %v4964_v25  ;;  %4987 = verf.f32 %v1495_v4 }
 0x1c2   :  { %2333 = vadd.xlane.f32.xlu0 %v2332_v21  ;;  %v7421_v34 = vadd.f32 %v7225_v39, %v6799_v45  ;;  %v3446_v13 = vrot.slane %v7377_v1, %v7243_v18  ;;  %v2993_v40 = vadd.f32 1.0, %v4966_v8  ;;  %v7426_v42 = vmul.f32 0.5, %v7351_v26 }
 0x1c3   :  { %v7415_v3 = vpop.xlane.xlu0 %2243  ;;  %v4972_v20 = vpop.eup %4971  ;;  %v7428_v59 = vmul.f32 0.5, %v1193_v5  ;;  %v3441_v4 = vrot.slane %v4968_v49, %v7283_v51  ;;  %v4331_v21 = vmul.f32 -1.442695, %v2483_v35  ;;  %v2421_v45 = vadd.f32 %v8916_v50, %v7320_v52 }
 0x1c4   :  { %8948 = vst [vmem:[#allocation17_spill] sm:$0xff] %v7415_v3  ;;  %v4974_v22 = vpop.eup %4973  ;;  %v7437_v1 = vadd.f32 1.0, %v4970_v37  ;;  %v7440_v26 = vsub.s32 %v3463_v24, %v7205_v55  ;;  %4989 = vpow2.f32 %v4267_v61  ;;  %v1434_v5 = vmul.f32 0.70710677, %v7410_v38  ;;  %v7443_v8 = vpop.xlane.xlu1 %2270 }
 0x1c5   :  { %v7435_v19 = vpop.eup %4975  ;;  %8951 = vst [vmem:[#allocation48_spill] sm:$0xff] %v7443_v8  ;;  %v1687_v47 = vadd.f32 1.0, %v4972_v20  ;;  %4991 = vrcp.f32 %v2929_v32  ;;  %v1433_v35 = vmul.f32 0.70710677, %v7421_v34  ;;  %v2418_v52 = vadd.f32 %v8916_v50, %v7322_v48 }
 0x1c6   :  { %8949 = vst [vmem:[#allocation16_spill] sm:$0xff] %v7437_v1  ;;  %8950 = vst [vmem:[#allocation47_spill] sm:$0xff] %v7440_v26  ;;  %v4978_v49 = vpop.eup %4977  ;;  %4993 = vrcp.f32 %v2993_v40  ;;  %v2992_v1 = vadd.f32 1.0, %v4974_v22  ;;  %v1812_v24 = vmul.f32 %v7274_v2, %v7167_v9  ;;  %v1868_v61 = vmul.f32 %v7121_v60, %v7012_v17 }
 0x1c7   :  { %v7445_v25 = vpop.xlane.xlu0 %2252  ;;  %v4980_v37 = vpop.eup %4979  ;;  %v3484_v32 = vadd.s32 4294967240, %v7200_v11  ;;  %4995 = vpow2.f32 %v4331_v21  ;;  %v4269_v20 = vmul.f32 -1.442695, %v2421_v45  ;;  %v2928_v3 = vadd.f32 1.0, %v4978_v49 }
 0x1c8   :  { %8952 = vst [vmem:[#allocation49_spill] sm:$0xff] %v7445_v25  ;;  %v4982_v6 = vpop.eup %4981  ;;  %v3448_v25 = vsel %vm3447_vm1, %v3446_v13, %v3441_v4  ;;  %4997 = verf.f32 %v1434_v5  ;;  %v1947_v48 = vmul.f32 %v7301_v41, %v1812_v24  ;;  %v2003_v22 = vmul.f32 %v7301_v41, %v1868_v61  ;;  %v7458_v40 = vpop.xlane.xlu1 %2084 }
 0x1c9   :  { %v4984_v8 = vpop.eup %4983  ;;  %v3787_v60 = vrot.slane %v4980_v37, %v7283_v51  ;;  %v7464_v2 = vmul.f32 %v1687_v47, %v7396_v46  ;;  %4999 = verf.f32 %v1433_v35  ;;  %v4266_v13 = vmul.f32 -1.442695, %v2418_v52 }
 0x1ca   :  { %v4986_v17 = vpop.eup %4985  ;;  %v3453_v4 = vrot.slane %v4982_v6, %v7345_v36  ;;  %5001 = vrcp.f32 %v2992_v1  ;;  %v2173_v21 = vsel %vm161_vm0, %v1947_v48, 0.0  ;;  %v2341_v45 = vsel %vm161_vm0, %v2003_v22, 0.0 }
 0x1cb   :  { %v7460_v9 = vpop.xlane.xlu0 %2057  ;;  %8953 = vst [vmem:[#allocation50_spill] sm:$0xff] %v7464_v2  ;;  %v4988_v5 = vpop.eup %4987  ;;  %v3801_v49 = vrot.slane %v7435_v19, %v7277_v14  ;;  %v7472_v24 = vsub.s32 %v3484_v32, %v7205_v55  ;;  %v7475_v37 = vmul.f32 0.5, %v7410_v38  ;;  %5003 = vpow2.f32 %v4269_v20  ;;  %2174 = vadd.xlane.f32.xlu1 %v2173_v21  ;;  %2342 = vadd.xlane.f32.xlu0 %v2341_v45  ;;  %v8956_v21 = vld [vmem:[#allocation21_spill] sm:$0xff] }
 0x1cc   :  { %v3796_v47 = vrot.slane %v4986_v17, %v7345_v36  ;;  %v1752_v6 = vadd.f32 1.0, %v4984_v8  ;;  %5005 = vrcp.f32 %v2928_v3  ;;  %v2482_v46 = vadd.f32 %v8916_v50, %v7342_v43  ;;  %v7480_v1 = vpop.xlane.xlu1 %2090 }
 0x1cd   :  { %8954 = vst [vmem:[#allocation51_spill] sm:$0xff] %v7472_v24  ;;  %v3498_v19 = vadd.s32 4294967224, %v7200_v11  ;;  %5007 = vpow2.f32 %v4266_v13  ;;  %v1876_v38 = vmul.f32 %v7293_v12, %v7190_v31  ;;  %v1803_v52 = vmul.f32 %v7105_v23, %v6986_v10 }
 0x1ce   :  { %v4990_v61 = vpop.eup %4989  ;;  %v8955_v3 = vrot.slane %v7371_v29, %v7243_v18  ;;  %v3455_v43 = vsel %vm3454_vm2, %v3453_v4, %v3448_v25  ;;  %v1751_v32 = vadd.f32 1.0, %v4988_v5  ;;  %v1208_v20 = vadd.f32 %v7225_v39, %v6862_v53 }
 0x1cf   :  { %v7482_v35 = vpop.xlane.xlu0 %2249  ;;  %v7496_v48 = vpop.eup %4991  ;;  %v3477_v22 = vadd.s32 4294967248, %v7200_v11  ;;  %v2423_v31 = vadd.f32 %v8916_v50, %v7340_v62  ;;  %v2011_v10 = vmul.f32 %v7301_v41, %v1876_v38  ;;  %v1938_v23 = vmul.f32 %v7301_v41, %v1803_v52 }
 0x1d0   :  { %v3792_v8 = vsel %vm3447_vm1, %v8955_v3, %v3787_v60  ;;  %v7503_v12 = vpop.eup %4993  ;;  %v7507_v25 = vmul.f32 %v1752_v6, %v7426_v42  ;;  %v7510_v53 = vmul.f32 0.5, %v7421_v34  ;;  %v4330_v17 = vmul.f32 -1.442695, %v2482_v46  ;;  %v7512_v60 = vpop.xlane.xlu1 %2282 }
 0x1d1   :  { %v3797_v29 = vsel %vm3454_vm2, %v3796_v47, %v3792_v8  ;;  %v4996_v62 = vpop.eup %4995  ;;  %v2931_v4 = vadd.f32 1.0, %v4990_v61  ;;  %v1203_v45 = vadd.f32 %v7225_v39, %v8956_v21  ;;  %v2365_v5 = vsel %vm161_vm0, %v2011_v10, 0.0 }
 0x1d2   :  { %v2146_v47 = vsel %vm161_vm0, %v1938_v23, 0.0  ;;  %v4998_v38 = vpop.eup %4997  ;;  %v7521_v42 = vmul.f32 %v1751_v32, %v7428_v59  ;;  %v8957_v34 = vrot.slane %v7388_v33, %v7277_v14  ;;  %v7530_v46 = vsub.s32 %v3498_v19, %v7205_v55  ;;  %2366 = vadd.xlane.f32.xlu1 %v2365_v5 }
 0x1d3   :  { %v7514_v13 = vpop.xlane.xlu0 %2258  ;;  %v1498_v52 = vmul.f32 0.70710677, %v1208_v20  ;;  %2147 = vadd.xlane.f32.xlu0 %v2146_v47  ;;  %v5000_v61 = vpop.eup %4999  ;;  %v3802_v3 = vsel %vm3461_vm3, %v3801_v49, %v3797_v29  ;;  %v7534_v8 = vsub.s32 %v3477_v22, %v7205_v55  ;;  %v4271_v59 = vmul.f32 -1.442695, %v2423_v31 }
 0x1d4   :  { %v7527_v6 = vsel %vm3461_vm3, %v8957_v34, %v3455_v43  ;;  %v1814_v32 = vmul.f32 %v7366_v7, %v7268_v16  ;;  %v5002_v33 = vpop.eup %5001  ;;  %v7540_v10 = vmul.f32 0.5, %v1208_v20  ;;  %5009 = vpow2.f32 %v4330_v17  ;;  %v7544_v23 = vpop.xlane.xlu1 %2279  ;;  %v8959_v34 = vld [vmem:[#allocation18_spill] sm:$0xff]  ;;  %v8961_v43 = vld [vmem:[#allocation20_spill] sm:$0xff] }
 0x1d5   :  { %8958 = vst [vmem:[#allocation21_spill] sm:$0xff] %v7534_v8  ;;  %v1867_v19 = vmul.f32 %v7143_v44, %v7076_v54  ;;  %v5004_v22 = vpop.eup %5003  ;;  %5011 = vrcp.f32 %v2931_v4  ;;  %v1497_v31 = vmul.f32 0.70710677, %v1203_v45  ;;  %v2425_v16 = vadd.f32 %v8916_v50, %v7359_v27 }
 0x1d6   :  { %v1949_v7 = vmul.f32 %v7301_v41, %v1814_v32  ;;  %v5006_v29 = vpop.eup %5005  ;;  %v2995_v20 = vadd.f32 1.0, %v4996_v62  ;;  %5013 = verf.f32 %v1498_v52  ;;  %v3512_v17 = vadd.s32 4294967208, %v7200_v11 }
 0x1d7   :  { %v7546_v49 = vpop.xlane.xlu0 %2063  ;;  %v2002_v54 = vmul.f32 %v7301_v41, %v1867_v19  ;;  %v5008_v44 = vpop.eup %5007  ;;  %v1690_v21 = vadd.f32 1.0, %v4998_v38  ;;  %5015 = vpow2.f32 %v4271_v59  ;;  %v2485_v4 = vadd.f32 %v8916_v50, %v7361_v56 }
 0x1d8   :  { %v2179_v5 = vsel %vm161_vm0, %v1949_v7, 0.0  ;;  %v3811_v27 = vrot.slane %v7503_v12, %v7403_v15  ;;  %v2933_v47 = vadd.f32 1.0, %v5004_v22  ;;  %v898_v62 = vadd.f32 %v7225_v39, %v8959_v34  ;;  %v7561_v32 = vpop.xlane.xlu1 %2096 }
 0x1d9   :  { %2180 = vadd.xlane.f32.xlu1 %v2179_v5  ;;  %v2338_v52 = vsel %vm161_vm0, %v2002_v54, 0.0  ;;  %v3806_v38 = vrot.slane %v5002_v33, %v7440_v26  ;;  %v7566_v59 = vmul.f32 0.5, %v1203_v45  ;;  %5017 = verf.f32 %v1497_v31 }
 0x1da   :  { %v4273_v56 = vmul.f32 -1.442695, %v2425_v16  ;;  %2339 = vadd.xlane.f32.xlu0 %v2338_v52  ;;  %v3467_v12 = vrot.slane %v5006_v29, %v7440_v26  ;;  %5019 = vrcp.f32 %v2995_v20  ;;  %v1689_v22 = vadd.f32 1.0, %v5000_v61  ;;  %v8962_v20 = vld [vmem:[#allocation42_spill] sm:$0xff] }
 0x1db   :  { %v7563_v19 = vpop.xlane.xlu0 %2255  ;;  %v2930_v7 = vadd.f32 1.0, %v5008_v44  ;;  %v7570_v5 = vmul.f32 %v1690_v21, %v7475_v37  ;;  %v7573_v54 = vsub.s32 %v3512_v17, %v7205_v55  ;;  %v4333_v34 = vmul.f32 -1.442695, %v2485_v4  ;;  %v8963_v44 = vld [vmem:[#allocation26_spill] sm:$0xff] }
 0x1dc   :  { %v7577_v33 = vadd.f32 %v7225_v39, %v8961_v43  ;;  %5021 = vrcp.f32 %v2933_v47  ;;  %v3526_v45 = vadd.s32 4294967192, %v7200_v11  ;;  %v1436_v31 = vmul.f32 0.70710677, %v898_v62  ;;  %v7582_v61 = vpop.xlane.xlu1 %2288  ;;  %v8964_v43 = vld [vmem:[#allocation6_spill] sm:$0xff] }
 0x1dd   :  { %8960 = vst [vmem:[#allocation18_spill] sm:$0xff] %v7573_v54  ;;  %v2420_v16 = vadd.f32 %v8916_v50, %v7386_v28  ;;  %v3807_v37 = vsel %vm3468_vm4, %v3806_v38, %v3802_v3  ;;  %5023 = vpow2.f32 %v4273_v56  ;;  %v1878_v17 = vmul.f32 %v7393_v63, %v8962_v20 }
 0x1de   :  { %v1870_v21 = vmul.f32 %v8964_v43, %v8963_v44  ;;  %v5010_v4 = vpop.eup %5009  ;;  %v3469_v47 = vsel %vm3468_vm4, %v3467_v12, %v7527_v6  ;;  %v7594_v52 = vmul.f32 %v1689_v22, %v7510_v53  ;;  %5025 = vrcp.f32 %v2930_v7 }
 0x1df   :  { %v7584_v29 = vpop.xlane.xlu0 %2264  ;;  %v2427_v28 = vadd.f32 %v8916_v50, %v7384_v57  ;;  %v7598_v36 = vpop.eup %5011  ;;  %5027 = vpow2.f32 %v4333_v34  ;;  %v1435_v3 = vmul.f32 0.70710677, %v7577_v33  ;;  %v2013_v63 = vmul.f32 %v7301_v41, %v1878_v17 }
 0x1e0   :  { %8965 = vst [vmem:[#allocation20_spill] sm:$0xff] %v7594_v52  ;;  %v2005_v38 = vmul.f32 %v7301_v41, %v1870_v21  ;;  %v5014_v56 = vpop.eup %5013  ;;  %v7604_v20 = vsel %vm3475_vm5, %v3811_v27, %v3807_v37  ;;  %v7607_v53 = vsub.s32 %v3526_v45, %v7205_v55  ;;  %5029 = verf.f32 %v1436_v31  ;;  %v7609_v12 = vpop.xlane.xlu1 %2285 }
 0x1e1   :  { %v4268_v6 = vmul.f32 -1.442695, %v2420_v16  ;;  %v5016_v22 = vpop.eup %5015  ;;  %v2994_v7 = vadd.f32 1.0, %v5010_v4  ;;  %v2371_v34 = vsel %vm161_vm0, %v2013_v63, 0.0  ;;  %v2429_v44 = vadd.f32 %v8916_v50, %v7413_v0  ;;  %v8968_v4 = vld [vmem:[#allocation19_spill] sm:$0xff] }
 0x1e2   :  { %8966 = vst [vmem:[#allocation42_spill] sm:$0xff] %v7607_v53  ;;  %v2347_v17 = vsel %vm161_vm0, %v2005_v38, 0.0  ;;  %v8967_v45 = vrot.slane %v7496_v48, %v7403_v15  ;;  %v7625_v16 = vmul.f32 0.5, %v898_v62  ;;  %v4275_v37 = vmul.f32 -1.442695, %v2427_v28  ;;  %2372 = vadd.xlane.f32.xlu1 %v2371_v34  ;;  %v8969_v62 = vld [vmem:[#allocation17_spill] sm:$0xff] }
 0x1e3   :  { %v7611_v57 = vpop.xlane.xlu0 %2069  ;;  %2348 = vadd.xlane.f32.xlu0 %v2347_v17  ;;  %v5018_v43 = vpop.eup %5017  ;;  %v1754_v21 = vadd.f32 1.0, %v5014_v56  ;;  %5031 = verf.f32 %v1435_v3  ;;  %v7629_v0 = vadd.f32 %v7225_v39, %v8968_v4  ;;  %v1877_v63 = vmul.f32 %v7400_v58, %v7329_v30  ;;  %v8970_v28 = vld [vmem:[#allocation25_spill] sm:$0xff]  ;;  %v8971_v34 = vld [vmem:[#allocation28_spill] sm:$0xff] }
 0x1e4   :  { %v7623_v31 = vsel %vm3475_vm5, %v8967_v45, %v3469_v47  ;;  %v7633_v38 = vpop.eup %5019  ;;  %v2935_v48 = vadd.f32 1.0, %v5016_v22  ;;  %5033 = vpow2.f32 %v4268_v6  ;;  %v2484_v47 = vadd.f32 %v8916_v50, %v8969_v62  ;;  %v7639_v56 = vpop.xlane.xlu1 %2102  ;;  %v8973_v62 = vld [vmem:[#allocation48_spill] sm:$0xff] }
 0x1e5   :  { %v1805_v17 = vmul.f32 %v8971_v34, %v8970_v28  ;;  %5035 = vrcp.f32 %v2994_v7  ;;  %v3540_v45 = vadd.s32 4294967176, %v7200_v11  ;;  %v4277_v4 = vmul.f32 -1.442695, %v2429_v44  ;;  %v8974_v44 = vld [vmem:[#allocation49_spill] sm:$0xff] }
 0x1e6   :  { %v2012_v30 = vmul.f32 %v7301_v41, %v1877_v63  ;;  %v7645_v58 = vpop.eup %5021  ;;  %v1753_v22 = vadd.f32 1.0, %v5018_v43  ;;  %5037 = vpow2.f32 %v4275_v37  ;;  %v2493_v27 = vadd.f32 %v8916_v50, %v8973_v62 }
 0x1e7   :  { %v7641_v3 = vpop.xlane.xlu0 %2261  ;;  %v1940_v6 = vmul.f32 %v7301_v41, %v1805_v17  ;;  %v5024_v28 = vpop.eup %5023  ;;  %v1500_v7 = vmul.f32 0.70710677, %v7629_v0  ;;  %v2487_v63 = vadd.f32 %v8916_v50, %v8974_v44  ;;  %v7657_v43 = vmul.f32 %v1754_v21, %v7540_v10  ;;  %v8977_v44 = vld [vmem:[#allocation44_spill] sm:$0xff] }
 0x1e8   :  { %8972 = vst [vmem:[#allocation26_spill] sm:$0xff] %v7641_v3  ;;  %v2368_v51 = vsel %vm161_vm0, %v2012_v30, 0.0  ;;  %v5026_v26 = vpop.eup %5025  ;;  %5039 = vrcp.f32 %v2935_v48  ;;  %v4332_v37 = vmul.f32 -1.442695, %v2484_v47  ;;  %v7660_v62 = vpop.xlane.xlu1 %2294  ;;  %v7665_v14 = vmul.f32 0.5, %v7577_v33  ;;  %v8978_v10 = vld [vmem:[#allocation16_spill] sm:$0xff] }
 0x1e9   :  { %2369 = vadd.xlane.f32.xlu1 %v2368_v51  ;;  %v2152_v17 = vsel %vm161_vm0, %v1940_v6, 0.0  ;;  %8975 = vst [vmem:[#allocation6_spill] sm:$0xff] %v7660_v62  ;;  %v5028_v34 = vpop.eup %5027  ;;  %v3491_v30 = vadd.s32 4294967232, %v7200_v11  ;;  %5041 = vpow2.f32 %v4277_v4  ;;  %v1816_v21 = vmul.f32 %v8978_v10, %v8977_v44  ;;  %v8980_v6 = vld [vmem:[#allocation22_spill] sm:$0xff]  ;;  %v8981_v44 = vld [vmem:[#allocation27_spill] sm:$0xff] }
 0x1ea   :  { %2153 = vadd.xlane.f32.xlu0 %v2152_v17  ;;  %v5030_v48 = vpop.eup %5029  ;;  %v7671_v51 = vmul.f32 %v1753_v22, %v7566_v59  ;;  %v7674_v47 = vsub.s32 %v3540_v45, %v7205_v55  ;;  %v1213_v52 = vadd.f32 %v7225_v39, %v8980_v6  ;;  %v3481_v33 = vrot.slane %v5026_v26, %v7534_v8  ;;  %v8982_v10 = vld [vmem:[#allocation30_spill] sm:$0xff] }
 0x1eb   :  { %v7662_v15 = vpop.xlane.xlu0 %2075  ;;  %5043 = verf.f32 %v1500_v7  ;;  %v4335_v62 = vmul.f32 -1.442695, %v2487_v63  ;;  %v1951_v4 = vmul.f32 %v7301_v41, %v1816_v21  ;;  %v2937_v17 = vadd.f32 1.0, %v5024_v28 }
 0x1ec   :  { %8976 = vst [vmem:[#allocation19_spill] sm:$0xff] %v7662_v15  ;;  %8979 = vst [vmem:[#allocation17_spill] sm:$0xff] %v7674_v47  ;;  %v4341_v15 = vmul.f32 -1.442695, %v2493_v27  ;;  %5045 = vpow2.f32 %v4332_v37  ;;  %v1869_v59 = vmul.f32 %v8982_v10, %v8981_v44  ;;  %v7682_v22 = vpop.xlane.xlu1 %2291  ;;  %v2997_v3 = vadd.f32 1.0, %v5028_v34  ;;  %v9010_v47 = vld [vmem:[#allocation41_spill] sm:$0xff] }
 0x1ed   :  { %v5032_v2 = vpop.eup %5031  ;;  %v7687_v27 = vsub.s32 %v3491_v30, %v7205_v55  ;;  %v2185_v26 = vsel %vm161_vm0, %v1951_v4, 0.0  ;;  %v2431_v7 = vadd.f32 %v8916_v50, %v7458_v40  ;;  %v1692_v63 = vadd.f32 1.0, %v5030_v48  ;;  %v8984_v40 = vld [vmem:[#allocation23_spill] sm:$0xff] }
 0x1ee   :  { %v5034_v28 = vpop.eup %5033  ;;  %v1499_v37 = vmul.f32 0.70710677, %v1213_v52  ;;  %5047 = vpow2.f32 %v4341_v15  ;;  %2186 = vadd.xlane.f32.xlu1 %v2185_v26  ;;  %v2004_v21 = vmul.f32 %v7301_v41, %v1869_v59  ;;  %v3483_v34 = vsel %vm3482_vm6, %v3481_v33, %v7623_v31  ;;  %v8985_v31 = vld [vmem:[#allocation24_spill] sm:$0xff] }
 0x1ef   :  { %v7684_v45 = vpop.xlane.xlu0 %2267  ;;  %v5036_v6 = vpop.eup %5035  ;;  %v7698_v30 = vmul.f32 0.5, %v7629_v0  ;;  %5049 = vpow2.f32 %v4335_v62  ;;  %v908_v48 = vadd.f32 %v7225_v39, %v8984_v40  ;;  %v4279_v10 = vmul.f32 -1.442695, %v2431_v7 }
 0x1f0   :  { %8983 = vst [vmem:[#allocation25_spill] sm:$0xff] %v7684_v45  ;;  %v5038_v4 = vpop.eup %5037  ;;  %5051 = vrcp.f32 %v2937_v17  ;;  %v2344_v15 = vsel %vm161_vm0, %v2004_v21, 0.0  ;;  %v7703_v59 = vpop.xlane.xlu1 %2108  ;;  %v2932_v44 = vadd.f32 1.0, %v5034_v28  ;;  %v7707_v45 = vmul.f32 0.5, %v1213_v52 }
 0x1f1   :  { %5053 = vrcp.f32 %v2997_v3  ;;  %2345 = vadd.xlane.f32.xlu0 %v2344_v15  ;;  %v7711_v0 = vadd.f32 %v7225_v39, %v8985_v31  ;;  %v7716_v33 = vmul.f32 %v1692_v63, %v7625_v16  ;;  %v8987_v17 = vrot.slane %v7598_v36, %v7472_v24  ;;  %v8988_v36 = vld [vmem:[#allocation11_spill] sm:$0xff] }
 0x1f2   :  { %v7713_v62 = vpop.eup %5039  ;;  %5055 = verf.f32 %v1499_v37  ;;  %v2015_v52 = vmul.f32 %v7301_v41, %v7507_v25  ;;  %v3816_v28 = vrot.slane %v5036_v6, %v7534_v8  ;;  %v1691_v21 = vadd.f32 1.0, %v5032_v2 }
 0x1f3   :  { %v7705_v26 = vpop.xlane.xlu0 %2276  ;;  %8986 = vst [vmem:[#allocation28_spill] sm:$0xff] %v7713_v62  ;;  %v7722_v7 = vsel %vm3489_vm7, %v8987_v17, %v3483_v34  ;;  %v5042_v3 = vpop.eup %5041  ;;  %v2939_v40 = vadd.f32 1.0, %v5038_v4  ;;  %v2422_v15 = vadd.f32 %v8916_v50, %v7460_v9  ;;  %v1438_v16 = vmul.f32 0.70710677, %v908_v48 }
 0x1f4   :  { %5057 = vpow2.f32 %v4279_v10  ;;  %v2377_v63 = vsel %vm161_vm0, %v2015_v52, 0.0  ;;  %v2007_v34 = vmul.f32 %v7301_v41, %v8988_v36  ;;  %v7732_v31 = vpop.xlane.xlu1 %2300  ;;  %v1437_v2 = vmul.f32 0.70710677, %v7711_v0 }
 0x1f5   :  { %v5044_v25 = vpop.eup %5043  ;;  %5059 = vrcp.f32 %v2932_v44  ;;  %2378 = vadd.xlane.f32.xlu1 %v2377_v63  ;;  %v2433_v9 = vadd.f32 %v8916_v50, %v7480_v1  ;;  %v2941_v10 = vadd.f32 1.0, %v5042_v3  ;;  %v2486_v52 = vadd.f32 %v8916_v50, %v7482_v35 }
 0x1f6   :  { %v5046_v4 = vpop.eup %5045  ;;  %v2353_v17 = vsel %vm161_vm0, %v2007_v34, 0.0  ;;  %v2014_v36 = vmul.f32 %v7301_v41, %v7521_v42  ;;  %v3817_v6 = vsel %vm3482_vm6, %v3816_v28, %v7604_v20  ;;  %v7749_v44 = vmul.f32 %v1691_v21, %v7665_v14  ;;  %v8989_v14 = vld [vmem:[#allocation7_spill] sm:$0xff] }
 0x1f7   :  { %v7734_v37 = vpop.xlane.xlu0 %2081  ;;  %5061 = vrcp.f32 %v2939_v40  ;;  %v4270_v63 = vmul.f32 -1.442695, %v2422_v15  ;;  %2354 = vadd.xlane.f32.xlu0 %v2353_v17  ;;  %v1756_v8 = vadd.f32 1.0, %v5044_v25  ;;  %v7751_v3 = vmul.f32 0.5, %v908_v48  ;;  %v8991_v40 = vld [vmem:[#allocation31_spill] sm:$0xff] }
 0x1f8   :  { %v5048_v1 = vpop.eup %5047  ;;  %5063 = verf.f32 %v1438_v16  ;;  %v4281_v34 = vmul.f32 -1.442695, %v2433_v9  ;;  %v7753_v62 = vpop.xlane.xlu1 %2297  ;;  %v2996_v54 = vadd.f32 1.0, %v5046_v4  ;;  %v2374_v20 = vsel %vm161_vm0, %v2014_v36, 0.0  ;;  %v8994_v36 = vld [vmem:[#allocation29_spill] sm:$0xff] }
 0x1f9   :  { %v5050_v42 = vpop.eup %5049  ;;  %5065 = verf.f32 %v1437_v2  ;;  %v1942_v28 = vmul.f32 %v7301_v41, %v8989_v14  ;;  %v7764_v48 = vadd.f32 %v7225_v39, %v8991_v40  ;;  %v4334_v15 = vmul.f32 -1.442695, %v2486_v52  ;;  %2375 = vadd.xlane.f32.xlu1 %v2374_v20 }
 0x1fa   :  { %v7760_v21 = vpop.eup %5051  ;;  %5067 = vrcp.f32 %v2941_v10  ;;  %v2497_v16 = vadd.f32 %v8916_v50, %v7512_v60  ;;  %v3005_v2 = vadd.f32 1.0, %v5048_v1  ;;  %v2489_v4 = vadd.f32 %v8916_v50, %v7514_v13  ;;  %v7782_v60 = vld [vmem:[%s8756_s2] ss:$0 sm:$0xff] }
 0x1fb   :  { %v7755_v35 = vpop.xlane.xlu0 %2273  ;;  %8990 = vst [vmem:[#allocation48_spill] sm:$0xff] %v7760_v21  ;;  %v7768_v25 = vpop.eup %5053  ;;  %5069 = vpow2.f32 %v4270_v63  ;;  %v2158_v9 = vsel %vm161_vm0, %v1942_v28, 0.0  ;;  %v8993_v39 = vrot.slane %v7633_v38, %v7472_v24  ;;  %v2999_v52 = vadd.f32 1.0, %v5050_v42  ;;  %v8999_v21 = vld [vmem:[#allocation9_spill] sm:$0xff] }
 0x1fc   :  { %8992 = vst [vmem:[#allocation49_spill] sm:$0xff] %v7768_v25  ;;  %v5056_v10 = vpop.eup %5055  ;;  %v7786_v63 = vadd.f32 %v7782_v60, %v8994_v36  ;;  %5071 = vpow2.f32 %v4281_v34  ;;  %2159 = vadd.xlane.f32.xlu0 %v2158_v9  ;;  %v7788_v13 = vpop.xlane.xlu1 %2114  ;;  %v1953_v42 = vmul.f32 %v7301_v41, %v7570_v5  ;;  %v7797_v14 = vmul.f32 %v1756_v8, %v7698_v30  ;;  %v8995_v34 = vld [vmem:[#allocation32_spill] sm:$0xff] }
 0x1fd   :  { %v7777_v17 = vsel %vm3489_vm7, %v8993_v39, %v3817_v6  ;;  %5073 = vrcp.f32 %v2996_v54  ;;  %v4345_v6 = vmul.f32 -1.442695, %v2497_v16  ;;  %v1502_v28 = vmul.f32 0.70710677, %v7764_v48  ;;  %v8996_v16 = vld [vmem:[#allocation33_spill] sm:$0xff] }
 0x1fe   :  { %v5058_v20 = vpop.eup %5057  ;;  %5075 = vpow2.f32 %v4334_v15  ;;  %v7802_v40 = vadd.f32 %v7782_v60, %v8995_v34  ;;  %v7805_v39 = vmul.f32 0.5, %v7711_v0  ;;  %v4337_v54 = vmul.f32 -1.442695, %v2489_v4  ;;  %v8997_v15 = vld [vmem:[#allocation12_spill] sm:$0xff] }
 0x1ff   :  { %v7790_v1 = vpop.xlane.xlu0 %2087  ;;  %v5060_v9 = vpop.eup %5059  ;;  %5077 = vrcp.f32 %v3005_v2  ;;  %v7809_v5 = vadd.f32 %v7782_v60, %v8996_v16  ;;  %v3505_v8 = vadd.s32 4294967216, %v7200_v11  ;;  %v1501_v30 = vmul.f32 0.70710677, %v7786_v63 }
 0x200   :  { %5079 = vrcp.f32 %v2999_v52  ;;  %v7815_v36 = vadd.f32 %v7782_v60, %v8997_v15  ;;  %v1755_v2 = vadd.f32 1.0, %v5056_v10  ;;  %v2943_v38 = vadd.f32 1.0, %v5058_v20  ;;  %v7824_v15 = vpop.xlane.xlu1 %2306 }
 0x201   :  { %v7817_v34 = vpop.eup %5061  ;;  %5081 = vpow2.f32 %v4345_v6  ;;  %v2191_v0 = vsel %vm161_vm0, %v1953_v42, 0.0  ;;  %v3495_v16 = vrot.slane %v5060_v9, %v7687_v27  ;;  %v1504_v52 = vmul.f32 0.70710677, %v7802_v40 }
 0x202   :  { %8998 = vst [vmem:[#allocation44_spill] sm:$0xff] %v7817_v34  ;;  %v5064_v4 = vpop.eup %5063  ;;  %5083 = verf.f32 %v1502_v28  ;;  %2192 = vadd.xlane.f32.xlu1 %v2191_v0  ;;  %v2006_v24 = vmul.f32 %v7301_v41, %v8999_v21  ;;  %v1440_v42 = vmul.f32 0.70710677, %v7809_v5  ;;  %v2496_v20 = vadd.f32 %v8916_v50, %v7544_v23 }
 0x203   :  { %v7826_v53 = vpop.xlane.xlu0 %2093  ;;  %v5066_v10 = vpop.eup %5065  ;;  %5085 = vpow2.f32 %v4337_v54  ;;  %v7836_v9 = vsub.s32 %v3505_v8, %v7205_v55  ;;  %v1503_v21 = vmul.f32 0.70710677, %v7815_v36  ;;  %v7843_v54 = vmul.f32 %v1755_v2, %v7707_v45 }
 0x204   :  { %v7833_v28 = vpop.eup %5067  ;;  %5087 = verf.f32 %v1501_v30  ;;  %v2350_v0 = vsel %vm161_vm0, %v2006_v24, 0.0  ;;  %v7846_v23 = vmul.f32 0.5, %v7764_v48  ;;  %v3497_v8 = vsel %vm3496_vm8, %v3495_v16, %v7722_v7 }
 0x205   :  { %9000 = vst [vmem:[#allocation16_spill] sm:$0xff] %v7833_v28  ;;  %9001 = vst [vmem:[#allocation22_spill] sm:$0xff] %v7836_v9  ;;  %v5070_v11 = vpop.eup %5069  ;;  %5089 = vrcp.f32 %v2943_v38  ;;  %2351 = vadd.xlane.f32.xlu0 %v2350_v0  ;;  %v1694_v30 = vadd.f32 1.0, %v5064_v4  ;;  %v4344_v55 = vmul.f32 -1.442695, %v2496_v20  ;;  %v1693_v9 = vadd.f32 1.0, %v5066_v10  ;;  %v7860_v4 = vpop.xlane.xlu1 %2303 }
 0x206   :  { %v5072_v25 = vpop.eup %5071  ;;  %5091 = verf.f32 %v1504_v52  ;;  %v2424_v45 = vadd.f32 %v8916_v50, %v7546_v49  ;;  %v2017_v38 = vmul.f32 %v7301_v41, %v7657_v43  ;;  %v2934_v2 = vadd.f32 1.0, %v5070_v11  ;;  %v9002_v0 = vld [vmem:[#allocation8_spill] sm:$0xff]  ;;  %v9004_v49 = vld [vmem:[#allocation10_spill] sm:$0xff]  ;;  %v9011_v28 = vld [vmem:[#allocation39_spill] sm:$0xff] }
 0x207   :  { %v7850_v24 = vpop.eup %5073  ;;  %5093 = verf.f32 %v1440_v42  ;;  %v1944_v6 = vmul.f32 %v7301_v41, %v9002_v0  ;;  %v2435_v7 = vadd.f32 %v8916_v50, %v7561_v32  ;;  %v7862_v16 = vpop.xlane.xlu0 %2099  ;;  %v2945_v10 = vadd.f32 1.0, %v5072_v25 }
 0x208   :  { %v5076_v48 = vpop.eup %5075  ;;  %5095 = verf.f32 %v1503_v21  ;;  %v7868_v42 = vadd.f32 %v7782_v60, %v9004_v49  ;;  %v4272_v43 = vmul.f32 -1.442695, %v2424_v45  ;;  %v2383_v11 = vsel %vm161_vm0, %v2017_v38, 0.0 }
 0x209   :  { %v7864_v52 = vpop.eup %5077  ;;  %v7874_v41 = vmul.f32 0.5, %v7786_v63  ;;  %5097 = vpow2.f32 %v4344_v55  ;;  %2384 = vadd.xlane.f32.xlu1 %v2383_v11  ;;  %v2164_v32 = vsel %vm161_vm0, %v1944_v6, 0.0  ;;  %v4283_v21 = vmul.f32 -1.442695, %v2435_v7 }
 0x20a   :  { %9003 = vst [vmem:[#allocation27_spill] sm:$0xff] %v7864_v52  ;;  %v7871_v20 = vpop.eup %5079  ;;  %v7878_v25 = vmul.f32 %v1694_v30, %v7751_v3  ;;  %v2998_v34 = vadd.f32 1.0, %v5076_v48  ;;  %5099 = vpow2.f32 %v4272_v43  ;;  %2165 = vadd.xlane.f32.xlu0 %v2164_v32  ;;  %v2488_v45 = vadd.f32 %v8916_v50, %v7563_v19  ;;  %v7894_v3 = vld [vmem:[%s8757_s3] ss:$0 sm:$0xff]  ;;  %v7906_v43 = vpop.xlane.xlu1 %2120  ;;  %s5531_s3 = smov [#allocation3]  }
 0x20b   :  { %9005 = vst [vmem:[#allocation30_spill] sm:$0xff] %v7871_v20  ;;  %v5082_v0 = vpop.eup %5081  ;;  %v7883_v49 = vmul.f32 %v1693_v9, %v7805_v39  ;;  %v9006_v55 = vrot.slane %v7645_v58, %v7530_v46  ;;  %5101 = vrcp.f32 %v2934_v2  ;;  %v2016_v6 = vmul.f32 %v7894_v3, %v7671_v51  ;;  %v9007_v2 = vld [vmem:[#allocation37_spill] sm:$0xff]  ;;  %9008 = vst [vmem:[#allocation23_spill] sm:$0xff] %v7906_v43  ;;  %v7908_v51 = vpop.xlane.xlu0 %2105  ;;  %s4122_s11 = sshll.u32 %s5531_s3, 4  ;;  %s4123_s11 = int_to_ptr.vmem [resolvable:$true] %s4122_s11 }
 0x20c   :  { %v5084_v38 = vpop.eup %5083  ;;  %5103 = vrcp.f32 %v2945_v10  ;;  %v1439_v9 = vmul.f32 0.70710677, %v7868_v42  ;;  %v4336_v58 = vmul.f32 -1.442695, %v2488_v45  ;;  %v7902_v48 = vmul.f32 0.5, %v7802_v40  ;;  %s5507_s12 = scalar_lea.vmem %s4123_s11, 128  ;;  %p5512_p1 = scmp.lt.s32.totalorder %s4123_s11, %s4123_s11 }
 0x20d   :  { %v7889_v63 = vsel %vm3503_vm9, %v9006_v55, %v3497_v8  ;;  %v5086_v19 = vpop.eup %5085  ;;  %v3009_v8 = vadd.f32 1.0, %v5082_v0  ;;  %5105 = vpow2.f32 %v4283_v21  ;;  %v928_v7 = vadd.f32 %v7782_v60, %v9007_v2  ;;  %v9009_v21 = vld [vmem:[#allocation36_spill] sm:$0xff]  ;;  %p5508_p0 = scmp.ne.s32.totalorder %s4123_s11, %s5507_s12  ;;  %p5513_p2 = scmp.lt.s32.totalorder %s5507_s12, %s5507_s12 }
 0x20e   :  { %v5088_v30 = vpop.eup %5087  ;;  %v1758_v32 = vadd.f32 1.0, %v5084_v38  ;;  %5107 = vrcp.f32 %v2998_v34  ;;  %v7915_v0 = vmul.f32 0.5, %v7809_v5  ;;  %v3001_v45 = vadd.f32 1.0, %v5086_v19  ;;  %v9012_v19 = vld [vmem:[#allocation40_spill] sm:$0xff] }
 0x20f   :  { %v7910_v11 = vpop.eup %5089  ;;  %5109 = vpow2.f32 %v4336_v58  ;;  %v7919_v55 = vadd.f32 %v7782_v60, %v9009_v21  ;;  %v2380_v2 = vsel %vm161_vm0, %v2016_v6, 0.0  ;;  %v1946_v10 = vmul.f32 %v7894_v3, %v9010_v47  ;;  %p5514_p3 = por %p5513_p2, %p5512_p1 }
 0x210   :  { %v5092_v40 = vpop.eup %5091  ;;  %5111 = verf.f32 %v1439_v9  ;;  %2381 = vadd.xlane.f32.xlu1 %v2380_v2  ;;  %v2499_v34 = vadd.f32 %v8916_v50, %v7582_v61  ;;  %v2491_v5 = vadd.f32 %v8916_v50, %v7584_v29  ;;  %v1757_v58 = vadd.f32 1.0, %v5088_v30 }
 0x211   :  { %v5094_v39 = vpop.eup %5093  ;;  %5113 = vrcp.f32 %v3009_v8  ;;  %v1442_v21 = vmul.f32 0.70710677, %v928_v7  ;;  %v2170_v6 = vsel %vm161_vm0, %v1946_v10, 0.0  ;;  %v7933_v47 = vadd.f32 %v7782_v60, %v9011_v28  ;;  %v7943_v8 = vpop.xlane.xlu1 %2309  ;;  %p5515_p4 = pnand %p5514_p3, %p5508_p0 }
 0x212   :  { %v5096_v38 = vpop.eup %5095  ;;  %v4347_v9 = vmul.f32 -1.442695, %v2499_v34  ;;  %v4339_v2 = vmul.f32 -1.442695, %v2491_v5  ;;  %5115 = vrcp.f32 %v3001_v45  ;;  %v7936_v61 = vmul.f32 0.5, %v7815_v36  ;;  %2171 = vadd.xlane.f32.xlu0 %v2170_v6  ;;  %9013 = vst [vmem:[#allocation24_spill] sm:$0xff] %v7943_v8  ;;  %v7945_v10 = vpop.xlane.xlu0 %2111 }
 0x213   :  { %v5098_v43 = vpop.eup %5097  ;;  %v1441_v29 = vmul.f32 0.70710677, %v7919_v55  ;;  %v7941_v30 = vadd.f32 %v7782_v60, %v9012_v19  ;;  %9014 = vst [vmem:[#allocation11_spill] sm:$0xff] %v7945_v10  ;;  %v7948_v28 = vmul.f32 %v1758_v32, %v7846_v23  ;;  %v1955_v36 = vmul.f32 %v7894_v3, %v7716_v33 }
 0x214   :  { %v5100_v34 = vpop.eup %5099  ;;  %v3008_v5 = vadd.f32 1.0, %v5098_v43  ;;  %5117 = vpow2.f32 %v4347_v9  ;;  %v1760_v6 = vadd.f32 1.0, %v5092_v40  ;;  %v7955_v52 = vmul.f32 0.5, %v7868_v42  ;;  %v9015_v40 = vld [vmem:[#allocation43_spill] sm:$0xff] }
 0x215   :  { %v7952_v45 = vpop.eup %5101  ;;  %v2936_v60 = vadd.f32 1.0, %v5100_v34  ;;  %5119 = vpow2.f32 %v4339_v2  ;;  %v7960_v18 = vmul.f32 %v1757_v58, %v7874_v41  ;;  %v1506_v23 = vmul.f32 0.70710677, %v7933_v47 }
 0x216   :  { %v7957_v19 = vpop.eup %5103  ;;  %5121 = verf.f32 %v1442_v21  ;;  %v2197_v43 = vsel %vm161_vm0, %v1955_v36, 0.0  ;;  %v1505_v33 = vmul.f32 0.70710677, %v7941_v30  ;;  %v2010_v42 = vmul.f32 %v7894_v3, %v9015_v40  ;;  %v7979_v40 = vpop.xlane.xlu1 %2126 }
 0x217   :  { %v5106_v32 = vpop.eup %5105  ;;  %5123 = verf.f32 %v1441_v29  ;;  %2198 = vadd.xlane.f32.xlu1 %v2197_v43  ;;  %v2498_v9 = vadd.f32 %v8916_v50, %v7609_v12  ;;  %v1696_v41 = vadd.f32 1.0, %v5094_v39  ;;  %v7971_v58 = vmul.f32 0.5, %v928_v7  ;;  %9016 = vst [vmem:[#allocation7_spill] sm:$0xff] %v7979_v40  ;;  %v7981_v12 = vpop.xlane.xlu0 %2312 }
 0x218   :  { %v7969_v2 = vpop.eup %5107  ;;  %5125 = vrcp.f32 %v3008_v5  ;;  %v2426_v21 = vadd.f32 %v8916_v50, %v7611_v57  ;;  %v7976_v29 = vmul.f32 %v1760_v6, %v7902_v48  ;;  %v2362_v36 = vsel %vm161_vm0, %v2010_v42, 0.0  ;;  %9017 = vst [vmem:[#allocation31_spill] sm:$0xff] %v7981_v12  ;;  %v9018_v48 = vld [vmem:[#allocation46_spill] sm:$0xff] }
 0x219   :  { %v5110_v34 = vpop.eup %5109  ;;  %5127 = vrcp.f32 %v2936_v60  ;;  %v4346_v43 = vmul.f32 -1.442695, %v2498_v9  ;;  %v1759_v39 = vadd.f32 1.0, %v5096_v38  ;;  %v2947_v5 = vadd.f32 1.0, %v5106_v32  ;;  %2363 = vadd.xlane.f32.xlu0 %v2362_v36 }
 0x21a   :  { %v5112_v10 = vpop.eup %5111  ;;  %5129 = verf.f32 %v1506_v23  ;;  %v4274_v7 = vmul.f32 -1.442695, %v2426_v21  ;;  %v2019_v57 = vmul.f32 %v7894_v3, %v7797_v14  ;;  %v1948_v6 = vmul.f32 %v7894_v3, %v9018_v48  ;;  %v9019_v23 = vld [vmem:[#allocation26_spill] sm:$0xff] }
 0x21b   :  { %v7983_v8 = vpop.eup %5113  ;;  %5131 = verf.f32 %v1505_v33  ;;  %v2437_v60 = vadd.f32 %v8916_v50, %v7639_v56  ;;  %v7992_v42 = vmul.f32 %v1696_v41, %v7915_v0  ;;  %v3000_v38 = vadd.f32 1.0, %v5110_v34  ;;  %v9021_v41 = vld [vmem:[#allocation50_spill] sm:$0xff] }
 0x21c   :  { %5133 = vpow2.f32 %v4346_v43  ;;  %v2490_v32 = vadd.f32 %v8916_v50, %v9019_v23  ;;  %v7996_v9 = vpop.eup %5115  ;;  %v2389_v33 = vsel %vm161_vm0, %v2019_v57, 0.0  ;;  %v2176_v14 = vsel %vm161_vm0, %v1948_v6, 0.0  ;;  %v9023_v6 = vld [vmem:[#allocation19_spill] sm:$0xff]  ;;  %v8013_v23 = vpop.xlane.xlu0 %2117 }
 0x21d   :  { %9020 = vst [vmem:[#allocation29_spill] sm:$0xff] %v7996_v9  ;;  %5135 = vpow2.f32 %v4274_v7  ;;  %v4285_v21 = vmul.f32 -1.442695, %v2437_v60  ;;  %2390 = vadd.xlane.f32.xlu1 %v2389_v33  ;;  %2177 = vadd.xlane.f32.xlu0 %v2176_v14  ;;  %v2018_v0 = vmul.f32 %v7894_v3, %v7843_v54  ;;  %v1950_v34 = vmul.f32 %v7894_v3, %v9021_v41  ;;  %v9022_v7 = vld [vmem:[#allocation6_spill] sm:$0xff]  ;;  %v8011_v60 = vpop.xlane.xlu1 %2315 }
 0x21e   :  { %v5118_v36 = vpop.eup %5117  ;;  %5137 = vrcp.f32 %v2947_v5  ;;  %v4338_v56 = vmul.f32 -1.442695, %v2490_v32  ;;  %v8005_v48 = vmul.f32 0.5, %v7919_v55  ;;  %v2501_v57 = vadd.f32 %v8916_v50, %v9022_v7  ;;  %9024 = vst [vmem:[#allocation32_spill] sm:$0xff] %v8013_v23 }
 0x21f   :  { %v5120_v43 = vpop.eup %5119  ;;  %5139 = vpow2.f32 %v4285_v21  ;;  %v2428_v5 = vadd.f32 %v8916_v50, %v9023_v6  ;;  %v8016_v54 = vmul.f32 %v1759_v39, %v7936_v61  ;;  %v1695_v33 = vadd.f32 1.0, %v5112_v10  ;;  %v9025_v39 = vld [vmem:[#allocation20_spill] sm:$0xff] }
 0x220   :  { %v5122_v32 = vpop.eup %5121  ;;  %v3011_v14 = vadd.f32 1.0, %v5118_v36  ;;  %5141 = vpow2.f32 %v4338_v56  ;;  %v2386_v21 = vsel %vm161_vm0, %v2018_v0, 0.0  ;;  %v2182_v41 = vsel %vm161_vm0, %v1950_v34, 0.0  ;;  %v9026_v34 = vld [vmem:[#allocation25_spill] sm:$0xff] }
 0x221   :  { %v5124_v55 = vpop.eup %5123  ;;  %v4349_v7 = vmul.f32 -1.442695, %v2501_v57  ;;  %v4276_v12 = vmul.f32 -1.442695, %v2428_v5  ;;  %5143 = vrcp.f32 %v3000_v38  ;;  %v3003_v6 = vadd.f32 1.0, %v5120_v43  ;;  %2387 = vadd.xlane.f32.xlu1 %v2386_v21  ;;  %2183 = vadd.xlane.f32.xlu0 %v2182_v41 }
 0x222   :  { %v8020_v40 = vpop.eup %5125  ;;  %v1957_v61 = vmul.f32 %v7894_v3, %v7878_v25  ;;  %v1952_v10 = vmul.f32 %v7894_v3, %v9025_v39  ;;  %v8029_v56 = vmul.f32 0.5, %v7933_v47  ;;  %v2500_v0 = vadd.f32 %v8916_v50, %v7682_v22  ;;  %v8043_v22 = vpop.xlane.xlu1 %2132 }
 0x223   :  { %v8026_v36 = vpop.eup %5127  ;;  %5145 = vpow2.f32 %v4349_v7  ;;  %v2492_v38 = vadd.f32 %v8916_v50, %v9026_v34  ;;  %v8036_v57 = vmul.f32 %v1695_v33, %v7955_v52  ;;  %v1698_v25 = vadd.f32 1.0, %v5122_v32  ;;  %v8045_v39 = vpop.xlane.xlu0 %2318 }
 0x224   :  { %v5130_v43 = vpop.eup %5129  ;;  %v8039_v5 = vmul.f32 0.5, %v7941_v30  ;;  %5147 = vpow2.f32 %v4276_v12  ;;  %v2203_v47 = vsel %vm161_vm0, %v1957_v61, 0.0  ;;  %v2188_v41 = vsel %vm161_vm0, %v1952_v10, 0.0 }
 0x225   :  { %v5132_v21 = vpop.eup %5131  ;;  %5149 = vrcp.f32 %v3011_v14  ;;  %v4348_v7 = vmul.f32 -1.442695, %v2500_v0  ;;  %v1697_v23 = vadd.f32 1.0, %v5124_v55  ;;  %2204 = vadd.xlane.f32.xlu1 %v2203_v47  ;;  %2189 = vadd.xlane.f32.xlu0 %v2188_v41  ;;  %v4340_v52 = vmul.f32 -1.442695, %v2492_v38  ;;  %v9053_v9 = vld [vmem:[#allocation32_spill] sm:$0xff] }
 0x226   :  { %v5134_v34 = vpop.eup %5133  ;;  %5151 = vrcp.f32 %v3003_v6  ;;  %v2021_v30 = vmul.f32 %v7894_v3, %v7948_v28  ;;  %v1954_v33 = vmul.f32 %v7894_v3, %v7749_v44  ;;  %v2439_v14 = vadd.f32 %v8916_v50, %v7703_v59 }
 0x227   :  { %v5136_v12 = vpop.eup %5135  ;;  %v3010_v32 = vadd.f32 1.0, %v5134_v34  ;;  %5153 = vpow2.f32 %v4348_v7  ;;  %v2495_v6 = vadd.f32 %v8916_v50, %v7705_v26  ;;  %v2020_v44 = vmul.f32 %v7894_v3, %v7960_v18  ;;  %v8070_v18 = vpop.xlane.xlu0 %2123 }
 0x228   :  { %v8053_v61 = vpop.eup %5137  ;;  %v2938_v10 = vadd.f32 1.0, %v5136_v12  ;;  %5155 = vpow2.f32 %v4340_v52  ;;  %v2395_v55 = vsel %vm161_vm0, %v2021_v30, 0.0  ;;  %v2194_v28 = vsel %vm161_vm0, %v1954_v33, 0.0  ;;  %v8068_v30 = vpop.xlane.xlu1 %2321 }
 0x229   :  { %v5140_v0 = vpop.eup %5139  ;;  %5157 = vrcp.f32 %v3010_v32  ;;  %v4287_v38 = vmul.f32 -1.442695, %v2439_v14  ;;  %v8062_v59 = vmul.f32 %v1698_v25, %v7971_v58  ;;  %2396 = vadd.xlane.f32.xlu1 %v2395_v55  ;;  %2195 = vadd.xlane.f32.xlu0 %v2194_v28  ;;  %v1956_v7 = vmul.f32 %v7894_v3, %v7883_v49 }
 0x22a   :  { %v5142_v47 = vpop.eup %5141  ;;  %5159 = vrcp.f32 %v2938_v10  ;;  %v2949_v41 = vadd.f32 1.0, %v5140_v0  ;;  %v4343_v34 = vmul.f32 -1.442695, %v2495_v6  ;;  %v2503_v52 = vadd.f32 %v8916_v50, %v7732_v31 }
 0x22b   :  { %v3002_v26 = vadd.f32 1.0, %v5142_v47  ;;  %5161 = vpow2.f32 %v4287_v38  ;;  %v8072_v12 = vpop.eup %5143  ;;  %v1825_v58 = vmul.f32 %v1697_v23, %v8005_v48  ;;  %v2392_v25 = vsel %vm161_vm0, %v2020_v44, 0.0 }
 0x22c   :  { %9027 = vst [vmem:[#allocation33_spill] sm:$0xff] %v8072_v12  ;;  %5163 = vrcp.f32 %v2949_v41  ;;  %v2430_v49 = vadd.f32 %v8916_v50, %v7734_v37  ;;  %v2200_v33 = vsel %vm161_vm0, %v1956_v7, 0.0  ;;  %v4351_v14 = vmul.f32 -1.442695, %v2503_v52 }
 0x22d   :  { %v5146_v32 = vpop.eup %5145  ;;  %v1959_v31 = vmul.f32 %v7894_v3, %v7992_v42  ;;  %v2023_v10 = vmul.f32 %v7894_v3, %v7976_v29  ;;  %v1762_v6 = vadd.f32 1.0, %v5130_v43  ;;  %5165 = vrcp.f32 %v3002_v26  ;;  %2393 = vadd.xlane.f32.xlu1 %v2392_v25  ;;  %2201 = vadd.xlane.f32.xlu0 %v2200_v33  ;;  %v8099_v26 = vpop.xlane.xlu1 %2138 }
 0x22e   :  { %v5148_v55 = vpop.eup %5147  ;;  %v4278_v48 = vmul.f32 -1.442695, %v2430_v49  ;;  %v2502_v23 = vadd.f32 %v8916_v50, %v7753_v62  ;;  %v1761_v0 = vadd.f32 1.0, %v5132_v21  ;;  %v3013_v28 = vadd.f32 1.0, %v5146_v32 }
 0x22f   :  { %v8085_v37 = vpop.eup %5149  ;;  %v2940_v38 = vadd.f32 1.0, %v5148_v55  ;;  %5167 = vpow2.f32 %v4343_v34  ;;  %v2209_v29 = vsel %vm161_vm0, %v1959_v31, 0.0  ;;  %v2494_v42 = vadd.f32 %v8916_v50, %v7755_v35  ;;  %v8101_v34 = vpop.xlane.xlu0 %2324 }
 0x230   :  { %9028 = vst [vmem:[#allocation12_spill] sm:$0xff] %v8085_v37  ;;  %v8087_v44 = vpop.eup %5151  ;;  %5169 = vpow2.f32 %v4351_v14  ;;  %v2022_v43 = vmul.f32 %v7894_v3, %v8016_v54  ;;  %v2401_v62 = vsel %vm161_vm0, %v2023_v10, 0.0  ;;  %v4350_v41 = vmul.f32 -1.442695, %v2502_v23 }
 0x231   :  { %9029 = vst [vmem:[#allocation9_spill] sm:$0xff] %v8087_v44  ;;  %v5154_v47 = vpop.eup %5153  ;;  %v1958_v21 = vmul.f32 %v7894_v3, %v8036_v57  ;;  %v2432_v7 = vadd.f32 %v8916_v50, %v7790_v1  ;;  %v9030_v35 = vrot.slane %v7850_v24, %v7687_v27  ;;  %5171 = vpow2.f32 %v4278_v48  ;;  %2210 = vadd.xlane.f32.xlu1 %v2209_v29 }
 0x232   :  { %v5156_v52 = vpop.eup %5155  ;;  %2402 = vadd.xlane.f32.xlu0 %v2401_v62  ;;  %v4342_v25 = vmul.f32 -1.442695, %v2494_v42  ;;  %v2441_v57 = vadd.f32 %v8916_v50, %v7788_v13  ;;  %v1890_v1 = vmul.f32 %v1762_v6, %v8029_v56  ;;  %v1889_v32 = vmul.f32 %v1761_v0, %v8039_v5  ;;  %v9047_v0 = vld [vmem:[#allocation47_spill] sm:$0xff] }
 0x233   :  { %v3827_v54 = vsel %vm3496_vm8, %v9030_v35, %v7777_v17  ;;  %v8110_v49 = vpop.eup %5157  ;;  %5173 = vrcp.f32 %v3013_v28  ;;  %v3012_v33 = vadd.f32 1.0, %v5154_v47  ;;  %v3004_v17 = vadd.f32 1.0, %v5156_v52  ;;  %v9033_v28 = vld [vmem:[#allocation35_spill] sm:$0xff]  ;;  %v8132_v42 = vpop.xlane.xlu0 %2129  ;;  %v9034_v47 = vld [vmem:[#allocation49_spill] sm:$0xff] }
 0x234   :  { %9031 = vst [vmem:[#allocation8_spill] sm:$0xff] %v8110_v49  ;;  %v8114_v14 = vpop.eup %5159  ;;  %5175 = vrcp.f32 %v2940_v38  ;;  %v2398_v24 = vsel %vm161_vm0, %v2022_v43, 0.0  ;;  %v1961_v31 = vmul.f32 %v7894_v3, %v8062_v59  ;;  %v2206_v13 = vsel %vm161_vm0, %v1958_v21, 0.0  ;;  %v9032_v59 = vld [vmem:[#allocation18_spill] sm:$0xff] }
 0x235   :  { %v5162_v10 = vpop.eup %5161  ;;  %5177 = vpow2.f32 %v4350_v41  ;;  %v4280_v55 = vmul.f32 -1.442695, %v2432_v7  ;;  %v1960_v56 = vmul.f32 %v7894_v3, %v1825_v58  ;;  %2399 = vadd.xlane.f32.xlu1 %v2398_v24  ;;  %v4289_v6 = vmul.f32 -1.442695, %v2441_v57  ;;  %v8130_v58 = vpop.xlane.xlu1 %2144 }
 0x236   :  { %v8121_v5 = vpop.eup %5163  ;;  %5179 = vpow2.f32 %v4342_v25  ;;  %2207 = vadd.xlane.f32.xlu0 %v2206_v13  ;;  %v2505_v48 = vadd.f32 %v8916_v50, %v7824_v15  ;;  %v2434_v23 = vadd.f32 %v8916_v50, %v7826_v53  ;;  %v3519_v38 = vadd.s32 4294967200, %v9033_v28 }
 0x237   :  { %5181 = vrcp.f32 %v3012_v33  ;;  %v2951_v29 = vadd.f32 1.0, %v5162_v10  ;;  %v8134_v43 = vpop.eup %5165  ;;  %v9035_v62 = vrot.slane %v9034_v47, %v7530_v46  ;;  %v2215_v53 = vsel %vm161_vm0, %v1961_v31, 0.0  ;;  %v9036_v33 = vld [vmem:[#allocation22_spill] sm:$0xff] }
 0x238   :  { %5183 = vrcp.f32 %v3004_v17  ;;  %v2025_v41 = vmul.f32 %v7894_v3, %v1890_v1  ;;  %v2212_v7 = vsel %vm161_vm0, %v1960_v56, 0.0  ;;  %v4282_v52 = vmul.f32 -1.442695, %v2434_v23  ;;  %v9037_v1 = vld [vmem:[#allocation34_spill] sm:$0xff] }
 0x239   :  { %v3832_v15 = vsel %vm3503_vm9, %v9035_v62, %v3827_v54  ;;  %v5168_v21 = vpop.eup %5167  ;;  %5185 = vpow2.f32 %v4280_v55  ;;  %v2024_v35 = vmul.f32 %v7894_v3, %v1889_v32  ;;  %2216 = vadd.xlane.f32.xlu1 %v2215_v53  ;;  %v4353_v57 = vmul.f32 -1.442695, %v2505_v48  ;;  %v8161_v48 = vpop.xlane.xlu0 %2330  ;;  %v9039_v53 = vld [vmem:[#allocation45_spill] sm:$0xff] }
 0x23a   :  { %v5170_v25 = vpop.eup %5169  ;;  %5187 = vpow2.f32 %v4289_v6  ;;  %2213 = vadd.xlane.f32.xlu0 %v2212_v7  ;;  %v2436_v54 = vadd.f32 %v8916_v50, %v7862_v16  ;;  %v3509_v17 = vrot.slane %v7952_v45, %v9036_v33  ;;  %v8149_v24 = vsub.s32 %v3519_v38, %v9037_v1  ;;  %v8159_v6 = vpop.xlane.xlu1 %2150  ;;  %v9038_v38 = vld [vmem:[#allocation38_spill] sm:$0xff] }
 0x23b   :  { %5189 = vrcp.f32 %v2951_v29  ;;  %v5172_v31 = vpop.eup %5171  ;;  %v3007_v10 = vadd.f32 1.0, %v5168_v21  ;;  %v2407_v3 = vsel %vm161_vm0, %v2025_v41, 0.0  ;;  %v2404_v32 = vsel %vm161_vm0, %v2024_v35, 0.0  ;;  %v9040_v21 = vld [vmem:[#allocation23_spill] sm:$0xff] }
 0x23c   :  { %v2504_v13 = vadd.f32 %v8916_v50, %v7860_v4  ;;  %v2942_v16 = vadd.f32 1.0, %v5172_v31  ;;  %5191 = vpow2.f32 %v4282_v52  ;;  %v4284_v56 = vmul.f32 -1.442695, %v2436_v54  ;;  %v9050_v29 = vld [vmem:[#allocation51_spill] sm:$0xff] }
 0x23d   :  { %v8155_v55 = vpop.eup %5173  ;;  %v2438_v45 = vadd.f32 %v8916_v50, %v7908_v51  ;;  %v3836_v4 = vrot.slane %v7969_v2, %v9036_v33  ;;  %v3015_v47 = vadd.f32 1.0, %v5170_v25  ;;  %5193 = vpow2.f32 %v4353_v57  ;;  %2408 = vadd.xlane.f32.xlu1 %v2407_v3  ;;  %v9041_v25 = vld [vmem:[#allocation24_spill] sm:$0xff] }
 0x23e   :  { %v8163_v23 = vpop.eup %5175  ;;  %2405 = vadd.xlane.f32.xlu0 %v2404_v32  ;;  %v3511_v51 = vsel %vm3510_vm10, %v3509_v17, %v7889_v63  ;;  %5195 = vrcp.f32 %v2942_v16  ;;  %v2443_v7 = vadd.f32 %v8916_v50, %v9040_v21  ;;  %v3533_v35 = vadd.s32 4294967184, %v9033_v28  ;;  %v9042_v17 = vld [vmem:[#allocation11_spill] sm:$0xff]  ;;  %v9044_v21 = vld [vmem:[#allocation28_spill] sm:$0xff] }
 0x23f   :  { %v5178_v62 = vpop.eup %5177  ;;  %5197 = vrcp.f32 %v3007_v10  ;;  %v4352_v2 = vmul.f32 -1.442695, %v2504_v13  ;;  %v2506_v57 = vadd.f32 %v8916_v50, %v9041_v25  ;;  %v4286_v63 = vmul.f32 -1.442695, %v2438_v45  ;;  %v9046_v45 = vld [vmem:[#allocation42_spill] sm:$0xff] }
 0x240   :  { %v5180_v52 = vpop.eup %5179  ;;  %5199 = vpow2.f32 %v4284_v56  ;;  %v2440_v3 = vadd.f32 %v8916_v50, %v9042_v17  ;;  %v8185_v16 = vsel %vm3510_vm10, %v3836_v4, %v3832_v15  ;;  %v9045_v28 = vrot.slane %v9044_v21, %v9032_v59  ;;  %v8197_v15 = vpop.xlane.xlu1 %2156 }
 0x241   :  { %v8178_v54 = vpop.eup %5181  ;;  %v3006_v31 = vadd.f32 1.0, %v5180_v52  ;;  %9043 = vst [vmem:[#allocation10_spill] sm:$0xff] %v8185_v16  ;;  %v3523_v13 = vrot.slane %v8026_v36, %v8149_v24  ;;  %5201 = vrcp.f32 %v3015_v47  ;;  %v4291_v17 = vmul.f32 -1.442695, %v2443_v7  ;;  %v8199_v4 = vpop.xlane.xlu0 %2135 }
 0x242   :  { %v8182_v32 = vpop.eup %5183  ;;  %v3518_v10 = vsel %vm3517_vm11, %v9045_v28, %v3511_v51  ;;  %v8202_v51 = vsub.s32 %v3533_v35, %v9037_v1  ;;  %v4354_v36 = vmul.f32 -1.442695, %v2506_v57  ;;  %v4288_v25 = vmul.f32 -1.442695, %v2440_v3  ;;  %v9051_v57 = vld [vmem:[#allocation13_spill] sm:$0xff] }
 0x243   :  { %v5186_v52 = vpop.eup %5185  ;;  %5203 = vrcp.f32 %v3006_v31  ;;  %v9048_v31 = vld [vmem:[#allocation7_spill] sm:$0xff]  ;;  %v8211_v56 = vsel %vm3524_vm12, %v3523_v13, %v3518_v10  ;;  %v3014_v41 = vadd.f32 1.0, %v5178_v62  ;;  %v2508_v13 = vadd.f32 %v8916_v50, %v8011_v60 }
 0x244   :  { %v5188_v21 = vpop.eup %5187  ;;  %v2944_v28 = vadd.f32 1.0, %v5186_v52  ;;  %5205 = vpow2.f32 %v4352_v2  ;;  %v2445_v7 = vadd.f32 %v8916_v50, %v9048_v31  ;;  %9049 = vst [vmem:[#allocation37_spill] sm:$0xff] %v8211_v56  ;;  %v3550_v52 = vrot.slane %v8163_v23, %v9051_v57  ;;  %v8227_v62 = vpop.xlane.xlu1 %2162 }
 0x245   :  { %v8204_v47 = vpop.eup %5189  ;;  %5207 = vpow2.f32 %v4286_v63  ;;  %v9052_v63 = vld [vmem:[#allocation31_spill] sm:$0xff]  ;;  %v2953_v44 = vadd.f32 1.0, %v5188_v21  ;;  %v2442_v23 = vadd.f32 %v8916_v50, %v9053_v9  ;;  %v9054_v21 = vld [vmem:[#allocation21_spill] sm:$0xff]  ;;  %v3866_v60 = vrot.slane %v8182_v32, %v9051_v57 }
 0x246   :  { %5209 = vrcp.f32 %v2944_v28  ;;  %v5192_v2 = vpop.eup %5191  ;;  %v2507_v3 = vadd.f32 %v8916_v50, %v9052_v63  ;;  %v4293_v35 = vmul.f32 -1.442695, %v2445_v7  ;;  %v9057_v7 = vld [vmem:[#allocation14_spill] sm:$0xff]  ;;  %v2509_v16 = vadd.f32 %v8916_v50, %v8045_v39 }
 0x247   :  { %5211 = vpow2.f32 %v4291_v17  ;;  %v5194_v31 = vpop.eup %5193  ;;  %v2946_v10 = vadd.f32 1.0, %v5192_v2  ;;  %v8229_v17 = vpop.xlane.xlu0 %2327  ;;  %v9055_v2 = vld [vmem:[#allocation15_spill] sm:$0xff]  ;;  %v4356_v49 = vmul.f32 -1.442695, %v2508_v13  ;;  %vm4100_vm0 = vcmask 1041409  }
 0x248   :  { %5213 = vpow2.f32 %v4354_v36  ;;  %v5196_v1 = vpop.eup %5195  ;;  %v4355_v20 = vmul.f32 -1.442695, %v2507_v3 }
 0x249   :  { %5215 = vpow2.f32 %v4288_v25  ;;  %v5198_v63 = vpop.eup %5197  ;;  %v3559_v12 = vrot.slane %v5196_v1, %v9055_v2  ;;  %v9056_v25 = vld [vmem:[#allocation16_spill] sm:$0xff] }
 0x24a   :  { %5217 = vrcp.f32 %v2946_v10  ;;  %v5200_v28 = vpop.eup %5199  ;;  %v9058_v37 = vrot.slane %v9056_v25, %v9057_v7  ;;  %v2510_v10 = vadd.f32 %v8916_v50, %v8068_v30 }
 0x24b   :  { %5219 = vrcp.f32 %v3014_v41  ;;  %v8242_v56 = vpop.eup %5201  ;;  %v2948_v32 = vadd.f32 1.0, %v5200_v28  ;;  %v3880_v28 = vrot.slane %v5198_v63, %v9038_v38 }
 0x24c   :  { %v3555_v9 = vsel %vm3447_vm1, %v9058_v37, %v3550_v52  ;;  %5221 = vrcp.f32 %v2953_v44  ;;  %v4290_v37 = vmul.f32 -1.442695, %v2442_v23  ;;  %v9059_v52 = vld [vmem:[#allocation27_spill] sm:$0xff]  ;;  %v3017_v44 = vadd.f32 1.0, %v5194_v31  ;;  %v8259_v23 = vpop.xlane.xlu0 %2336 }
 0x24d   :  { %v3560_v36 = vsel %vm3454_vm2, %v3559_v12, %v3555_v9  ;;  %v5204_v1 = vpop.eup %5203  ;;  %5223 = vpow2.f32 %v4293_v35  ;;  %v9060_v39 = vrot.slane %v9059_v52, %v9057_v7  ;;  %v4357_v9 = vmul.f32 -1.442695, %v2509_v16  ;;  %v8257_v35 = vpop.xlane.xlu1 %2168 }
 0x24e   :  { %v5206_v41 = vpop.eup %5205  ;;  %v3875_v12 = vrot.slane %v5204_v1, %v9055_v2  ;;  %5225 = vrcp.f32 %v2948_v32  ;;  %v2444_v31 = vadd.f32 %v8916_v50, %v8070_v18  ;;  %v9061_v1 = vrot.slane %v8020_v40, %v9047_v0 }
 0x24f   :  { %v3871_v3 = vsel %vm3447_vm1, %v9060_v39, %v3866_v60  ;;  %v5208_v13 = vpop.eup %5207  ;;  %5227 = vpow2.f32 %v4355_v20  ;;  %v3016_v16 = vadd.f32 1.0, %v5206_v41  ;;  %v2447_v18 = vadd.f32 %v8916_v50, %v8043_v22 }
 0x250   :  { %v5210_v25 = vpop.eup %5209  ;;  %v3876_v52 = vsel %vm3454_vm2, %v3875_v12, %v3871_v3  ;;  %v2950_v60 = vadd.f32 1.0, %v5208_v13  ;;  %5229 = vpow2.f32 %v4356_v49  ;;  %v9062_v3 = vrot.slane %v7910_v11, %v9038_v38 }
 0x251   :  { %v5212_v32 = vpop.eup %5211  ;;  %v3881_v63 = vsel %vm3461_vm3, %v3880_v28, %v3876_v52  ;;  %v3569_v20 = vrot.slane %v5210_v25, %v9047_v0  ;;  %5231 = vpow2.f32 %v4290_v37  ;;  %v9063_v25 = vrot.slane %v7983_v8, %v9039_v53 }
 0x252   :  { %v5214_v30 = vpop.eup %5213  ;;  %v3886_v39 = vsel %vm3468_vm4, %v9061_v1, %v3881_v63  ;;  %v3565_v49 = vsel %vm3461_vm3, %v9062_v3, %v3560_v36  ;;  %5233 = vrcp.f32 %v2950_v60  ;;  %v4358_v41 = vmul.f32 -1.442695, %v2510_v10  ;;  %v8290_v63 = vpop.xlane.xlu1 %2360 }
 0x253   :  { %v5216_v12 = vpop.eup %5215  ;;  %v8280_v37 = vsel %vm3475_vm5, %v9063_v25, %v3886_v39  ;;  %v3570_v40 = vsel %vm3468_vm4, %v3569_v20, %v3565_v49  ;;  %5235 = vrcp.f32 %v3017_v44  ;;  %v4292_v11 = vmul.f32 -1.442695, %v2444_v31  ;;  %v8292_v44 = vpop.xlane.xlu0 %2141 }
 0x254   :  { %v5218_v13 = vpop.eup %5217  ;;  %v2952_v28 = vadd.f32 1.0, %v5216_v12  ;;  %5237 = vpow2.f32 %v4357_v9  ;;  %v2511_v36 = vadd.f32 %v8916_v50, %v8101_v34  ;;  %v2955_v8 = vadd.f32 1.0, %v5212_v32 }
 0x255   :  { %v8285_v52 = vpop.eup %5219  ;;  %v3579_v22 = vrot.slane %v5218_v13, %v9054_v21  ;;  %5239 = vrcp.f32 %v3016_v16  ;;  %v2449_v60 = vadd.f32 %v8916_v50, %v8099_v26  ;;  %v3856_v9 = vrot.slane %v8134_v43, %v8202_v51 }
 0x256   :  { %v8294_v10 = vpop.eup %5221  ;;  %v9064_v34 = vrot.slane %v7957_v19, %v9039_v53  ;;  %5241 = vrcp.f32 %v2952_v28  ;;  %v4295_v20 = vmul.f32 -1.442695, %v2447_v18  ;;  %v3018_v1 = vadd.f32 1.0, %v5214_v30 }
 0x257   :  { %v5224_v32 = vpop.eup %5223  ;;  %5243 = vpow2.f32 %v4358_v41  ;;  %v3905_v3 = vrot.slane %v8178_v54, %v7687_v27  ;;  %v9065_v49 = vrot.slane %v8053_v61, %v9050_v29  ;;  %v4359_v12 = vmul.f32 -1.442695, %v2511_v36 }
 0x258   :  { %v3575_v31 = vsel %vm3475_vm5, %v9064_v34, %v3570_v40  ;;  %v5226_v39 = vpop.eup %5225  ;;  %5245 = vpow2.f32 %v4292_v11  ;;  %v3604_v25 = vrot.slane %v8204_v47, %v9032_v59  ;;  %v4297_v30 = vmul.f32 -1.442695, %v2449_v60  ;;  %v8325_v60 = vpop.xlane.xlu0 %2333 }
 0x259   :  { %v3580_v16 = vsel %vm3482_vm6, %v3579_v22, %v3575_v31  ;;  %v5228_v18 = vpop.eup %5227  ;;  %v3589_v40 = vrot.slane %v5226_v39, %v7687_v27  ;;  %5247 = vrcp.f32 %v2955_v8  ;;  %v2451_v61 = vadd.f32 %v8916_v50, %v8130_v58  ;;  %v8323_v8 = vpop.xlane.xlu1 %2357 }
 0x25a   :  { %v3585_v19 = vsel %vm3489_vm7, %v9065_v49, %v3580_v16  ;;  %v5230_v41 = vpop.eup %5229  ;;  %5249 = vpow2.f32 %v4295_v20  ;;  %v2446_v28 = vadd.f32 %v8916_v50, %v8132_v42  ;;  %v2453_v22 = vadd.f32 %v8916_v50, %v8159_v6 }
 0x25b   :  { %v5232_v11 = vpop.eup %5231  ;;  %v3590_v36 = vsel %vm3496_vm8, %v3589_v40, %v3585_v19  ;;  %5251 = vrcp.f32 %v3018_v1  ;;  %v3020_v47 = vadd.f32 1.0, %v5230_v41  ;;  %v9066_v31 = vrot.slane %v8121_v5, %v7530_v46 }
 0x25c   :  { %v5234_v34 = vpop.eup %5233  ;;  %v2957_v20 = vadd.f32 1.0, %v5224_v32  ;;  %v2954_v42 = vadd.f32 1.0, %v5232_v11  ;;  %5253 = vpow2.f32 %v4359_v12  ;;  %v2513_v39 = vadd.f32 %v8916_v50, %v8161_v48 }
 0x25d   :  { %v3595_v58 = vsel %vm3503_vm9, %v9066_v31, %v3590_v36  ;;  %v8331_v16 = vpop.eup %5235  ;;  %v3599_v6 = vrot.slane %v5234_v34, %v9036_v33  ;;  %5255 = vpow2.f32 %v4297_v30  ;;  %v3614_v5 = vrot.slane %v8294_v10, %v9046_v45 }
 0x25e   :  { %v5238_v49 = vpop.eup %5237  ;;  %5257 = vrcp.f32 %v2954_v42  ;;  %v4299_v19 = vmul.f32 -1.442695, %v2451_v61  ;;  %v4294_v32 = vmul.f32 -1.442695, %v2446_v28  ;;  %v3019_v41 = vadd.f32 1.0, %v5228_v18  ;;  %v8351_v18 = vpop.xlane.xlu0 %2342 }
 0x25f   :  { %v8340_v40 = vpop.eup %5239  ;;  %v3600_v12 = vsel %vm3510_vm10, %v3599_v6, %v3595_v58  ;;  %5259 = vrcp.f32 %v3020_v47  ;;  %v3021_v11 = vadd.f32 1.0, %v5238_v49  ;;  %v4301_v34 = vmul.f32 -1.442695, %v2453_v22  ;;  %v8349_v58 = vpop.xlane.xlu1 %2174 }
 0x260   :  { %v5242_v36 = vpop.eup %5241  ;;  %v3605_v30 = vsel %vm3517_vm11, %v3604_v25, %v3600_v12  ;;  %5261 = vrcp.f32 %v2957_v20  ;;  %v2455_v48 = vadd.f32 %v8916_v50, %v8197_v15  ;;  %v4361_v61 = vmul.f32 -1.442695, %v2513_v39 }
 0x261   :  { %v5244_v31 = vpop.eup %5243  ;;  %v3609_v10 = vrot.slane %v5242_v36, %v8149_v24  ;;  %5263 = vrcp.f32 %v3021_v11  ;;  %v2448_v28 = vadd.f32 %v8916_v50, %v8199_v4  ;;  %v2457_v25 = vadd.f32 %v8916_v50, %v8227_v62  ;;  %v9067_v11 = vld [vmem:[#allocation37_spill] sm:$0xff] }
 0x262   :  { %v5246_v47 = vpop.eup %5245  ;;  %v3022_v42 = vadd.f32 1.0, %v5244_v31  ;;  %5265 = vpow2.f32 %v4294_v32  ;;  %v2512_v6 = vadd.f32 %v8916_v50, %v8229_v17  ;;  %v8362_v32 = vmul.f32 -1.442695, %v2455_v48 }
 0x263   :  { %v5248_v15 = vpop.eup %5247  ;;  %v3610_v22 = vsel %vm3524_vm12, %v3609_v10, %v3605_v30  ;;  %5267 = vrcp.f32 %v3019_v41  ;;  %v2956_v20 = vadd.f32 1.0, %v5246_v47  ;;  %v4296_v12 = vmul.f32 -1.442695, %v2448_v28  ;;  %v9068_v41 = vld [vmem:[#allocation48_spill] sm:$0xff] }
 0x264   :  { %v5250_v4 = vpop.eup %5249  ;;  %5269 = vrcp.f32 %v3022_v42  ;;  %v9069_v36 = vrot.slane %v9068_v41, %v9046_v45  ;;  %v8371_v31 = vmul.f32 -1.442695, %v2457_v25  ;;  %v2459_v10 = vadd.f32 %v8916_v50, %v8257_v35  ;;  %v8383_v41 = vpop.xlane.xlu1 %2366 }
 0x265   :  { %v8364_v62 = vpop.eup %5251  ;;  %5271 = vrcp.f32 %v2956_v20  ;;  %v9070_v48 = vrot.slane %v8114_v14, %v8202_v51  ;;  %v4360_v20 = vmul.f32 -1.442695, %v2512_v6  ;;  %v2523_v14 = vadd.f32 %v8916_v50, %v8290_v63  ;;  %v9072_v6 = vld [vmem:[#allocation10_spill] sm:$0xff]  ;;  %v9075_v63 = vld [vmem:[#allocation33_spill] sm:$0xff] }
 0x266   :  { %v3532_v17 = vsel %vm3531_vm13, %v9069_v36, %v9067_v11  ;;  %v5254_v30 = vpop.eup %5253  ;;  %5273 = vpow2.f32 %v4299_v19  ;;  %v2515_v11 = vadd.f32 %v8916_v50, %v8259_v23  ;;  %v8385_v19 = vpop.xlane.xlu0 %2147  ;;  %v9071_v36 = vld [vmem:[#allocation17_spill] sm:$0xff]  ;;  %v3615_v23 = vsel %vm3531_vm13, %v3614_v5, %v3610_v22 }
 0x267   :  { %v8379_v47 = vsel %vm3538_vm14, %v9070_v48, %v3532_v17  ;;  %v5256_v28 = vpop.eup %5255  ;;  %v3023_v42 = vadd.f32 1.0, %v5254_v30  ;;  %5275 = vpow2.f32 %v4361_v61  ;;  %v3624_v35 = vrot.slane %v5248_v15, %v9071_v36  ;;  %v9073_v48 = vld [vmem:[#allocation30_spill] sm:$0xff]  ;;  %v9077_v5 = vld [vmem:[#allocation29_spill] sm:$0xff] }
 0x268   :  { %v5258_v25 = vpop.eup %5257  ;;  %5277 = vpow2.f32 %v4301_v34  ;;  %v2450_v17 = vadd.f32 %v8916_v50, %v8292_v44  ;;  %v9074_v39 = vrot.slane %v9073_v48, %v9032_v59  ;;  %v2959_v34 = vadd.f32 1.0, %v5250_v4 }
 0x269   :  { %v5260_v30 = vpop.eup %5259  ;;  %v3619_v61 = vrot.slane %v5258_v25, %v8202_v51  ;;  %5279 = vrcp.f32 %v3023_v42  ;;  %v2961_v13 = vadd.f32 1.0, %v5256_v28  ;;  %v9076_v1 = vrot.slane %v9075_v63, %v8149_v24 }
 0x26a   :  { %v3842_v49 = vsel %vm3517_vm11, %v9074_v39, %v9072_v6  ;;  %v5262_v15 = vpop.eup %5261  ;;  %5281 = vpow2.f32 %v4296_v12  ;;  %v9078_v22 = vrot.slane %v9077_v5, %v9046_v45  ;;  %v9079_v39 = vld [vmem:[#allocation9_spill] sm:$0xff]  ;;  %v3945_v12 = vrot.slane %v5260_v30, %v9051_v57  ;;  %v8423_v63 = vpop.xlane.xlu0 %2339  ;;  %v9082_v5 = vld [vmem:[#allocation12_spill] sm:$0xff] }
 0x26b   :  { %v3847_v44 = vsel %vm3524_vm12, %v9076_v1, %v3842_v49  ;;  %v5264_v26 = vpop.eup %5263  ;;  %v3620_v42 = vsel %vm3538_vm14, %v3619_v61, %v3615_v23  ;;  %v3861_v6 = vrot.slane %v9079_v39, %v9071_v36  ;;  %5283 = vpow2.f32 %v4360_v20  ;;  %v8421_v23 = vpop.xlane.xlu1 %2180 }
 0x26c   :  { %v3852_v25 = vsel %vm3531_vm13, %v9078_v22, %v3847_v44  ;;  %v5266_v4 = vpop.eup %5265  ;;  %v3949_v28 = vrot.slane %v5264_v26, %v9057_v7  ;;  %v8413_v48 = vsel %vm3545_vm15, %v3624_v35, %v3620_v42  ;;  %v9080_v26 = vld [vmem:[#allocation8_spill] sm:$0xff]  ;;  %5285 = vrcp.f32 %v2959_v34 }
 0x26d   :  { %v3857_v1 = vsel %vm3538_vm14, %v3856_v9, %v3852_v25  ;;  %v8419_v49 = vpop.eup %5267  ;;  %v2958_v61 = vadd.f32 1.0, %v5266_v4  ;;  %v9081_v35 = vrot.slane %v9080_v26, %v9054_v21  ;;  %v4363_v42 = vmul.f32 -1.442695, %v2515_v11 }
 0x26e   :  { %v8426_v30 = vsel %vm3545_vm15, %v3861_v6, %v3857_v1  ;;  %v5270_v43 = vpop.eup %5269  ;;  %v3950_v9 = vsel %vm3447_vm1, %v3949_v28, %v3945_v12  ;;  %v9083_v20 = vrot.slane %v9082_v5, %v9050_v29  ;;  %v4307_v6 = vmul.f32 -1.442695, %v2459_v10 }
 0x26f   :  { %v3896_v44 = vsel %vm3482_vm6, %v9081_v35, %v8280_v37  ;;  %v5272_v25 = vpop.eup %5271  ;;  %v3954_v39 = vrot.slane %v5270_v43, %v9055_v2  ;;  %5287 = vrcp.f32 %v2958_v61  ;;  %v2514_v4 = vadd.f32 %v8916_v50, %v8325_v60 }
 0x270   :  { %v3901_v22 = vsel %vm3489_vm7, %v9083_v20, %v3896_v44  ;;  %v5274_v1 = vpop.eup %5273  ;;  %v3633_v37 = vrot.slane %v5262_v15, %v9057_v7  ;;  %v3629_v34 = vrot.slane %v5272_v25, %v9051_v57  ;;  %5289 = vpow2.f32 %v8362_v32 }
 0x271   :  { %v3906_v11 = vsel %vm3496_vm8, %v3905_v3, %v3901_v22  ;;  %v5276_v12 = vpop.eup %5275  ;;  %v3955_v28 = vsel %vm3454_vm2, %v3954_v39, %v3950_v9  ;;  %5291 = vrcp.f32 %v2961_v13  ;;  %v4371_v10 = vmul.f32 -1.442695, %v2523_v14  ;;  %v8457_v13 = vpop.xlane.xlu1 %2372 }
 0x272   :  { %v4298_v61 = vmul.f32 -1.442695, %v2450_v17  ;;  %v5278_v26 = vpop.eup %5277  ;;  %v3634_v60 = vsel %vm3447_vm1, %v3633_v37, %v3629_v34  ;;  %5293 = vpow2.f32 %v4363_v42  ;;  %v2522_v15 = vadd.f32 %v8916_v50, %v8323_v8  ;;  %v8459_v14 = vpop.xlane.xlu0 %2348 }
 0x273   :  { %v2461_v32 = vadd.f32 %v8916_v50, %v8349_v58  ;;  %v5280_v35 = vpop.eup %5279  ;;  %5295 = vpow2.f32 %v8371_v31  ;;  %v4362_v54 = vmul.f32 -1.442695, %v2514_v4  ;;  %v2517_v3 = vadd.f32 %v8916_v50, %v8351_v18 }
 0x274   :  { %v9084_v17 = vrot.slane %v8155_v55, %v7530_v46  ;;  %v5282_v8 = vpop.eup %5281  ;;  %v3959_v43 = vrot.slane %v5280_v35, %v9038_v38  ;;  %v3025_v58 = vadd.f32 1.0, %v5276_v12  ;;  %5297 = vpow2.f32 %v4307_v6 }
 0x275   :  { %v9085_v31 = vrot.slane %v8285_v52, %v9036_v33  ;;  %v2960_v18 = vadd.f32 1.0, %v5282_v8  ;;  %5299 = vpow2.f32 %v4298_v61  ;;  %v9086_v42 = vrot.slane %v8242_v56, %v9032_v59  ;;  %v5284_v52 = vpop.eup %5283  ;;  %v9087_v56 = vld [vmem:[#allocation44_spill] sm:$0xff] }
 0x276   :  { %v3911_v44 = vsel %vm3503_vm9, %v9084_v17, %v3906_v11  ;;  %v3935_v55 = vrot.slane %v8364_v62, %v8202_v51  ;;  %v8477_v20 = vsel %vm3461_vm3, %v3959_v43, %v3955_v28  ;;  %5301 = vpow2.f32 %v4371_v10  ;;  %v5286_v37 = vpop.eup %5285  ;;  %v8496_v10 = vpop.xlane.xlu1 %2369 }
 0x277   :  { %v3916_v9 = vsel %vm3510_vm10, %v9085_v31, %v3911_v44  ;;  %v3940_v22 = vrot.slane %v8419_v49, %v9071_v36  ;;  %5303 = vrcp.f32 %v2960_v18  ;;  %v2452_v25 = vadd.f32 %v8916_v50, %v8385_v19 }
 0x278   :  { %v3921_v5 = vsel %vm3517_vm11, %v9086_v42, %v3916_v9  ;;  %v9088_v39 = vrot.slane %v9087_v56, %v9071_v36  ;;  %v9089_v62 = vrot.slane %v8340_v40, %v8149_v24  ;;  %v2963_v34 = vadd.f32 1.0, %v5274_v1 }
 0x279   :  { %5305 = vrcp.f32 %v3025_v58  ;;  %v3024_v49 = vadd.f32 1.0, %v5284_v52  ;;  %v9090_v11 = vrot.slane %v8331_v16, %v9046_v45  ;;  %v5288_v12 = vpop.eup %5287  ;;  %v2965_v28 = vadd.f32 1.0, %v5278_v26 }
 0x27a   :  { %v3546_v6 = vsel %vm3545_vm15, %v9088_v39, %v8379_v47  ;;  %v3926_v4 = vsel %vm3524_vm12, %v9089_v62, %v3921_v5  ;;  %5307 = vpow2.f32 %v4362_v54  ;;  %v2154_v47 = vpop.xlane.xlu0 %2153  ;;  %v5290_v1 = vpop.eup %5289  ;;  %v3638_v35 = vrot.slane %v5288_v12, %v9055_v2 }
 0x27b   :  { %v3931_v19 = vsel %vm3531_vm13, %v9090_v11, %v3926_v4  ;;  %v8501_v40 = vsel %vm4100_vm0, %v8413_v48, %v3546_v6  ;;  %5309 = vrcp.f32 %v3024_v49  ;;  %v4370_v17 = vmul.f32 -1.442695, %v2522_v15  ;;  %v5292_v44 = vpop.eup %5291 }
 0x27c   :  { %v3936_v61 = vsel %vm3538_vm14, %v3935_v55, %v3931_v19  ;;  %v3643_v26 = vrot.slane %v5286_v37, %v9038_v38  ;;  %v4309_v54 = vmul.f32 -1.442695, %v2461_v32  ;;  %v5294_v8 = vpop.eup %5293  ;;  %5311 = vrcp.f32 %v2963_v34  ;;  %v8514_v55 = vpop.xlane.xlu1 %2186 }
 0x27d   :  { %v8505_v16 = vsel %vm3545_vm15, %v3940_v22, %v3936_v61  ;;  %v3639_v43 = vsel %vm3454_vm2, %v3638_v35, %v3634_v60  ;;  %v4365_v58 = vmul.f32 -1.442695, %v2517_v3  ;;  %v2525_v48 = vadd.f32 %v8916_v50, %v8383_v41  ;;  %v5296_v31 = vpop.eup %5295 }
 0x27e   :  { %5313 = vrcp.f32 %v2965_v28  ;;  %v3644_v9 = vsel %vm3461_vm3, %v3643_v26, %v3639_v43  ;;  %v4300_v15 = vmul.f32 -1.442695, %v2452_v25  ;;  %v2516_v18 = vadd.f32 %v8916_v50, %v8423_v63  ;;  %v5298_v42 = vpop.eup %5297  ;;  %v2346_v60 = vpop.xlane.xlu0 %2345 }
 0x27f   :  { %5315 = vpow2.f32 %v4370_v17  ;;  %v5300_v5 = vpop.eup %5299  ;;  %v3027_v32 = vadd.f32 1.0, %v5294_v8  ;;  %v4373_v41 = vmul.f32 -1.442695, %v2525_v48  ;;  %v2463_v63 = vadd.f32 %v8916_v50, %v8421_v23 }
 0x280   :  { %5317 = vpow2.f32 %v4309_v54  ;;  %v5302_v3 = vpop.eup %5301  ;;  %v2962_v22 = vadd.f32 1.0, %v5300_v5  ;;  %v4364_v56 = vmul.f32 -1.442695, %v2516_v18  ;;  %v2519_v6 = vadd.f32 %v8916_v50, %v8459_v14 }
 0x281   :  { %5319 = vpow2.f32 %v4365_v58  ;;  %v5304_v52 = vpop.eup %5303  ;;  %v3653_v4 = vrot.slane %v5292_v44, %v9039_v53  ;;  %v2967_v37 = vadd.f32 1.0, %v5290_v1  ;;  %v2969_v34 = vadd.f32 1.0, %v5296_v31 }
 0x282   :  { %5321 = vpow2.f32 %v4300_v15  ;;  %v3648_v25 = vrot.slane %v5304_v52, %v9047_v0  ;;  %v2454_v12 = vadd.f32 %v8916_v50, %v2154_v47  ;;  %v2971_v61 = vadd.f32 1.0, %v5298_v42  ;;  %v8526_v14 = vpop.xlane.xlu1 %2378 }
 0x283   :  { %v5306_v39 = vpop.eup %5305  ;;  %5323 = vrcp.f32 %v2962_v22  ;;  %v3035_v44 = vadd.f32 1.0, %v5302_v3  ;;  %v2527_v54 = vadd.f32 %v8916_v50, %v8457_v13  ;;  %v4367_v8 = vmul.f32 -1.442695, %v2519_v6 }
 0x284   :  { %v5308_v62 = vpop.eup %5307  ;;  %5325 = vrcp.f32 %v3027_v32  ;;  %v3649_v11 = vsel %vm3468_vm4, %v3648_v25, %v3644_v9  ;;  %v2355_v35 = vpop.xlane.xlu0 %2354  ;;  %v3969_v1 = vrot.slane %v5306_v39, %v9039_v53  ;;  %v4302_v48 = vmul.f32 -1.442695, %v2454_v12 }
 0x285   :  { %v5310_v49 = vpop.eup %5309  ;;  %v3026_v19 = vadd.f32 1.0, %v5308_v62  ;;  %5327 = vpow2.f32 %v4373_v41  ;;  %v3654_v23 = vsel %vm3475_vm5, %v3653_v4, %v3649_v11  ;;  %v2518_v31 = vadd.f32 %v8916_v50, %v2346_v60 }
 0x286   :  { %v3964_v28 = vrot.slane %v5310_v49, %v9047_v0  ;;  %5329 = vpow2.f32 %v4364_v56  ;;  %v5312_v17 = vpop.eup %5311  ;;  %v4311_v15 = vmul.f32 -1.442695, %v2463_v63  ;;  %v4375_v5 = vmul.f32 -1.442695, %v2527_v54  ;;  %v2376_v13 = vpop.xlane.xlu1 %2375 }
 0x287   :  { %5331 = vrcp.f32 %v3026_v19  ;;  %v4366_v41 = vmul.f32 -1.442695, %v2518_v31  ;;  %v2465_v39 = vadd.f32 %v8916_v50, %v8514_v55  ;;  %v3663_v63 = vrot.slane %v5312_v17, %v9050_v29 }
 0x288   :  { %v8529_v26 = vpop.eup %5313  ;;  %5333 = vrcp.f32 %v2967_v37  ;;  %v3965_v47 = vsel %vm3468_vm4, %v3964_v28, %v8477_v20  ;;  %v2526_v20 = vadd.f32 %v8916_v50, %v8496_v10  ;;  %v2521_v11 = vadd.f32 %v8916_v50, %v2355_v35 }
 0x289   :  { %v5316_v43 = vpop.eup %5315  ;;  %5335 = vrcp.f32 %v2969_v34  ;;  %v3970_v58 = vsel %vm3475_vm5, %v3969_v1, %v3965_v47  ;;  %v2160_v32 = vpop.xlane.xlu0 %2159  ;;  %v4313_v12 = vmul.f32 -1.442695, %v2465_v39  ;;  %vm4102_vm0 = vcmask 1042434  }
 0x28a   :  { %v5318_v9 = vpop.eup %5317  ;;  %5337 = vrcp.f32 %v2971_v61  ;;  %v3034_v62 = vadd.f32 1.0, %v5316_v43  ;;  %v4374_v4 = vmul.f32 -1.442695, %v2526_v20  ;;  %v4369_v31 = vmul.f32 -1.442695, %v2521_v11 }
 0x28b   :  { %v5320_v18 = vpop.eup %5319  ;;  %5339 = vrcp.f32 %v3035_v44  ;;  %v2973_v1 = vadd.f32 1.0, %v5318_v9  ;;  %v2456_v44 = vadd.f32 %v8916_v50, %v2160_v32 }
 0x28c   :  { %v5322_v42 = vpop.eup %5321  ;;  %5341 = vpow2.f32 %v4367_v8  ;;  %v3029_v56 = vadd.f32 1.0, %v5320_v18  ;;  %v2529_v8 = vadd.f32 %v8916_v50, %v8526_v14 }
 0x28d   :  { %v5324_v3 = vpop.eup %5323  ;;  %v2964_v22 = vadd.f32 1.0, %v5322_v42  ;;  %5343 = vpow2.f32 %v4302_v48  ;;  %v4304_v18 = vmul.f32 -1.442695, %v2456_v44 }
 0x28e   :  { %v5326_v52 = vpop.eup %5325  ;;  %v3658_v60 = vrot.slane %v5324_v3, %v9054_v21  ;;  %5345 = vpow2.f32 %v4311_v15  ;;  %v4377_v20 = vmul.f32 -1.442695, %v2529_v8 }
 0x28f   :  { %v5328_v25 = vpop.eup %5327  ;;  %5347 = vrcp.f32 %v2964_v22  ;;  %v2193_v28 = vpop.xlane.xlu1 %2192 }
 0x290   :  { %v5330_v6 = vpop.eup %5329  ;;  %v3659_v10 = vsel %vm3482_vm6, %v3658_v60, %v3654_v23  ;;  %5349 = vpow2.f32 %v4375_v5  ;;  %v3979_v23 = vrot.slane %v5326_v52, %v9050_v29  ;;  %v3037_v54 = vadd.f32 1.0, %v5328_v25 }
 0x291   :  { %v5332_v37 = vpop.eup %5331  ;;  %v3664_v34 = vsel %vm3489_vm7, %v3663_v63, %v3659_v10  ;;  %v3028_v49 = vadd.f32 1.0, %v5330_v6  ;;  %5351 = vpow2.f32 %v4366_v41  ;;  %v2528_v41 = vadd.f32 %v8916_v50, %v2376_v13 }
 0x292   :  { %v8546_v19 = vpop.eup %5333  ;;  %v3974_v55 = vrot.slane %v5332_v37, %v9054_v21  ;;  %5353 = vrcp.f32 %v3029_v56  ;;  %v2352_v61 = vpop.xlane.xlu0 %2351  ;;  %v3673_v25 = vrot.slane %v8529_v26, %v7530_v46  ;;  %v2467_v63 = vadd.f32 %v8916_v50, %v2193_v28 }
 0x293   :  { %v8549_v17 = vpop.eup %5335  ;;  %5355 = vrcp.f32 %v3028_v49  ;;  %v2520_v42 = vadd.f32 %v8916_v50, %v2352_v61  ;;  %v4376_v11 = vmul.f32 -1.442695, %v2528_v41 }
 0x294   :  { %v8553_v47 = vpop.eup %5337  ;;  %v3975_v35 = vsel %vm3482_vm6, %v3974_v55, %v3970_v58  ;;  %5357 = vpow2.f32 %v4374_v4 }
 0x295   :  { %v8558_v43 = vpop.eup %5339  ;;  %5359 = vrcp.f32 %v3034_v62  ;;  %v3980_v48 = vsel %vm3489_vm7, %v3979_v23, %v3975_v35  ;;  %v4368_v6 = vmul.f32 -1.442695, %v2520_v42 }
 0x296   :  { %v5342_v15 = vpop.eup %5341  ;;  %5361 = vpow2.f32 %v4313_v12  ;;  %v2385_v32 = vpop.xlane.xlu1 %2384 }
 0x297   :  { %v5344_v9 = vpop.eup %5343  ;;  %5363 = vrcp.f32 %v2973_v1  ;;  %v2166_v3 = vpop.xlane.xlu0 %2165  ;;  %v3031_v22 = vadd.f32 1.0, %v5342_v15  ;;  %v2531_v26 = vadd.f32 %v8916_v50, %v2385_v32  ;;  %v4315_v1 = vmul.f32 -1.442695, %v2467_v63 }
 0x298   :  { %v5346_v5 = vpop.eup %5345  ;;  %5365 = vrcp.f32 %v3037_v54  ;;  %v2966_v58 = vadd.f32 1.0, %v5344_v9  ;;  %v2458_v56 = vadd.f32 %v8916_v50, %v2166_v3 }
 0x299   :  { %v5348_v14 = vpop.eup %5347  ;;  %5367 = vpow2.f32 %v4369_v31  ;;  %v2975_v4 = vadd.f32 1.0, %v5346_v5  ;;  %v4379_v5 = vmul.f32 -1.442695, %v2531_v26 }
 0x29a   :  { %v5350_v52 = vpop.eup %5349  ;;  %v3668_v60 = vrot.slane %v5348_v14, %v7687_v27  ;;  %5369 = vrcp.f32 %v2966_v58  ;;  %v4306_v61 = vmul.f32 -1.442695, %v2458_v56 }
 0x29b   :  { %v5352_v39 = vpop.eup %5351  ;;  %5371 = vpow2.f32 %v4304_v18  ;;  %v3039_v54 = vadd.f32 1.0, %v5350_v52  ;;  %v3683_v52 = vrot.slane %v8546_v19, %v9032_v59 }
 0x29c   :  { %v5354_v10 = vpop.eup %5353  ;;  %v3669_v62 = vsel %vm3496_vm8, %v3668_v60, %v3664_v34  ;;  %v3030_v37 = vadd.f32 1.0, %v5352_v39  ;;  %5373 = vpow2.f32 %v4377_v20 }
 0x29d   :  { %v5356_v13 = vpop.eup %5355  ;;  %5375 = vrcp.f32 %v3031_v22  ;;  %v3674_v49 = vsel %vm3503_vm9, %v3673_v25, %v3669_v62  ;;  %v2382_v28 = vpop.xlane.xlu1 %2381  ;;  %v3989_v34 = vrot.slane %v5354_v10, %v7530_v46 }
 0x29e   :  { %v5358_v55 = vpop.eup %5357  ;;  %v3984_v12 = vrot.slane %v5356_v13, %v7687_v27  ;;  %5377 = vrcp.f32 %v3030_v37  ;;  %v2530_v15 = vadd.f32 %v8916_v50, %v2382_v28 }
 0x29f   :  { %v8572_v23 = vpop.eup %5359  ;;  %5379 = vpow2.f32 %v4368_v6  ;;  %v3038_v31 = vadd.f32 1.0, %v5358_v55  ;;  %v2172_v9 = vpop.xlane.xlu0 %2171 }
 0x2a0   :  { %v5362_v44 = vpop.eup %5361  ;;  %5381 = vrcp.f32 %v2975_v4  ;;  %v3985_v35 = vsel %vm3496_vm8, %v3984_v12, %v3980_v48  ;;  %v2460_v32 = vadd.f32 %v8916_v50, %v2172_v9  ;;  %v4378_v22 = vmul.f32 -1.442695, %v2530_v15 }
 0x2a1   :  { %v8576_v8 = vpop.eup %5363  ;;  %5383 = vpow2.f32 %v4376_v11  ;;  %v3990_v18 = vsel %vm3503_vm9, %v3989_v34, %v3985_v35  ;;  %v2977_v20 = vadd.f32 1.0, %v5362_v44 }
 0x2a2   :  { %v8580_v42 = vpop.eup %5365  ;;  %5385 = vpow2.f32 %v4306_v61  ;;  %v4308_v6 = vmul.f32 -1.442695, %v2460_v32 }
 0x2a3   :  { %v5368_v58 = vpop.eup %5367  ;;  %5387 = vpow2.f32 %v4315_v1 }
 0x2a4   :  { %v5370_v48 = vpop.eup %5369  ;;  %5389 = vrcp.f32 %v3039_v54  ;;  %v3033_v60 = vadd.f32 1.0, %v5368_v58  ;;  %v2199_v39 = vpop.xlane.xlu1 %2198 }
 0x2a5   :  { %v5372_v3 = vpop.eup %5371  ;;  %5391 = vrcp.f32 %v3038_v31  ;;  %v3678_v14 = vrot.slane %v5370_v48, %v9036_v33  ;;  %v2469_v19 = vadd.f32 %v8916_v50, %v2199_v39 }
 0x2a6   :  { %v5374_v41 = vpop.eup %5373  ;;  %v2968_v56 = vadd.f32 1.0, %v5372_v3  ;;  %5393 = vpow2.f32 %v4379_v5  ;;  %v2364_v4 = vpop.xlane.xlu0 %2363 }
 0x2a7   :  { %v5376_v25 = vpop.eup %5375  ;;  %v3679_v63 = vsel %vm3510_vm10, %v3678_v14, %v3674_v49  ;;  %5395 = vrcp.f32 %v2977_v20  ;;  %v2524_v11 = vadd.f32 %v8916_v50, %v2364_v4  ;;  %v3041_v1 = vadd.f32 1.0, %v5374_v41 }
 0x2a8   :  { %v5378_v10 = vpop.eup %5377  ;;  %v3684_v62 = vsel %vm3517_vm11, %v3683_v52, %v3679_v63  ;;  %5397 = vrcp.f32 %v2968_v56  ;;  %v3999_v12 = vrot.slane %v5376_v25, %v9032_v59  ;;  %v4317_v9 = vmul.f32 -1.442695, %v2469_v19 }
 0x2a9   :  { %v5380_v37 = vpop.eup %5379  ;;  %v3994_v13 = vrot.slane %v5378_v10, %v9036_v33  ;;  %5399 = vpow2.f32 %v4378_v22  ;;  %v4372_v61 = vmul.f32 -1.442695, %v2524_v11 }
 0x2aa   :  { %v8591_v55 = vpop.eup %5381  ;;  %5401 = vrcp.f32 %v3033_v60  ;;  %v3032_v49 = vadd.f32 1.0, %v5380_v37  ;;  %v2391_v44 = vpop.xlane.xlu1 %2390 }
 0x2ab   :  { %v5384_v26 = vpop.eup %5383  ;;  %5403 = vpow2.f32 %v4308_v6  ;;  %v3995_v28 = vsel %vm3510_vm10, %v3994_v13, %v3990_v18  ;;  %v2178_v35 = vpop.xlane.xlu0 %2177  ;;  %v2533_v5 = vadd.f32 %v8916_v50, %v2391_v44  ;;  %v3693_v13 = vrot.slane %v8549_v17, %v9046_v45 }
 0x2ac   :  { %v5386_v34 = vpop.eup %5385  ;;  %5405 = vrcp.f32 %v3032_v49  ;;  %v8596_v54 = vsel %vm3517_vm11, %v3999_v12, %v3995_v28  ;;  %v2462_v58 = vadd.f32 %v8916_v50, %v2178_v35  ;;  %v3040_v18 = vadd.f32 1.0, %v5384_v26 }
 0x2ad   :  { %v5388_v31 = vpop.eup %5387  ;;  %v2970_v15 = vadd.f32 1.0, %v5386_v34  ;;  %5407 = vpow2.f32 %v4372_v61  ;;  %v4381_v60 = vmul.f32 -1.442695, %v2533_v5 }
 0x2ae   :  { %v8600_v20 = vpop.eup %5389  ;;  %v4310_v48 = vmul.f32 -1.442695, %v2462_v58  ;;  %v2979_v14 = vadd.f32 1.0, %v5388_v31  ;;  %v2388_v22 = vpop.xlane.xlu1 %2387  ;;  %v3703_v31 = vrot.slane %v8553_v47, %v9071_v36 }
 0x2af   :  { %v8602_v32 = vpop.eup %5391  ;;  %5409 = vrcp.f32 %v2970_v15  ;;  %v2184_v41 = vpop.xlane.xlu0 %2183  ;;  %v2532_v56 = vadd.f32 %v8916_v50, %v2388_v22 }
 0x2b0   :  { %v5394_v3 = vpop.eup %5393  ;;  %5411 = vrcp.f32 %v3041_v1  ;;  %v2464_v39 = vadd.f32 %v8916_v50, %v2184_v41 }
 0x2b1   :  { %v8604_v52 = vpop.eup %5395  ;;  %5413 = vpow2.f32 %v4317_v9  ;;  %v3043_v10 = vadd.f32 1.0, %v5394_v3  ;;  %v4380_v19 = vmul.f32 -1.442695, %v2532_v56 }
 0x2b2   :  { %v5398_v25 = vpop.eup %5397  ;;  %5415 = vpow2.f32 %v4310_v48  ;;  %v4312_v4 = vmul.f32 -1.442695, %v2464_v39  ;;  %v2205_v11 = vpop.xlane.xlu1 %2204 }
 0x2b3   :  { %v5400_v63 = vpop.eup %5399  ;;  %5417 = vrcp.f32 %v3040_v18  ;;  %v3688_v6 = vrot.slane %v5398_v25, %v8149_v24  ;;  %v2190_v12 = vpop.xlane.xlu0 %2189  ;;  %v2471_v61 = vadd.f32 %v8916_v50, %v2205_v11  ;;  %v4014_v25 = vrot.slane %v8572_v23, %v8202_v51 }
 0x2b4   :  { %v5402_v37 = vpop.eup %5401  ;;  %5419 = vrcp.f32 %v2979_v14  ;;  %v2466_v34 = vadd.f32 %v8916_v50, %v2190_v12  ;;  %v3042_v17 = vadd.f32 1.0, %v5400_v63  ;;  %v4019_v63 = vrot.slane %v8558_v43, %v9071_v36 }
 0x2b5   :  { %v5404_v49 = vpop.eup %5403  ;;  %v3689_v26 = vsel %vm3524_vm12, %v3688_v6, %v3684_v62  ;;  %5421 = vpow2.f32 %v4381_v60  ;;  %v4009_v5 = vrot.slane %v5402_v37, %v9046_v45  ;;  %v4319_v48 = vmul.f32 -1.442695, %v2471_v61 }
 0x2b6   :  { %v5406_v28 = vpop.eup %5405  ;;  %5423 = vpow2.f32 %v4312_v4  ;;  %v3694_v1 = vsel %vm3531_vm13, %v3693_v13, %v3689_v26  ;;  %v4314_v62 = vmul.f32 -1.442695, %v2466_v34  ;;  %v2397_v15 = vpop.xlane.xlu1 %2396  ;;  %v2972_v60 = vadd.f32 1.0, %v5404_v49 }
 0x2b7   :  { %v4004_v44 = vrot.slane %v5406_v28, %v8149_v24  ;;  %5425 = vrcp.f32 %v3043_v10  ;;  %v5408_v35 = vpop.eup %5407  ;;  %v2196_v9 = vpop.xlane.xlu0 %2195  ;;  %v2535_v3 = vadd.f32 %v8916_v50, %v2397_v15 }
 0x2b8   :  { %5427 = vpow2.f32 %v4380_v19  ;;  %v3036_v18 = vadd.f32 1.0, %v5408_v35  ;;  %v2468_v14 = vadd.f32 %v8916_v50, %v2196_v9 }
 0x2b9   :  { %v5410_v58 = vpop.eup %5409  ;;  %5429 = vpow2.f32 %v4314_v62  ;;  %v4005_v47 = vsel %vm3524_vm12, %v4004_v44, %v8596_v54  ;;  %v4383_v39 = vmul.f32 -1.442695, %v2535_v3 }
 0x2ba   :  { %v8621_v22 = vpop.eup %5411  ;;  %v3698_v41 = vrot.slane %v5410_v58, %v8202_v51  ;;  %5431 = vrcp.f32 %v3042_v17  ;;  %v4316_v10 = vmul.f32 -1.442695, %v2468_v14  ;;  %v2394_v4 = vpop.xlane.xlu1 %2393  ;;  %v4010_v19 = vsel %vm3531_vm13, %v4009_v5, %v4005_v47 }
 0x2bb   :  { %v5414_v56 = vpop.eup %5413  ;;  %5433 = vrcp.f32 %v3036_v18  ;;  %v2202_v37 = vpop.xlane.xlu0 %2201  ;;  %v2534_v12 = vadd.f32 %v8916_v50, %v2394_v4  ;;  %v4015_v61 = vsel %vm3538_vm14, %v4014_v25, %v4010_v19 }
 0x2bc   :  { %v5416_v6 = vpop.eup %5415  ;;  %v3699_v13 = vsel %vm3538_vm14, %v3698_v41, %v3694_v1  ;;  %5435 = vpow2.f32 %v4319_v48  ;;  %v2470_v23 = vadd.f32 %v8916_v50, %v2202_v37  ;;  %v2981_v43 = vadd.f32 1.0, %v5414_v56 }
 0x2bd   :  { %v8632_v11 = vpop.eup %5417  ;;  %v2974_v54 = vadd.f32 1.0, %v5416_v6  ;;  %5437 = vrcp.f32 %v2972_v60  ;;  %v3704_v26 = vsel %vm3545_vm15, %v3703_v31, %v3699_v13  ;;  %v4382_v34 = vmul.f32 -1.442695, %v2534_v12 }
 0x2be   :  { %v8636_v49 = vpop.eup %5419  ;;  %5439 = vpow2.f32 %v4383_v39  ;;  %v8641_v1 = vsel %vm3545_vm15, %v4019_v63, %v4015_v61  ;;  %v4318_v17 = vmul.f32 -1.442695, %v2470_v23  ;;  %v2211_v35 = vpop.xlane.xlu1 %2210  ;;  %v8645_v15 = vsel %vm4102_vm0, %v3704_v26, %v8501_v40 }
 0x2bf   :  { %v5422_v28 = vpop.eup %5421  ;;  %5441 = vpow2.f32 %v4316_v10  ;;  %v2403_v62 = vpop.xlane.xlu0 %2402  ;;  %v2473_v5 = vadd.f32 %v8916_v50, %v2211_v35 }
 0x2c0   :  { %v5424_v44 = vpop.eup %5423  ;;  %5443 = vrcp.f32 %v2974_v54  ;;  %v3045_v18 = vadd.f32 1.0, %v5422_v28  ;;  %v2537_v14 = vadd.f32 %v8916_v50, %v2403_v62 }
 0x2c1   :  { %v8647_v9 = vpop.eup %5425  ;;  %v2976_v31 = vadd.f32 1.0, %v5424_v44  ;;  %5445 = vrcp.f32 %v2981_v43  ;;  %v4321_v48 = vmul.f32 -1.442695, %v2473_v5  ;;  %v4028_v44 = vrot.slane %v8580_v42, %v9057_v7 }
 0x2c2   :  { %v5428_v58 = vpop.eup %5427  ;;  %5447 = vpow2.f32 %v4382_v34  ;;  %v2400_v41 = vpop.xlane.xlu1 %2399  ;;  %v4385_v13 = vmul.f32 -1.442695, %v2537_v14 }
 0x2c3   :  { %v5430_v3 = vpop.eup %5429  ;;  %5449 = vpow2.f32 %v4318_v17  ;;  %v2208_v60 = vpop.xlane.xlu0 %2207  ;;  %v2536_v56 = vadd.f32 %v8916_v50, %v2400_v41  ;;  %v3044_v63 = vadd.f32 1.0, %v5428_v58 }
 0x2c4   :  { %v8651_v47 = vpop.eup %5431  ;;  %5451 = vrcp.f32 %v2976_v31  ;;  %v2978_v40 = vadd.f32 1.0, %v5430_v3  ;;  %v2472_v39 = vadd.f32 %v8916_v50, %v2208_v60  ;;  %v4033_v31 = vrot.slane %v8602_v32, %v9055_v2 }
 0x2c5   :  { %v5434_v25 = vpop.eup %5433  ;;  %5453 = vpow2.f32 %v4321_v48  ;;  %v4384_v10 = vmul.f32 -1.442695, %v2536_v56 }
 0x2c6   :  { %v5436_v6 = vpop.eup %5435  ;;  %5455 = vrcp.f32 %v3045_v18  ;;  %v4320_v4 = vmul.f32 -1.442695, %v2472_v39  ;;  %v2217_v19 = vpop.xlane.xlu1 %2216  ;;  %v4024_v23 = vrot.slane %v5434_v25, %v9051_v57  ;;  %v3712_v39 = vrot.slane %v8576_v8, %v9057_v7 }
 0x2c7   :  { %v5438_v37 = vpop.eup %5437  ;;  %5457 = vrcp.f32 %v2978_v40  ;;  %v2214_v54 = vpop.xlane.xlu0 %2213  ;;  %v2475_v43 = vadd.f32 %v8916_v50, %v2217_v19  ;;  %v2983_v61 = vadd.f32 1.0, %v5436_v6 }
 0x2c8   :  { %v5440_v12 = vpop.eup %5439  ;;  %5459 = vpow2.f32 %v4384_v10  ;;  %v2474_v28 = vadd.f32 %v8916_v50, %v2214_v54  ;;  %v3708_v3 = vrot.slane %v5438_v37, %v9051_v57  ;;  %v4029_v14 = vsel %vm3447_vm1, %v4028_v44, %v4024_v23 }
 0x2c9   :  { %v5442_v26 = vpop.eup %5441  ;;  %5461 = vrcp.f32 %v3044_v63  ;;  %v4323_v35 = vmul.f32 -1.442695, %v2475_v43  ;;  %v3047_v40 = vadd.f32 1.0, %v5440_v12  ;;  %v4034_v6 = vsel %vm3454_vm2, %v4033_v31, %v4029_v14 }
 0x2ca   :  { %v5444_v34 = vpop.eup %5443  ;;  %v2980_v17 = vadd.f32 1.0, %v5442_v26  ;;  %5463 = vpow2.f32 %v4320_v4  ;;  %v4322_v5 = vmul.f32 -1.442695, %v2474_v28  ;;  %v2409_v58 = vpop.xlane.xlu1 %2408  ;;  %v3713_v37 = vsel %vm3447_vm1, %v3712_v39, %v3708_v3 }
 0x2cb   :  { %v8660_v62 = vpop.eup %5445  ;;  %5465 = vpow2.f32 %v4385_v13  ;;  %v2406_v18 = vpop.xlane.xlu0 %2405  ;;  %v2539_v42 = vadd.f32 %v8916_v50, %v2409_v58  ;;  %v3717_v60 = vrot.slane %v5444_v34, %v9055_v2  ;;  %v4038_v2 = vrot.slane %v8600_v20, %v9038_v38 }
 0x2cc   :  { %v5448_v48 = vpop.eup %5447  ;;  %5467 = vrcp.f32 %v2980_v17  ;;  %v2538_v56 = vadd.f32 %v8916_v50, %v2406_v18  ;;  %v3722_v54 = vrot.slane %v8591_v55, %v9038_v38  ;;  %v4043_v20 = vrot.slane %v8632_v11, %v9047_v0 }
 0x2cd   :  { %v5450_v41 = vpop.eup %5449  ;;  %5469 = vrcp.f32 %v2983_v61  ;;  %v4387_v63 = vmul.f32 -1.442695, %v2539_v42  ;;  %v3046_v50 = vadd.f32 1.0, %v5448_v48  ;;  %v3718_v7 = vsel %vm3454_vm2, %v3717_v60, %v3713_v37 }
 0x2ce   :  { %v5452_v32 = vpop.eup %5451  ;;  %v2982_v25 = vadd.f32 1.0, %v5450_v41  ;;  %5471 = vpow2.f32 %v4323_v35  ;;  %v4386_v10 = vmul.f32 -1.442695, %v2538_v56  ;;  %v4039_v12 = vsel %vm3461_vm3, %v4038_v2, %v4034_v6 }
 0x2cf   :  { %v5454_v57 = vpop.eup %5453  ;;  %5473 = vpow2.f32 %v4322_v5  ;;  %v3727_v8 = vrot.slane %v5452_v32, %v9047_v0  ;;  %v3723_v61 = vsel %vm3461_vm3, %v3722_v54, %v3718_v7  ;;  %v4044_v44 = vsel %vm3468_vm4, %v4043_v20, %v4039_v12 }
 0x2d0   :  { %v8672_v4 = vpop.eup %5455  ;;  %5475 = vrcp.f32 %v2982_v25  ;;  %v2985_v23 = vadd.f32 1.0, %v5454_v57  ;;  %v3732_v31 = vrot.slane %v8604_v52, %v9039_v53  ;;  %v4048_v0 = vrot.slane %v8621_v22, %v9039_v53 }
 0x2d1   :  { %v5458_v13 = vpop.eup %5457  ;;  %5477 = vrcp.f32 %v3047_v40  ;;  %v3728_v17 = vsel %vm3468_vm4, %v3727_v8, %v3723_v61  ;;  %v4053_v58 = vrot.slane %v8651_v47, %v9054_v21  ;;  %v3742_v22 = vrot.slane %v8636_v49, %v9050_v29 }
 0x2d2   :  { %v5460_v19 = vpop.eup %5459  ;;  %5479 = vpow2.f32 %v4387_v63  ;;  %v3737_v38 = vrot.slane %v5458_v13, %v9054_v21  ;;  %v3733_v18 = vsel %vm3475_vm5, %v3732_v31, %v3728_v17  ;;  %v4049_v48 = vsel %vm3475_vm5, %v4048_v0, %v4044_v44 }
 0x2d3   :  { %v5462_v43 = vpop.eup %5461  ;;  %5481 = vpow2.f32 %v4386_v10  ;;  %v3048_v28 = vadd.f32 1.0, %v5460_v19  ;;  %v4054_v21 = vsel %vm3482_vm6, %v4053_v58, %v4049_v48  ;;  %v4058_v56 = vrot.slane %v8647_v9, %v9050_v29 }
 0x2d4   :  { %v5464_v26 = vpop.eup %5463  ;;  %5483 = vrcp.f32 %v3046_v50  ;;  %v3738_v14 = vsel %vm3482_vm6, %v3737_v38, %v3733_v18  ;;  %v4063_v32 = vrot.slane %v5462_v43, %v7687_v27  ;;  %v3752_v10 = vrot.slane %v8660_v62, %v7530_v46 }
 0x2d5   :  { %v5466_v34 = vpop.eup %5465  ;;  %v2984_v55 = vadd.f32 1.0, %v5464_v26  ;;  %5485 = vrcp.f32 %v2985_v23  ;;  %v3743_v39 = vsel %vm3489_vm7, %v3742_v22, %v3738_v14  ;;  %v4059_v37 = vsel %vm3489_vm7, %v4058_v56, %v4054_v21 }
 0x2d6   :  { %v5468_v35 = vpop.eup %5467  ;;  %v3049_v42 = vadd.f32 1.0, %v5466_v34  ;;  %v4064_v7 = vsel %vm3496_vm8, %v4063_v32, %v4059_v37  ;;  %v4068_v19 = vrot.slane %v8672_v4, %v7530_v46  ;;  %vm4104_vm1 = vcmask 1043459  }
 0x2d7   :  { %v5470_v11 = vpop.eup %5469  ;;  %5487 = vrcp.f32 %v2984_v55  ;;  %v3747_v52 = vrot.slane %v5468_v35, %v7687_v27  ;;  %vm4106_vm2 = vcmask 1044484   ;;  %vm4108_vm3 = vcmask 1045509  }
 0x2d8   :  { %v5472_v5 = vpop.eup %5471  ;;  %5489 = vrcp.f32 %v3048_v28  ;;  %v3762_v62 = vrot.slane %v5470_v11, %v9032_v59  ;;  %v4069_v23 = vsel %vm3503_vm9, %v4068_v19, %v4064_v7  ;;  %vm4110_vm4 = vcmask 1046534  }
 0x2d9   :  { %v5474_v3 = vpop.eup %5473  ;;  %v2987_v41 = vadd.f32 1.0, %v5472_v5  ;;  %v3748_v63 = vsel %vm3496_vm8, %v3747_v52, %v3743_v39  ;;  %vm4112_vm5 = vcmask 1047559  }
 0x2da   :  { %v5476_v53 = vpop.eup %5475  ;;  %v2986_v60 = vadd.f32 1.0, %v5474_v3  ;;  %v3753_v27 = vsel %vm3503_vm9, %v3752_v10, %v3748_v63 }
 0x2db   :  { %v5478_v40 = vpop.eup %5477  ;;  %5491 = vrcp.f32 %v2987_v41  ;;  %v3757_v57 = vrot.slane %v5476_v53, %v9036_v33 }
 0x2dc   :  { %v5480_v47 = vpop.eup %5479  ;;  %5493 = vrcp.f32 %v2986_v60  ;;  %v4078_v28 = vrot.slane %v5478_v40, %v9032_v59 }
 0x2dd   :  { %v5482_v25 = vpop.eup %5481  ;;  %5495 = vrcp.f32 %v3049_v42  ;;  %v3051_v49 = vadd.f32 1.0, %v5480_v47  ;;  %v3758_v13 = vsel %vm3510_vm10, %v3757_v57, %v3753_v27 }
 0x2de   :  { %v5484_v6 = vpop.eup %5483  ;;  %v3050_v2 = vadd.f32 1.0, %v5482_v25  ;;  %v3763_v12 = vsel %vm3517_vm11, %v3762_v62, %v3758_v13 }
 0x2df   :  { %5497 = vrcp.f32 %v3051_v49  ;;  %v5486_v29 = vpop.eup %5485  ;;  %v4073_v50 = vrot.slane %v5484_v6, %v9036_v33 }
 0x2e0   :  { %5499 = vrcp.f32 %v3050_v2  ;;  %v3772_v46 = vrot.slane %v5486_v29, %v9046_v45 }
 0x2e1   :  { %v5488_v9 = vpop.eup %5487  ;;  %v4074_v33 = vsel %vm3510_vm10, %v4073_v50, %v4069_v23 }
 0x2e2   :  { %v5490_v8 = vpop.eup %5489  ;;  %v3767_v54 = vrot.slane %v5488_v9, %v8149_v24  ;;  %v4079_v38 = vsel %vm3517_vm11, %v4078_v28, %v4074_v33 }
 0x2e3   :  { %v4083_v26 = vrot.slane %v5490_v8, %v8149_v24 }
 0x2e4   :  { %v3768_v20 = vsel %vm3524_vm12, %v3767_v54, %v3763_v12 }
 0x2e5   :  { %v5492_v43 = vpop.eup %5491  ;;  %v3773_v17 = vsel %vm3531_vm13, %v3772_v46, %v3768_v20  ;;  %v4084_v24 = vsel %vm3524_vm12, %v4083_v26, %v4079_v38 }
 0x2e6   :  { %v5494_v61 = vpop.eup %5493  ;;  %v3782_v4 = vrot.slane %v5492_v43, %v9071_v36 }
 0x2e7   :  { %v5496_v34 = vpop.eup %5495  ;;  %v3777_v44 = vrot.slane %v5494_v61, %v8202_v51 }
 0x2e8   :  { %v4088_v0 = vrot.slane %v5496_v34, %v9046_v45 }
 0x2e9   :  { %v5498_v55 = vpop.eup %5497  ;;  %v3778_v35 = vsel %vm3538_vm14, %v3777_v44, %v3773_v17 }
 0x2ea   :  { %v5500_v31 = vpop.eup %5499  ;;  %v3783_v59 = vsel %vm3545_vm15, %v3782_v4, %v3778_v35  ;;  %v4098_v11 = vrot.slane %v5498_v55, %v9071_v36  ;;  %v4089_v18 = vsel %vm3531_vm13, %v4088_v0, %v4084_v24 }
 0x2eb   :  { %v4093_v5 = vrot.slane %v5500_v31, %v8202_v51  ;;  %v4105_v58 = vsel %vm4104_vm1, %v3783_v59, %v8645_v15 }
 0x2ec   :  { %v4107_v48 = vsel %vm4106_vm2, %v8426_v30, %v4105_v58 }
 0x2ed   :  { %v4094_v3 = vsel %vm3538_vm14, %v4093_v5, %v4089_v18  ;;  %v4109_v14 = vsel %vm4108_vm3, %v8505_v16, %v4107_v48 }
 0x2ee   :  { %v4099_v45 = vsel %vm3545_vm15, %v4098_v11, %v4094_v3  ;;  %v4111_v36 = vsel %vm4110_vm4, %v8641_v1, %v4109_v14 }
 0x2ef   :  { %v4113_v51 = vsel %vm4112_vm5, %v4099_v45, %v4111_v36 }
 0x2f0   :  { %4115 = vst [vmem:[#allocation3] sm:$0xff] %v4113_v51 }
 0x2f1   :  { %5518 = shalt.err (!%p5515_p4)
}
 0x2f2   :  { %s5519_s15 = scalar_lea.hbm %s8759_s5, 128 }
 0x2f3   :  { %p5520_p5 = scmp.ne.s32.totalorder %s8759_s5, %s5519_s15  ;;  %p5523_p6 = scmp.lt.u32.totalorder %s5519_s15, %s8759_s5 }
 0x2f5   :  { %p5525_p7 = pnand %p5523_p6, %p5520_p5 }
 0x2f7   :  { %5528 = shalt.err (!%p5525_p7)
}
 0x2f8   :  { %4125 = dma.vmem_to_hbm [thread:$0]  %s4123_s11, 128, %s8759_s5, [#allocation4]  }
 0x2f9   :  { %5529 = dma.done.wait [#allocation4], 128  }
 0x2fa   :  { %5530 = vsyncadd [#allocation4], 4294967168 }
 0x2fb   :  { %4129 = vsyncpa [#allocation4], 1 }

</bundles_post_ra>
